<compile_context>
chip_gen: v7x
topology: tpu7x:2x2x1
jax: 0.10.0
libtpu: 0.0.40
codegen_flags: <defaults>
</compile_context>

<pallas_src>
import math
import numpy as np
import jax
import jax.numpy as jnp
from jax.experimental import pallas as pl
from jax.experimental.pallas import tpu as pltpu

DIM = 4                       # output_dim
HIDDEN = 32                   # hidden_dim (also dim_feedforward per the spec)
MAX_N = 8                     # ctor max_n -> number of size classes = MAX_N + 1
N_CLASSES = MAX_N + 1
D_MODEL = DIM + HIDDEN        # transformer d_model = 36
N_HEADS = 2
HEAD_DIM = D_MODEL // N_HEADS # 18
N_LAYERS = 3
LN_EPS = 1e-5
B = 2                         # batch
T = MAX_N                     # static (padded) token dim; true length n[b] <= MAX_N
M = B * T                     # flat rows (batch folded into sublanes)
OUT_PAD = 128                 # lane-dense padded output width
NEG_INF = -1e9
SCALE = 1.0 / math.sqrt(HEAD_DIM)
BF16 = jnp.bfloat16


# --------------------------------------------------------------------------- fused kernel
def _decoder_kernel(
    z_ref, eps_ref,
    bmap_ref, bmapT_ref, tcol_ref, cls_ref, eye_ref,
    mu_ref, sigma_ref,
    w1_ref, b1_ref, w2_ref, b2_ref,
    wqkv_ref, bqkv_ref, wo_ref, bo_ref,
    wf1_ref, bf1_ref, wf2_ref, bf2_ref,
    g1_ref, be1_ref, g2_ref, be2_ref,
    wc_ref, bc_ref,
    out_ref,
):
    z_pad = z_ref[...]                                                   # (B, D_MODEL) f32, z in cols DIM:
    bmap = bmap_ref[...]                                                 # (M, B) one-hot batch map

    # ---- size_pred MLP -> logits (bf16 matmuls, f32 accumulation) ----
    z_bf = z_pad.astype(BF16)
    h = jnp.maximum(
        jnp.dot(z_bf, w1_ref[...], preferred_element_type=jnp.float32) + b1_ref[...], 0.0)
    logits = (jnp.dot(h.astype(BF16), w2_ref[...], preferred_element_type=jnp.float32)
              + b2_ref[...])                                             # (B, N_CLASSES) f32

    # ---- n = argmax(logits) (first max index), kept as float (B, 1) ----
    mx = jnp.max(logits, axis=-1, keepdims=True)
    cand = jnp.where(logits >= mx, cls_ref[...], float(N_CLASSES))
    n_f = jnp.min(cand, axis=-1, keepdims=True)                          # (B, 1)

    # ---- key-padding / block-diagonal attention bias via ONE matmul ----
    key_ok = jnp.where((tcol_ref[...] < n_f) & (bmapT_ref[...] > 0.5), 1.0, 0.0)  # (B, M)
    allow = jnp.dot(bmap, key_ok, preferred_element_type=jnp.float32)    # (M, M)
    bias = jnp.where(allow > 0.5, 0.0, NEG_INF)                          # (M, M)
    # row validity == diagonal of allow (slot(m) < n[batch(m)])
    valid_row = jnp.sum(allow * eye_ref[...], axis=-1, keepdims=True) > 0.5  # (M, 1)

    # ---- build x0z (no placement matmuls: operands are pre-placed 36-wide) ----
    x0_part = mu_ref[...] + jnp.abs(sigma_ref[...]) * eps_ref[...]       # (M, D_MODEL), cols 0:4 live
    z_rep = jnp.dot(bmap, z_pad, preferred_element_type=jnp.float32)     # (M, D_MODEL), cols 4:36 live
    x = jnp.where(valid_row, x0_part + z_rep, 0.0)                       # (M, D_MODEL)

    # ---- 3x TransformerEncoderLayer (post-norm, relu, dropout = eval identity) ----
    for l in range(N_LAYERS):
        x_bf = x.astype(BF16)
        # fused QKV: one (M,36)x(36,108) matmul; heads are static lane slices
        qkv = (jnp.dot(x_bf, wqkv_ref[l], preferred_element_type=jnp.float32)
               + bqkv_ref[l])                                            # (M, 6*HEAD_DIM)
        acc = None
        for hd in range(N_HEADS):
            base = hd * 3 * HEAD_DIM
            qh = qkv[:, base:base + HEAD_DIM]
            kh = qkv[:, base + HEAD_DIM:base + 2 * HEAD_DIM]
            vh = qkv[:, base + 2 * HEAD_DIM:base + 3 * HEAD_DIM]
            s = jax.lax.dot_general(qh.astype(BF16), kh.astype(BF16),
                                    (((1,), (1,)), ((), ())),
                                    preferred_element_type=jnp.float32) * SCALE + bias
            s = s - jnp.max(s, axis=-1, keepdims=True)
            p = jnp.exp(s)
            p = p * pl.reciprocal(jnp.sum(p, axis=-1, keepdims=True), approx=True)
            ho = jnp.dot(p.astype(BF16), vh.astype(BF16),
                         preferred_element_type=jnp.float32)             # (M, HEAD_DIM)
            c = jnp.dot(ho.astype(BF16), wo_ref[l * N_HEADS + hd],
                        preferred_element_type=jnp.float32)              # (M, D_MODEL)
            acc = c if acc is None else acc + c
        attn = acc + bo_ref[l]

        # residual + LayerNorm 1 (decoupled reductions; vector math f32)
        y = x + attn
        m1 = jnp.mean(y, axis=-1, keepdims=True)
        ms1 = jnp.mean(y * y, axis=-1, keepdims=True)
        y = (y - m1) * jax.lax.rsqrt(ms1 - m1 * m1 + LN_EPS) * g1_ref[l] + be1_ref[l]

        # feed-forward (relu)
        y_bf = y.astype(BF16)
        hf = jnp.maximum(
            jnp.dot(y_bf, wf1_ref[l], preferred_element_type=jnp.float32) + bf1_ref[l], 0.0)
        f = (jnp.dot(hf.astype(BF16), wf2_ref[l], preferred_element_type=jnp.float32)
             + bf2_ref[l])

        # residual + LayerNorm 2
        y2 = y + f
        m2 = jnp.mean(y2, axis=-1, keepdims=True)
        ms2 = jnp.mean(y2 * y2, axis=-1, keepdims=True)
        x = (y2 - m2) * jax.lax.rsqrt(ms2 - m2 * m2 + LN_EPS) * g2_ref[l] + be2_ref[l]

    # ---- Conv1d(k=1) == pointwise matmul; single lane-dense (M,128) output slab ----
    out_ref[...] = (jnp.dot(x.astype(BF16), wc_ref[...], preferred_element_type=jnp.float32)
                    + bc_ref[...])
    # fold the size_pred logits into spare columns of the slab (cols DIM:DIM+N_CLASSES,
    # rows 0:B) — those columns are zero-padded conv channels, so nothing is clobbered.
    out_ref[0:B, DIM:DIM + N_CLASSES] = logits


def decoder_forward(z, eps_pad, consts, mu_pad, sigma_pad, size_mlp, layer_stacks, conv):
    # XLA-side pad (free): place z into cols DIM:D_MODEL of a 36-wide buffer.
    z_pad = jnp.pad(z, ((0, 0), (DIM, 0)))
    args = (z_pad, eps_pad, *consts, mu_pad, sigma_pad, *size_mlp, *layer_stacks, *conv)
    return pl.pallas_call(
        _decoder_kernel,
        out_shape=jax.ShapeDtypeStruct((M, OUT_PAD), jnp.float32),
        in_specs=[pl.BlockSpec(memory_space=pltpu.MemorySpace.VMEM)] * len(args),
        out_specs=pl.BlockSpec(memory_space=pltpu.MemorySpace.VMEM),
    )(*args)


# --------------------------------------------------------------------------- main
if __name__ == "__main__":
    key = jax.random.PRNGKey(0)
    ks = jax.random.split(key, 24)

    z = jax.random.normal(ks[0], (B, HIDDEN), jnp.float32)
    eps = jax.random.normal(ks[1], (M, DIM), jnp.float32)     # one Normal sample per (b, slot)

    # ---- size_pred MLP params (class-0 bias pushed down so predicted sizes > 0) ----
    w1 = jax.random.normal(ks[2], (HIDDEN, HIDDEN), jnp.float32) * 0.1
    # extend w1 to take the 36-wide z_pad directly (rows 0:DIM are zero)
    w1_ext = jnp.zeros((D_MODEL, HIDDEN), jnp.float32).at[DIM:, :].set(w1).astype(BF16)
    b1 = jnp.zeros((1, HIDDEN), jnp.float32)
    w2 = (jax.random.normal(ks[3], (HIDDEN, N_CLASSES), jnp.float32) * 0.1).astype(BF16)
    b2 = jnp.concatenate([jnp.full((1, 1), -100.0),
                          jnp.zeros((1, N_CLASSES - 1))], axis=1).astype(jnp.float32)

    init_mu = jax.random.normal(ks[4], (1, DIM), jnp.float32)
    init_sigma = jax.random.uniform(ks[5], (1, DIM), jnp.float32)
    # pre-place mu / sigma / eps into cols 0:DIM of 36-wide buffers (no in-kernel placement matmuls)
    mu_pad = jnp.zeros((1, D_MODEL), jnp.float32).at[:, :DIM].set(init_mu)
    sigma_pad = jnp.zeros((1, D_MODEL), jnp.float32).at[:, :DIM].set(init_sigma)
    eps_pad = jnp.zeros((M, D_MODEL), jnp.float32).at[:, :DIM].set(eps)

    # ---- host-built static constants (batch map, slot indices, class ids, identity) ----
    bmap_np = np.zeros((M, B), np.float32)
    for m in range(M):
        bmap_np[m, m // T] = 1.0
    bmapT_np = np.ascontiguousarray(bmap_np.T)
    tcol_np = (np.arange(M) % T).astype(np.float32).reshape(1, M)
    cls_np = np.arange(N_CLASSES, dtype=np.float32).reshape(1, N_CLASSES)
    eye_np = np.eye(M, dtype=np.float32)
    consts = tuple(jnp.asarray(a) for a in (bmap_np, bmapT_np, tcol_np, cls_np, eye_np))

    # ---- transformer layer params: QKV fused per layer, wo per head, all stacked ----
    wqkv_l, bqkv_l, wo_l, bo_l = [], [], [], []
    wf1_l, bf1_l, wf2_l, bf2_l = [], [], [], []
    g1_l, be1_l, g2_l, be2_l = [], [], [], []
    for l in range(N_LAYERS):
        kk = jax.random.split(ks[6 + l], 8)
        cols = []
        for hd in range(N_HEADS):
            cols.append(jax.random.normal(jax.random.fold_in(kk[0], hd), (D_MODEL, HEAD_DIM)) * 0.1)  # q
            cols.append(jax.random.normal(jax.random.fold_in(kk[1], hd), (D_MODEL, HEAD_DIM)) * 0.1)  # k
            cols.append(jax.random.normal(jax.random.fold_in(kk[2], hd), (D_MODEL, HEAD_DIM)) * 0.1)  # v
            wo_l.append(jax.random.normal(jax.random.fold_in(kk[3], hd), (HEAD_DIM, D_MODEL)) * 0.1)
        wqkv_l.append(jnp.concatenate(cols, axis=1))                    # (36, 108)
        bqkv_l.append(jnp.zeros((1, 3 * D_MODEL)))
        bo_l.append(jnp.zeros((1, D_MODEL)))
        wf1_l.append(jax.random.normal(kk[4], (D_MODEL, HIDDEN)) * 0.1)  # dim_feedforward = hidden_dim
        bf1_l.append(jnp.zeros((1, HIDDEN)))
        wf2_l.append(jax.random.normal(kk[5], (HIDDEN, D_MODEL)) * 0.1)
        bf2_l.append(jnp.zeros((1, D_MODEL)))
        g1_l.append(jnp.ones((1, D_MODEL)));  be1_l.append(jnp.zeros((1, D_MODEL)))
        g2_l.append(jnp.ones((1, D_MODEL)));  be2_l.append(jnp.zeros((1, D_MODEL)))

    stack_bf = lambda xs: jnp.stack([a.astype(BF16) for a in xs], axis=0)
    stack_f32 = lambda xs: jnp.stack([a.astype(jnp.float32) for a in xs], axis=0)
    layer_stacks = (stack_bf(wqkv_l), stack_f32(bqkv_l),
                    stack_bf(wo_l),   stack_f32(bo_l),
                    stack_bf(wf1_l),  stack_f32(bf1_l),
                    stack_bf(wf2_l),  stack_f32(bf2_l),
                    stack_f32(g1_l),  stack_f32(be1_l),
                    stack_f32(g2_l),  stack_f32(be2_l))

    # ---- Conv1d(k=1) weights, transposed and lane-padded to 128 output channels ----
    wc_full = jax.random.normal(ks[20], (D_MODEL, DIM), jnp.float32) * 0.1
    wc_pad = jnp.zeros((D_MODEL, OUT_PAD), jnp.float32).at[:, :DIM].set(wc_full).astype(BF16)
    bc_pad = jnp.zeros((1, OUT_PAD), jnp.float32)

    # ---- single fused forward pass (one pallas_call, one end-of-pipeline sync) ----
    out = jax.block_until_ready(
        decoder_forward(z, eps_pad, consts, mu_pad, sigma_pad,
                        (w1_ext, b1, w2, b2), layer_stacks, (wc_pad, bc_pad)))

    # ---- final (dynamic-shape) extraction on host, matching the PyTorch indexing ----
    out_np = np.asarray(out)                                    # (B*T, 128)
    logits_np = out_np[:B, DIM:DIM + N_CLASSES]                 # folded logits
    n = np.argmax(logits_np, axis=-1).astype(np.int64)          # (B,)
    num_outputs = int(n.sum())
    mask = (np.arange(T)[None, :] < n[:, None])                 # (B, T)
    mask_flat = mask.reshape(-1)
    x_all = out_np[:, :DIM]                                     # (B*T, DIM)
    x = x_all[mask_flat]                                        # (num_outputs, DIM)
    batch = np.repeat(np.arange(B), n)                          # (num_outputs,)

    assert num_outputs > 0
    assert x.shape == (num_outputs, DIM)
    assert batch.shape == (num_outputs,)
    assert np.isfinite(x).all()
    assert np.isfinite(logits_np).all()
    print("KERNEL_OK")
</pallas_src>

<mosaic_0001>
module attributes {stable_mosaic.version = 11 : i64} {
  func.func @_decoder_kernel(%arg0: memref<2x36xf32, #tpu.memory_space<vmem>>, %arg1: memref<16x36xf32, #tpu.memory_space<vmem>>, %arg2: memref<16x2xf32, #tpu.memory_space<vmem>>, %arg3: memref<2x16xf32, #tpu.memory_space<vmem>>, %arg4: memref<1x16xf32, #tpu.memory_space<vmem>>, %arg5: memref<1x9xf32, #tpu.memory_space<vmem>>, %arg6: memref<16x16xf32, #tpu.memory_space<vmem>>, %arg7: memref<1x36xf32, #tpu.memory_space<vmem>>, %arg8: memref<1x36xf32, #tpu.memory_space<vmem>>, %arg9: memref<36x32xbf16, #tpu.memory_space<vmem>>, %arg10: memref<1x32xf32, #tpu.memory_space<vmem>>, %arg11: memref<32x9xbf16, #tpu.memory_space<vmem>>, %arg12: memref<1x9xf32, #tpu.memory_space<vmem>>, %arg13: memref<3x36x108xbf16, #tpu.memory_space<vmem>>, %arg14: memref<3x1x108xf32, #tpu.memory_space<vmem>>, %arg15: memref<6x18x36xbf16, #tpu.memory_space<vmem>>, %arg16: memref<3x1x36xf32, #tpu.memory_space<vmem>>, %arg17: memref<3x36x32xbf16, #tpu.memory_space<vmem>>, %arg18: memref<3x1x32xf32, #tpu.memory_space<vmem>>, %arg19: memref<3x32x36xbf16, #tpu.memory_space<vmem>>, %arg20: memref<3x1x36xf32, #tpu.memory_space<vmem>>, %arg21: memref<3x1x36xf32, #tpu.memory_space<vmem>>, %arg22: memref<3x1x36xf32, #tpu.memory_space<vmem>>, %arg23: memref<3x1x36xf32, #tpu.memory_space<vmem>>, %arg24: memref<3x1x36xf32, #tpu.memory_space<vmem>>, %arg25: memref<36x128xbf16, #tpu.memory_space<vmem>>, %arg26: memref<1x128xf32, #tpu.memory_space<vmem>>, %arg27: memref<16x128xf32, #tpu.memory_space<vmem>>) attributes {dimension_semantics = [], scalar_prefetch = 0 : i64, scratch_operands = 0 : i64, tpu.core_type = #tpu.core_type<tc>} {
    %c0 = arith.constant 0 : index
    %c0_0 = arith.constant 0 : index
    %0 = vector.load %arg0[%c0, %c0_0] : memref<2x36xf32, #tpu.memory_space<vmem>>, vector<2x36xf32>
    %c0_1 = arith.constant 0 : index
    %c0_2 = arith.constant 0 : index
    %1 = vector.load %arg2[%c0_1, %c0_2] : memref<16x2xf32, #tpu.memory_space<vmem>>, vector<16x2xf32>
    %2 = arith.truncf %0 : vector<2x36xf32> to vector<2x36xbf16>
    %c0_3 = arith.constant 0 : index
    %c0_4 = arith.constant 0 : index
    %3 = vector.load %arg9[%c0_3, %c0_4] : memref<36x32xbf16, #tpu.memory_space<vmem>>, vector<36x32xbf16>
    %cst = arith.constant dense<0.000000e+00> : vector<2x32xf32>
    %4 = tpu.matmul %2, %3, %cst {dimension_numbers = #tpu.dot_dimension_numbers<[1], [0], [0], [1], [0, 0, 1, 1], [], []>} : vector<2x36xbf16>, vector<36x32xbf16>, vector<2x32xf32> -> vector<2x32xf32>
    %c0_5 = arith.constant 0 : index
    %c0_6 = arith.constant 0 : index
    %5 = vector.load %arg10[%c0_5, %c0_6] : memref<1x32xf32, #tpu.memory_space<vmem>>, vector<1x32xf32>
    %6 = vector.broadcast %5 : vector<1x32xf32> to vector<2x32xf32>
    %7 = arith.addf %4, %6 : vector<2x32xf32>
    %cst_7 = arith.constant 0.000000e+00 : f32
    %8 = vector.broadcast %cst_7 : f32 to vector<2x32xf32>
    %9 = arith.maximumf %7, %8 : vector<2x32xf32>
    %10 = arith.truncf %9 : vector<2x32xf32> to vector<2x32xbf16>
    %c0_8 = arith.constant 0 : index
    %c0_9 = arith.constant 0 : index
    %11 = vector.load %arg11[%c0_8, %c0_9] : memref<32x9xbf16, #tpu.memory_space<vmem>>, vector<32x9xbf16>
    %cst_10 = arith.constant dense<0.000000e+00> : vector<2x9xf32>
    %12 = tpu.matmul %10, %11, %cst_10 {dimension_numbers = #tpu.dot_dimension_numbers<[1], [0], [0], [1], [0, 0, 1, 1], [], []>} : vector<2x32xbf16>, vector<32x9xbf16>, vector<2x9xf32> -> vector<2x9xf32>
    %c0_11 = arith.constant 0 : index
    %c0_12 = arith.constant 0 : index
    %13 = vector.load %arg12[%c0_11, %c0_12] : memref<1x9xf32, #tpu.memory_space<vmem>>, vector<1x9xf32>
    %14 = vector.broadcast %13 : vector<1x9xf32> to vector<2x9xf32>
    %15 = arith.addf %12, %14 : vector<2x9xf32>
    %cst_13 = arith.constant dense<0xFF800000> : vector<2xf32>
    %16 = vector.multi_reduction <maximumf>, %15, %cst_13 [1] : vector<2x9xf32> to vector<2xf32>
    %17 = vector.shape_cast %16 : vector<2xf32> to vector<2x1xf32>
    %18 = vector.broadcast %17 : vector<2x1xf32> to vector<2x9xf32>
    %19 = arith.cmpf oge, %15, %18 : vector<2x9xf32>
    %c0_14 = arith.constant 0 : index
    %c0_15 = arith.constant 0 : index
    %20 = vector.load %arg5[%c0_14, %c0_15] : memref<1x9xf32, #tpu.memory_space<vmem>>, vector<1x9xf32>
    %cst_16 = arith.constant 9.000000e+00 : f32
    %21 = vector.shape_cast %20 : vector<1x9xf32> to vector<1x9xf32>
    %22 = vector.broadcast %21 : vector<1x9xf32> to vector<2x9xf32>
    %23 = vector.broadcast %cst_16 : f32 to vector<2x9xf32>
    %24 = arith.select %19, %22, %23 : vector<2x9xi1>, vector<2x9xf32>
    %cst_17 = arith.constant dense<0x7F800000> : vector<2xf32>
    %25 = vector.multi_reduction <minimumf>, %24, %cst_17 [1] : vector<2x9xf32> to vector<2xf32>
    %26 = vector.shape_cast %25 : vector<2xf32> to vector<2x1xf32>
    %c0_18 = arith.constant 0 : index
    %c0_19 = arith.constant 0 : index
    %27 = vector.load %arg4[%c0_18, %c0_19] : memref<1x16xf32, #tpu.memory_space<vmem>>, vector<1x16xf32>
    %28 = vector.broadcast %27 : vector<1x16xf32> to vector<2x16xf32>
    %29 = vector.broadcast %26 : vector<2x1xf32> to vector<2x16xf32>
    %30 = arith.cmpf olt, %28, %29 : vector<2x16xf32>
    %c0_20 = arith.constant 0 : index
    %c0_21 = arith.constant 0 : index
    %31 = vector.load %arg3[%c0_20, %c0_21] : memref<2x16xf32, #tpu.memory_space<vmem>>, vector<2x16xf32>
    %cst_22 = arith.constant 5.000000e-01 : f32
    %32 = vector.broadcast %cst_22 : f32 to vector<2x16xf32>
    %33 = arith.cmpf ogt, %31, %32 : vector<2x16xf32>
    %34 = arith.andi %30, %33 : vector<2x16xi1>
    %cst_23 = arith.constant 1.000000e+00 : f32
    %cst_24 = arith.constant 0.000000e+00 : f32
    %35 = vector.broadcast %cst_23 : f32 to vector<2x16xf32>
    %36 = vector.broadcast %cst_24 : f32 to vector<2x16xf32>
    %37 = arith.select %34, %35, %36 : vector<2x16xi1>, vector<2x16xf32>
    %cst_25 = arith.constant dense<0.000000e+00> : vector<16x16xf32>
    %38 = tpu.matmul %1, %37, %cst_25 {dimension_numbers = #tpu.dot_dimension_numbers<[1], [0], [0], [1], [0, 0, 1, 1], [], []>} : vector<16x2xf32>, vector<2x16xf32>, vector<16x16xf32> -> vector<16x16xf32>
    %cst_26 = arith.constant 5.000000e-01 : f32
    %39 = vector.broadcast %cst_26 : f32 to vector<16x16xf32>
    %40 = arith.cmpf ogt, %38, %39 : vector<16x16xf32>
    %cst_27 = arith.constant 0.000000e+00 : f32
    %cst_28 = arith.constant -1.000000e+09 : f32
    %41 = vector.broadcast %cst_27 : f32 to vector<16x16xf32>
    %42 = vector.broadcast %cst_28 : f32 to vector<16x16xf32>
    %43 = arith.select %40, %41, %42 : vector<16x16xi1>, vector<16x16xf32>
    %c0_29 = arith.constant 0 : index
    %c0_30 = arith.constant 0 : index
    %44 = vector.load %arg6[%c0_29, %c0_30] : memref<16x16xf32, #tpu.memory_space<vmem>>, vector<16x16xf32>
    %45 = arith.mulf %38, %44 : vector<16x16xf32>
    %cst_31 = arith.constant dense<0.000000e+00> : vector<16xf32>
    %46 = vector.multi_reduction <add>, %45, %cst_31 [1] : vector<16x16xf32> to vector<16xf32>
    %47 = vector.shape_cast %46 : vector<16xf32> to vector<16x1xf32>
    %cst_32 = arith.constant 5.000000e-01 : f32
    %48 = vector.broadcast %cst_32 : f32 to vector<16x1xf32>
    %49 = arith.cmpf ogt, %47, %48 : vector<16x1xf32>
    %c0_33 = arith.constant 0 : index
    %c0_34 = arith.constant 0 : index
    %50 = vector.load %arg7[%c0_33, %c0_34] : memref<1x36xf32, #tpu.memory_space<vmem>>, vector<1x36xf32>
    %c0_35 = arith.constant 0 : index
    %c0_36 = arith.constant 0 : index
    %51 = vector.load %arg8[%c0_35, %c0_36] : memref<1x36xf32, #tpu.memory_space<vmem>>, vector<1x36xf32>
    %52 = math.absf %51 : vector<1x36xf32>
    %c0_37 = arith.constant 0 : index
    %c0_38 = arith.constant 0 : index
    %53 = vector.load %arg1[%c0_37, %c0_38] : memref<16x36xf32, #tpu.memory_space<vmem>>, vector<16x36xf32>
    %54 = vector.broadcast %52 : vector<1x36xf32> to vector<16x36xf32>
    %55 = arith.mulf %54, %53 : vector<16x36xf32>
    %56 = vector.broadcast %50 : vector<1x36xf32> to vector<16x36xf32>
    %57 = arith.addf %56, %55 : vector<16x36xf32>
    %cst_39 = arith.constant dense<0.000000e+00> : vector<16x36xf32>
    %58 = tpu.matmul %1, %0, %cst_39 {dimension_numbers = #tpu.dot_dimension_numbers<[1], [0], [0], [1], [0, 0, 1, 1], [], []>} : vector<16x2xf32>, vector<2x36xf32>, vector<16x36xf32> -> vector<16x36xf32>
    %59 = arith.addf %57, %58 : vector<16x36xf32>
    %cst_40 = arith.constant 0.000000e+00 : f32
    %60 = vector.shape_cast %49 : vector<16x1xi1> to vector<16x1xi1>
    %61 = vector.broadcast %60 : vector<16x1xi1> to vector<16x36xi1>
    %62 = vector.broadcast %cst_40 : f32 to vector<16x36xf32>
    %63 = arith.select %61, %59, %62 : vector<16x36xi1>, vector<16x36xf32>
    %64 = arith.truncf %63 : vector<16x36xf32> to vector<16x36xbf16>
    %c0_41 = arith.constant 0 : index
    %c0_42 = arith.constant 0 : index
    %c0_43 = arith.constant 0 : index
    %65 = vector.load %arg13[%c0_41, %c0_42, %c0_43] : memref<3x36x108xbf16, #tpu.memory_space<vmem>>, vector<1x36x108xbf16>
    %66 = vector.shape_cast %65 : vector<1x36x108xbf16> to vector<36x108xbf16>
    %cst_44 = arith.constant dense<0.000000e+00> : vector<16x108xf32>
    %67 = tpu.matmul %64, %66, %cst_44 {dimension_numbers = #tpu.dot_dimension_numbers<[1], [0], [0], [1], [0, 0, 1, 1], [], []>} : vector<16x36xbf16>, vector<36x108xbf16>, vector<16x108xf32> -> vector<16x108xf32>
    %c0_45 = arith.constant 0 : index
    %c0_46 = arith.constant 0 : index
    %c0_47 = arith.constant 0 : index
    %68 = vector.load %arg14[%c0_45, %c0_46, %c0_47] : memref<3x1x108xf32, #tpu.memory_space<vmem>>, vector<1x1x108xf32>
    %69 = vector.shape_cast %68 : vector<1x1x108xf32> to vector<1x108xf32>
    %70 = vector.broadcast %69 : vector<1x108xf32> to vector<16x108xf32>
    %71 = arith.addf %67, %70 : vector<16x108xf32>
    %72 = vector.extract_strided_slice %71 {offsets = [0, 0], sizes = [16, 18], strides = [1, 1]} : vector<16x108xf32> to vector<16x18xf32>
    %73 = vector.extract_strided_slice %71 {offsets = [0, 18], sizes = [16, 18], strides = [1, 1]} : vector<16x108xf32> to vector<16x18xf32>
    %74 = vector.extract_strided_slice %71 {offsets = [0, 36], sizes = [16, 18], strides = [1, 1]} : vector<16x108xf32> to vector<16x18xf32>
    %75 = arith.truncf %72 : vector<16x18xf32> to vector<16x18xbf16>
    %76 = arith.truncf %73 : vector<16x18xf32> to vector<16x18xbf16>
    %cst_48 = arith.constant dense<0.000000e+00> : vector<16x16xf32>
    %77 = tpu.matmul %75, %76, %cst_48 {dimension_numbers = #tpu.dot_dimension_numbers<[1], [1], [0], [0], [0, 0, 1, 0], [], []>} : vector<16x18xbf16>, vector<16x18xbf16>, vector<16x16xf32> -> vector<16x16xf32>
    %cst_49 = arith.constant 0.235702261 : f32
    %78 = vector.broadcast %cst_49 : f32 to vector<16x16xf32>
    %79 = arith.mulf %77, %78 : vector<16x16xf32>
    %80 = arith.addf %79, %43 : vector<16x16xf32>
    %cst_50 = arith.constant dense<0xFF800000> : vector<16xf32>
    %81 = vector.multi_reduction <maximumf>, %80, %cst_50 [1] : vector<16x16xf32> to vector<16xf32>
    %82 = vector.shape_cast %81 : vector<16xf32> to vector<16x1xf32>
    %83 = vector.broadcast %82 : vector<16x1xf32> to vector<16x16xf32>
    %84 = arith.subf %80, %83 : vector<16x16xf32>
    %85 = math.exp %84 : vector<16x16xf32>
    %cst_51 = arith.constant dense<0.000000e+00> : vector<16xf32>
    %86 = vector.multi_reduction <add>, %85, %cst_51 [1] : vector<16x16xf32> to vector<16xf32>
    %87 = vector.shape_cast %86 : vector<16xf32> to vector<16x1xf32>
    %88 = tpu.reciprocal %87 {approx = true} : vector<16x1xf32> -> vector<16x1xf32>
    %89 = vector.broadcast %88 : vector<16x1xf32> to vector<16x16xf32>
    %90 = arith.mulf %85, %89 : vector<16x16xf32>
    %91 = arith.truncf %90 : vector<16x16xf32> to vector<16x16xbf16>
    %92 = arith.truncf %74 : vector<16x18xf32> to vector<16x18xbf16>
    %cst_52 = arith.constant dense<0.000000e+00> : vector<16x18xf32>
    %93 = tpu.matmul %91, %92, %cst_52 {dimension_numbers = #tpu.dot_dimension_numbers<[1], [0], [0], [1], [0, 0, 1, 1], [], []>} : vector<16x16xbf16>, vector<16x18xbf16>, vector<16x18xf32> -> vector<16x18xf32>
    %94 = arith.truncf %93 : vector<16x18xf32> to vector<16x18xbf16>
    %c0_53 = arith.constant 0 : index
    %c0_54 = arith.constant 0 : index
    %c0_55 = arith.constant 0 : index
    %95 = vector.load %arg15[%c0_53, %c0_54, %c0_55] : memref<6x18x36xbf16, #tpu.memory_space<vmem>>, vector<1x18x36xbf16>
    %96 = vector.shape_cast %95 : vector<1x18x36xbf16> to vector<18x36xbf16>
    %cst_56 = arith.constant dense<0.000000e+00> : vector<16x36xf32>
    %97 = tpu.matmul %94, %96, %cst_56 {dimension_numbers = #tpu.dot_dimension_numbers<[1], [0], [0], [1], [0, 0, 1, 1], [], []>} : vector<16x18xbf16>, vector<18x36xbf16>, vector<16x36xf32> -> vector<16x36xf32>
    %98 = vector.extract_strided_slice %71 {offsets = [0, 54], sizes = [16, 18], strides = [1, 1]} : vector<16x108xf32> to vector<16x18xf32>
    %99 = vector.extract_strided_slice %71 {offsets = [0, 72], sizes = [16, 18], strides = [1, 1]} : vector<16x108xf32> to vector<16x18xf32>
    %100 = vector.extract_strided_slice %71 {offsets = [0, 90], sizes = [16, 18], strides = [1, 1]} : vector<16x108xf32> to vector<16x18xf32>
    %101 = arith.truncf %98 : vector<16x18xf32> to vector<16x18xbf16>
    %102 = arith.truncf %99 : vector<16x18xf32> to vector<16x18xbf16>
    %cst_57 = arith.constant dense<0.000000e+00> : vector<16x16xf32>
    %103 = tpu.matmul %101, %102, %cst_57 {dimension_numbers = #tpu.dot_dimension_numbers<[1], [1], [0], [0], [0, 0, 1, 0], [], []>} : vector<16x18xbf16>, vector<16x18xbf16>, vector<16x16xf32> -> vector<16x16xf32>
    %cst_58 = arith.constant 0.235702261 : f32
    %104 = vector.broadcast %cst_58 : f32 to vector<16x16xf32>
    %105 = arith.mulf %103, %104 : vector<16x16xf32>
    %106 = arith.addf %105, %43 : vector<16x16xf32>
    %cst_59 = arith.constant dense<0xFF800000> : vector<16xf32>
    %107 = vector.multi_reduction <maximumf>, %106, %cst_59 [1] : vector<16x16xf32> to vector<16xf32>
    %108 = vector.shape_cast %107 : vector<16xf32> to vector<16x1xf32>
    %109 = vector.broadcast %108 : vector<16x1xf32> to vector<16x16xf32>
    %110 = arith.subf %106, %109 : vector<16x16xf32>
    %111 = math.exp %110 : vector<16x16xf32>
    %cst_60 = arith.constant dense<0.000000e+00> : vector<16xf32>
    %112 = vector.multi_reduction <add>, %111, %cst_60 [1] : vector<16x16xf32> to vector<16xf32>
    %113 = vector.shape_cast %112 : vector<16xf32> to vector<16x1xf32>
    %114 = tpu.reciprocal %113 {approx = true} : vector<16x1xf32> -> vector<16x1xf32>
    %115 = vector.broadcast %114 : vector<16x1xf32> to vector<16x16xf32>
    %116 = arith.mulf %111, %115 : vector<16x16xf32>
    %117 = arith.truncf %116 : vector<16x16xf32> to vector<16x16xbf16>
    %118 = arith.truncf %100 : vector<16x18xf32> to vector<16x18xbf16>
    %cst_61 = arith.constant dense<0.000000e+00> : vector<16x18xf32>
    %119 = tpu.matmul %117, %118, %cst_61 {dimension_numbers = #tpu.dot_dimension_numbers<[1], [0], [0], [1], [0, 0, 1, 1], [], []>} : vector<16x16xbf16>, vector<16x18xbf16>, vector<16x18xf32> -> vector<16x18xf32>
    %120 = arith.truncf %119 : vector<16x18xf32> to vector<16x18xbf16>
    %c1 = arith.constant 1 : index
    %c0_62 = arith.constant 0 : index
    %c0_63 = arith.constant 0 : index
    %121 = vector.load %arg15[%c1, %c0_62, %c0_63] : memref<6x18x36xbf16, #tpu.memory_space<vmem>>, vector<1x18x36xbf16>
    %122 = vector.shape_cast %121 : vector<1x18x36xbf16> to vector<18x36xbf16>
    %cst_64 = arith.constant dense<0.000000e+00> : vector<16x36xf32>
    %123 = tpu.matmul %120, %122, %cst_64 {dimension_numbers = #tpu.dot_dimension_numbers<[1], [0], [0], [1], [0, 0, 1, 1], [], []>} : vector<16x18xbf16>, vector<18x36xbf16>, vector<16x36xf32> -> vector<16x36xf32>
    %124 = arith.addf %97, %123 : vector<16x36xf32>
    %c0_65 = arith.constant 0 : index
    %c0_66 = arith.constant 0 : index
    %c0_67 = arith.constant 0 : index
    %125 = vector.load %arg16[%c0_65, %c0_66, %c0_67] : memref<3x1x36xf32, #tpu.memory_space<vmem>>, vector<1x1x36xf32>
    %126 = vector.shape_cast %125 : vector<1x1x36xf32> to vector<1x36xf32>
    %127 = vector.broadcast %126 : vector<1x36xf32> to vector<16x36xf32>
    %128 = arith.addf %124, %127 : vector<16x36xf32>
    %129 = arith.addf %63, %128 : vector<16x36xf32>
    %cst_68 = arith.constant dense<0.000000e+00> : vector<16xf32>
    %130 = vector.multi_reduction <add>, %129, %cst_68 [1] : vector<16x36xf32> to vector<16xf32>
    %131 = vector.shape_cast %130 : vector<16xf32> to vector<16x1xf32>
    %cst_69 = arith.constant 3.600000e+01 : f32
    %132 = vector.broadcast %cst_69 : f32 to vector<16x1xf32>
    %133 = arith.divf %131, %132 : vector<16x1xf32>
    %134 = arith.mulf %129, %129 : vector<16x36xf32>
    %cst_70 = arith.constant dense<0.000000e+00> : vector<16xf32>
    %135 = vector.multi_reduction <add>, %134, %cst_70 [1] : vector<16x36xf32> to vector<16xf32>
    %136 = vector.shape_cast %135 : vector<16xf32> to vector<16x1xf32>
    %cst_71 = arith.constant 3.600000e+01 : f32
    %137 = vector.broadcast %cst_71 : f32 to vector<16x1xf32>
    %138 = arith.divf %136, %137 : vector<16x1xf32>
    %139 = vector.broadcast %133 : vector<16x1xf32> to vector<16x36xf32>
    %140 = arith.subf %129, %139 : vector<16x36xf32>
    %141 = arith.mulf %133, %133 : vector<16x1xf32>
    %142 = arith.subf %138, %141 : vector<16x1xf32>
    %cst_72 = arith.constant 9.99999974E-6 : f32
    %143 = vector.broadcast %cst_72 : f32 to vector<16x1xf32>
    %144 = arith.addf %142, %143 : vector<16x1xf32>
    %145 = math.rsqrt %144 : vector<16x1xf32>
    %146 = vector.broadcast %145 : vector<16x1xf32> to vector<16x36xf32>
    %147 = arith.mulf %140, %146 : vector<16x36xf32>
    %c0_73 = arith.constant 0 : index
    %c0_74 = arith.constant 0 : index
    %c0_75 = arith.constant 0 : index
    %148 = vector.load %arg21[%c0_73, %c0_74, %c0_75] : memref<3x1x36xf32, #tpu.memory_space<vmem>>, vector<1x1x36xf32>
    %149 = vector.shape_cast %148 : vector<1x1x36xf32> to vector<1x36xf32>
    %150 = vector.broadcast %149 : vector<1x36xf32> to vector<16x36xf32>
    %151 = arith.mulf %147, %150 : vector<16x36xf32>
    %c0_76 = arith.constant 0 : index
    %c0_77 = arith.constant 0 : index
    %c0_78 = arith.constant 0 : index
    %152 = vector.load %arg22[%c0_76, %c0_77, %c0_78] : memref<3x1x36xf32, #tpu.memory_space<vmem>>, vector<1x1x36xf32>
    %153 = vector.shape_cast %152 : vector<1x1x36xf32> to vector<1x36xf32>
    %154 = vector.broadcast %153 : vector<1x36xf32> to vector<16x36xf32>
    %155 = arith.addf %151, %154 : vector<16x36xf32>
    %156 = arith.truncf %155 : vector<16x36xf32> to vector<16x36xbf16>
    %c0_79 = arith.constant 0 : index
    %c0_80 = arith.constant 0 : index
    %c0_81 = arith.constant 0 : index
    %157 = vector.load %arg17[%c0_79, %c0_80, %c0_81] : memref<3x36x32xbf16, #tpu.memory_space<vmem>>, vector<1x36x32xbf16>
    %158 = vector.shape_cast %157 : vector<1x36x32xbf16> to vector<36x32xbf16>
    %cst_82 = arith.constant dense<0.000000e+00> : vector<16x32xf32>
    %159 = tpu.matmul %156, %158, %cst_82 {dimension_numbers = #tpu.dot_dimension_numbers<[1], [0], [0], [1], [0, 0, 1, 1], [], []>} : vector<16x36xbf16>, vector<36x32xbf16>, vector<16x32xf32> -> vector<16x32xf32>
    %c0_83 = arith.constant 0 : index
    %c0_84 = arith.constant 0 : index
    %c0_85 = arith.constant 0 : index
    %160 = vector.load %arg18[%c0_83, %c0_84, %c0_85] : memref<3x1x32xf32, #tpu.memory_space<vmem>>, vector<1x1x32xf32>
    %161 = vector.shape_cast %160 : vector<1x1x32xf32> to vector<1x32xf32>
    %162 = vector.broadcast %161 : vector<1x32xf32> to vector<16x32xf32>
    %163 = arith.addf %159, %162 : vector<16x32xf32>
    %cst_86 = arith.constant 0.000000e+00 : f32
    %164 = vector.broadcast %cst_86 : f32 to vector<16x32xf32>
    %165 = arith.maximumf %163, %164 : vector<16x32xf32>
    %166 = arith.truncf %165 : vector<16x32xf32> to vector<16x32xbf16>
    %c0_87 = arith.constant 0 : index
    %c0_88 = arith.constant 0 : index
    %c0_89 = arith.constant 0 : index
    %167 = vector.load %arg19[%c0_87, %c0_88, %c0_89] : memref<3x32x36xbf16, #tpu.memory_space<vmem>>, vector<1x32x36xbf16>
    %168 = vector.shape_cast %167 : vector<1x32x36xbf16> to vector<32x36xbf16>
    %cst_90 = arith.constant dense<0.000000e+00> : vector<16x36xf32>
    %169 = tpu.matmul %166, %168, %cst_90 {dimension_numbers = #tpu.dot_dimension_numbers<[1], [0], [0], [1], [0, 0, 1, 1], [], []>} : vector<16x32xbf16>, vector<32x36xbf16>, vector<16x36xf32> -> vector<16x36xf32>
    %c0_91 = arith.constant 0 : index
    %c0_92 = arith.constant 0 : index
    %c0_93 = arith.constant 0 : index
    %170 = vector.load %arg20[%c0_91, %c0_92, %c0_93] : memref<3x1x36xf32, #tpu.memory_space<vmem>>, vector<1x1x36xf32>
    %171 = vector.shape_cast %170 : vector<1x1x36xf32> to vector<1x36xf32>
    %172 = vector.broadcast %171 : vector<1x36xf32> to vector<16x36xf32>
    %173 = arith.addf %169, %172 : vector<16x36xf32>
    %174 = arith.addf %155, %173 : vector<16x36xf32>
    %cst_94 = arith.constant dense<0.000000e+00> : vector<16xf32>
    %175 = vector.multi_reduction <add>, %174, %cst_94 [1] : vector<16x36xf32> to vector<16xf32>
    %176 = vector.shape_cast %175 : vector<16xf32> to vector<16x1xf32>
    %cst_95 = arith.constant 3.600000e+01 : f32
    %177 = vector.broadcast %cst_95 : f32 to vector<16x1xf32>
    %178 = arith.divf %176, %177 : vector<16x1xf32>
    %179 = arith.mulf %174, %174 : vector<16x36xf32>
    %cst_96 = arith.constant dense<0.000000e+00> : vector<16xf32>
    %180 = vector.multi_reduction <add>, %179, %cst_96 [1] : vector<16x36xf32> to vector<16xf32>
    %181 = vector.shape_cast %180 : vector<16xf32> to vector<16x1xf32>
    %cst_97 = arith.constant 3.600000e+01 : f32
    %182 = vector.broadcast %cst_97 : f32 to vector<16x1xf32>
    %183 = arith.divf %181, %182 : vector<16x1xf32>
    %184 = vector.broadcast %178 : vector<16x1xf32> to vector<16x36xf32>
    %185 = arith.subf %174, %184 : vector<16x36xf32>
    %186 = arith.mulf %178, %178 : vector<16x1xf32>
    %187 = arith.subf %183, %186 : vector<16x1xf32>
    %cst_98 = arith.constant 9.99999974E-6 : f32
    %188 = vector.broadcast %cst_98 : f32 to vector<16x1xf32>
    %189 = arith.addf %187, %188 : vector<16x1xf32>
    %190 = math.rsqrt %189 : vector<16x1xf32>
    %191 = vector.broadcast %190 : vector<16x1xf32> to vector<16x36xf32>
    %192 = arith.mulf %185, %191 : vector<16x36xf32>
    %c0_99 = arith.constant 0 : index
    %c0_100 = arith.constant 0 : index
    %c0_101 = arith.constant 0 : index
    %193 = vector.load %arg23[%c0_99, %c0_100, %c0_101] : memref<3x1x36xf32, #tpu.memory_space<vmem>>, vector<1x1x36xf32>
    %194 = vector.shape_cast %193 : vector<1x1x36xf32> to vector<1x36xf32>
    %195 = vector.broadcast %194 : vector<1x36xf32> to vector<16x36xf32>
    %196 = arith.mulf %192, %195 : vector<16x36xf32>
    %c0_102 = arith.constant 0 : index
    %c0_103 = arith.constant 0 : index
    %c0_104 = arith.constant 0 : index
    %197 = vector.load %arg24[%c0_102, %c0_103, %c0_104] : memref<3x1x36xf32, #tpu.memory_space<vmem>>, vector<1x1x36xf32>
    %198 = vector.shape_cast %197 : vector<1x1x36xf32> to vector<1x36xf32>
    %199 = vector.broadcast %198 : vector<1x36xf32> to vector<16x36xf32>
    %200 = arith.addf %196, %199 : vector<16x36xf32>
    %201 = arith.truncf %200 : vector<16x36xf32> to vector<16x36xbf16>
    %c1_105 = arith.constant 1 : index
    %c0_106 = arith.constant 0 : index
    %c0_107 = arith.constant 0 : index
    %202 = vector.load %arg13[%c1_105, %c0_106, %c0_107] : memref<3x36x108xbf16, #tpu.memory_space<vmem>>, vector<1x36x108xbf16>
    %203 = vector.shape_cast %202 : vector<1x36x108xbf16> to vector<36x108xbf16>
    %cst_108 = arith.constant dense<0.000000e+00> : vector<16x108xf32>
    %204 = tpu.matmul %201, %203, %cst_108 {dimension_numbers = #tpu.dot_dimension_numbers<[1], [0], [0], [1], [0, 0, 1, 1], [], []>} : vector<16x36xbf16>, vector<36x108xbf16>, vector<16x108xf32> -> vector<16x108xf32>
    %c1_109 = arith.constant 1 : index
    %c0_110 = arith.constant 0 : index
    %c0_111 = arith.constant 0 : index
    %205 = vector.load %arg14[%c1_109, %c0_110, %c0_111] : memref<3x1x108xf32, #tpu.memory_space<vmem>>, vector<1x1x108xf32>
    %206 = vector.shape_cast %205 : vector<1x1x108xf32> to vector<1x108xf32>
    %207 = vector.broadcast %206 : vector<1x108xf32> to vector<16x108xf32>
    %208 = arith.addf %204, %207 : vector<16x108xf32>
    %209 = vector.extract_strided_slice %208 {offsets = [0, 0], sizes = [16, 18], strides = [1, 1]} : vector<16x108xf32> to vector<16x18xf32>
    %210 = vector.extract_strided_slice %208 {offsets = [0, 18], sizes = [16, 18], strides = [1, 1]} : vector<16x108xf32> to vector<16x18xf32>
    %211 = vector.extract_strided_slice %208 {offsets = [0, 36], sizes = [16, 18], strides = [1, 1]} : vector<16x108xf32> to vector<16x18xf32>
    %212 = arith.truncf %209 : vector<16x18xf32> to vector<16x18xbf16>
    %213 = arith.truncf %210 : vector<16x18xf32> to vector<16x18xbf16>
    %cst_112 = arith.constant dense<0.000000e+00> : vector<16x16xf32>
    %214 = tpu.matmul %212, %213, %cst_112 {dimension_numbers = #tpu.dot_dimension_numbers<[1], [1], [0], [0], [0, 0, 1, 0], [], []>} : vector<16x18xbf16>, vector<16x18xbf16>, vector<16x16xf32> -> vector<16x16xf32>
    %cst_113 = arith.constant 0.235702261 : f32
    %215 = vector.broadcast %cst_113 : f32 to vector<16x16xf32>
    %216 = arith.mulf %214, %215 : vector<16x16xf32>
    %217 = arith.addf %216, %43 : vector<16x16xf32>
    %cst_114 = arith.constant dense<0xFF800000> : vector<16xf32>
    %218 = vector.multi_reduction <maximumf>, %217, %cst_114 [1] : vector<16x16xf32> to vector<16xf32>
    %219 = vector.shape_cast %218 : vector<16xf32> to vector<16x1xf32>
    %220 = vector.broadcast %219 : vector<16x1xf32> to vector<16x16xf32>
    %221 = arith.subf %217, %220 : vector<16x16xf32>
    %222 = math.exp %221 : vector<16x16xf32>
    %cst_115 = arith.constant dense<0.000000e+00> : vector<16xf32>
    %223 = vector.multi_reduction <add>, %222, %cst_115 [1] : vector<16x16xf32> to vector<16xf32>
    %224 = vector.shape_cast %223 : vector<16xf32> to vector<16x1xf32>
    %225 = tpu.reciprocal %224 {approx = true} : vector<16x1xf32> -> vector<16x1xf32>
    %226 = vector.broadcast %225 : vector<16x1xf32> to vector<16x16xf32>
    %227 = arith.mulf %222, %226 : vector<16x16xf32>
    %228 = arith.truncf %227 : vector<16x16xf32> to vector<16x16xbf16>
    %229 = arith.truncf %211 : vector<16x18xf32> to vector<16x18xbf16>
    %cst_116 = arith.constant dense<0.000000e+00> : vector<16x18xf32>
    %230 = tpu.matmul %228, %229, %cst_116 {dimension_numbers = #tpu.dot_dimension_numbers<[1], [0], [0], [1], [0, 0, 1, 1], [], []>} : vector<16x16xbf16>, vector<16x18xbf16>, vector<16x18xf32> -> vector<16x18xf32>
    %231 = arith.truncf %230 : vector<16x18xf32> to vector<16x18xbf16>
    %c2 = arith.constant 2 : index
    %c0_117 = arith.constant 0 : index
    %c0_118 = arith.constant 0 : index
    %232 = vector.load %arg15[%c2, %c0_117, %c0_118] : memref<6x18x36xbf16, #tpu.memory_space<vmem>>, vector<1x18x36xbf16>
    %233 = vector.shape_cast %232 : vector<1x18x36xbf16> to vector<18x36xbf16>
    %cst_119 = arith.constant dense<0.000000e+00> : vector<16x36xf32>
    %234 = tpu.matmul %231, %233, %cst_119 {dimension_numbers = #tpu.dot_dimension_numbers<[1], [0], [0], [1], [0, 0, 1, 1], [], []>} : vector<16x18xbf16>, vector<18x36xbf16>, vector<16x36xf32> -> vector<16x36xf32>
    %235 = vector.extract_strided_slice %208 {offsets = [0, 54], sizes = [16, 18], strides = [1, 1]} : vector<16x108xf32> to vector<16x18xf32>
    %236 = vector.extract_strided_slice %208 {offsets = [0, 72], sizes = [16, 18], strides = [1, 1]} : vector<16x108xf32> to vector<16x18xf32>
    %237 = vector.extract_strided_slice %208 {offsets = [0, 90], sizes = [16, 18], strides = [1, 1]} : vector<16x108xf32> to vector<16x18xf32>
    %238 = arith.truncf %235 : vector<16x18xf32> to vector<16x18xbf16>
    %239 = arith.truncf %236 : vector<16x18xf32> to vector<16x18xbf16>
    %cst_120 = arith.constant dense<0.000000e+00> : vector<16x16xf32>
    %240 = tpu.matmul %238, %239, %cst_120 {dimension_numbers = #tpu.dot_dimension_numbers<[1], [1], [0], [0], [0, 0, 1, 0], [], []>} : vector<16x18xbf16>, vector<16x18xbf16>, vector<16x16xf32> -> vector<16x16xf32>
    %cst_121 = arith.constant 0.235702261 : f32
    %241 = vector.broadcast %cst_121 : f32 to vector<16x16xf32>
    %242 = arith.mulf %240, %241 : vector<16x16xf32>
    %243 = arith.addf %242, %43 : vector<16x16xf32>
    %cst_122 = arith.constant dense<0xFF800000> : vector<16xf32>
    %244 = vector.multi_reduction <maximumf>, %243, %cst_122 [1] : vector<16x16xf32> to vector<16xf32>
    %245 = vector.shape_cast %244 : vector<16xf32> to vector<16x1xf32>
    %246 = vector.broadcast %245 : vector<16x1xf32> to vector<16x16xf32>
    %247 = arith.subf %243, %246 : vector<16x16xf32>
    %248 = math.exp %247 : vector<16x16xf32>
    %cst_123 = arith.constant dense<0.000000e+00> : vector<16xf32>
    %249 = vector.multi_reduction <add>, %248, %cst_123 [1] : vector<16x16xf32> to vector<16xf32>
    %250 = vector.shape_cast %249 : vector<16xf32> to vector<16x1xf32>
    %251 = tpu.reciprocal %250 {approx = true} : vector<16x1xf32> -> vector<16x1xf32>
    %252 = vector.broadcast %251 : vector<16x1xf32> to vector<16x16xf32>
    %253 = arith.mulf %248, %252 : vector<16x16xf32>
    %254 = arith.truncf %253 : vector<16x16xf32> to vector<16x16xbf16>
    %255 = arith.truncf %237 : vector<16x18xf32> to vector<16x18xbf16>
    %cst_124 = arith.constant dense<0.000000e+00> : vector<16x18xf32>
    %256 = tpu.matmul %254, %255, %cst_124 {dimension_numbers = #tpu.dot_dimension_numbers<[1], [0], [0], [1], [0, 0, 1, 1], [], []>} : vector<16x16xbf16>, vector<16x18xbf16>, vector<16x18xf32> -> vector<16x18xf32>
    %257 = arith.truncf %256 : vector<16x18xf32> to vector<16x18xbf16>
    %c3 = arith.constant 3 : index
    %c0_125 = arith.constant 0 : index
    %c0_126 = arith.constant 0 : index
    %258 = vector.load %arg15[%c3, %c0_125, %c0_126] : memref<6x18x36xbf16, #tpu.memory_space<vmem>>, vector<1x18x36xbf16>
    %259 = vector.shape_cast %258 : vector<1x18x36xbf16> to vector<18x36xbf16>
    %cst_127 = arith.constant dense<0.000000e+00> : vector<16x36xf32>
    %260 = tpu.matmul %257, %259, %cst_127 {dimension_numbers = #tpu.dot_dimension_numbers<[1], [0], [0], [1], [0, 0, 1, 1], [], []>} : vector<16x18xbf16>, vector<18x36xbf16>, vector<16x36xf32> -> vector<16x36xf32>
    %261 = arith.addf %234, %260 : vector<16x36xf32>
    %c1_128 = arith.constant 1 : index
    %c0_129 = arith.constant 0 : index
    %c0_130 = arith.constant 0 : index
    %262 = vector.load %arg16[%c1_128, %c0_129, %c0_130] : memref<3x1x36xf32, #tpu.memory_space<vmem>>, vector<1x1x36xf32>
    %263 = vector.shape_cast %262 : vector<1x1x36xf32> to vector<1x36xf32>
    %264 = vector.broadcast %263 : vector<1x36xf32> to vector<16x36xf32>
    %265 = arith.addf %261, %264 : vector<16x36xf32>
    %266 = arith.addf %200, %265 : vector<16x36xf32>
    %cst_131 = arith.constant dense<0.000000e+00> : vector<16xf32>
    %267 = vector.multi_reduction <add>, %266, %cst_131 [1] : vector<16x36xf32> to vector<16xf32>
    %268 = vector.shape_cast %267 : vector<16xf32> to vector<16x1xf32>
    %cst_132 = arith.constant 3.600000e+01 : f32
    %269 = vector.broadcast %cst_132 : f32 to vector<16x1xf32>
    %270 = arith.divf %268, %269 : vector<16x1xf32>
    %271 = arith.mulf %266, %266 : vector<16x36xf32>
    %cst_133 = arith.constant dense<0.000000e+00> : vector<16xf32>
    %272 = vector.multi_reduction <add>, %271, %cst_133 [1] : vector<16x36xf32> to vector<16xf32>
    %273 = vector.shape_cast %272 : vector<16xf32> to vector<16x1xf32>
    %cst_134 = arith.constant 3.600000e+01 : f32
    %274 = vector.broadcast %cst_134 : f32 to vector<16x1xf32>
    %275 = arith.divf %273, %274 : vector<16x1xf32>
    %276 = vector.broadcast %270 : vector<16x1xf32> to vector<16x36xf32>
    %277 = arith.subf %266, %276 : vector<16x36xf32>
    %278 = arith.mulf %270, %270 : vector<16x1xf32>
    %279 = arith.subf %275, %278 : vector<16x1xf32>
    %cst_135 = arith.constant 9.99999974E-6 : f32
    %280 = vector.broadcast %cst_135 : f32 to vector<16x1xf32>
    %281 = arith.addf %279, %280 : vector<16x1xf32>
    %282 = math.rsqrt %281 : vector<16x1xf32>
    %283 = vector.broadcast %282 : vector<16x1xf32> to vector<16x36xf32>
    %284 = arith.mulf %277, %283 : vector<16x36xf32>
    %c1_136 = arith.constant 1 : index
    %c0_137 = arith.constant 0 : index
    %c0_138 = arith.constant 0 : index
    %285 = vector.load %arg21[%c1_136, %c0_137, %c0_138] : memref<3x1x36xf32, #tpu.memory_space<vmem>>, vector<1x1x36xf32>
    %286 = vector.shape_cast %285 : vector<1x1x36xf32> to vector<1x36xf32>
    %287 = vector.broadcast %286 : vector<1x36xf32> to vector<16x36xf32>
    %288 = arith.mulf %284, %287 : vector<16x36xf32>
    %c1_139 = arith.constant 1 : index
    %c0_140 = arith.constant 0 : index
    %c0_141 = arith.constant 0 : index
    %289 = vector.load %arg22[%c1_139, %c0_140, %c0_141] : memref<3x1x36xf32, #tpu.memory_space<vmem>>, vector<1x1x36xf32>
    %290 = vector.shape_cast %289 : vector<1x1x36xf32> to vector<1x36xf32>
    %291 = vector.broadcast %290 : vector<1x36xf32> to vector<16x36xf32>
    %292 = arith.addf %288, %291 : vector<16x36xf32>
    %293 = arith.truncf %292 : vector<16x36xf32> to vector<16x36xbf16>
    %c1_142 = arith.constant 1 : index
    %c0_143 = arith.constant 0 : index
    %c0_144 = arith.constant 0 : index
    %294 = vector.load %arg17[%c1_142, %c0_143, %c0_144] : memref<3x36x32xbf16, #tpu.memory_space<vmem>>, vector<1x36x32xbf16>
    %295 = vector.shape_cast %294 : vector<1x36x32xbf16> to vector<36x32xbf16>
    %cst_145 = arith.constant dense<0.000000e+00> : vector<16x32xf32>
    %296 = tpu.matmul %293, %295, %cst_145 {dimension_numbers = #tpu.dot_dimension_numbers<[1], [0], [0], [1], [0, 0, 1, 1], [], []>} : vector<16x36xbf16>, vector<36x32xbf16>, vector<16x32xf32> -> vector<16x32xf32>
    %c1_146 = arith.constant 1 : index
    %c0_147 = arith.constant 0 : index
    %c0_148 = arith.constant 0 : index
    %297 = vector.load %arg18[%c1_146, %c0_147, %c0_148] : memref<3x1x32xf32, #tpu.memory_space<vmem>>, vector<1x1x32xf32>
    %298 = vector.shape_cast %297 : vector<1x1x32xf32> to vector<1x32xf32>
    %299 = vector.broadcast %298 : vector<1x32xf32> to vector<16x32xf32>
    %300 = arith.addf %296, %299 : vector<16x32xf32>
    %cst_149 = arith.constant 0.000000e+00 : f32
    %301 = vector.broadcast %cst_149 : f32 to vector<16x32xf32>
    %302 = arith.maximumf %300, %301 : vector<16x32xf32>
    %303 = arith.truncf %302 : vector<16x32xf32> to vector<16x32xbf16>
    %c1_150 = arith.constant 1 : index
    %c0_151 = arith.constant 0 : index
    %c0_152 = arith.constant 0 : index
    %304 = vector.load %arg19[%c1_150, %c0_151, %c0_152] : memref<3x32x36xbf16, #tpu.memory_space<vmem>>, vector<1x32x36xbf16>
    %305 = vector.shape_cast %304 : vector<1x32x36xbf16> to vector<32x36xbf16>
    %cst_153 = arith.constant dense<0.000000e+00> : vector<16x36xf32>
    %306 = tpu.matmul %303, %305, %cst_153 {dimension_numbers = #tpu.dot_dimension_numbers<[1], [0], [0], [1], [0, 0, 1, 1], [], []>} : vector<16x32xbf16>, vector<32x36xbf16>, vector<16x36xf32> -> vector<16x36xf32>
    %c1_154 = arith.constant 1 : index
    %c0_155 = arith.constant 0 : index
    %c0_156 = arith.constant 0 : index
    %307 = vector.load %arg20[%c1_154, %c0_155, %c0_156] : memref<3x1x36xf32, #tpu.memory_space<vmem>>, vector<1x1x36xf32>
    %308 = vector.shape_cast %307 : vector<1x1x36xf32> to vector<1x36xf32>
    %309 = vector.broadcast %308 : vector<1x36xf32> to vector<16x36xf32>
    %310 = arith.addf %306, %309 : vector<16x36xf32>
    %311 = arith.addf %292, %310 : vector<16x36xf32>
    %cst_157 = arith.constant dense<0.000000e+00> : vector<16xf32>
    %312 = vector.multi_reduction <add>, %311, %cst_157 [1] : vector<16x36xf32> to vector<16xf32>
    %313 = vector.shape_cast %312 : vector<16xf32> to vector<16x1xf32>
    %cst_158 = arith.constant 3.600000e+01 : f32
    %314 = vector.broadcast %cst_158 : f32 to vector<16x1xf32>
    %315 = arith.divf %313, %314 : vector<16x1xf32>
    %316 = arith.mulf %311, %311 : vector<16x36xf32>
    %cst_159 = arith.constant dense<0.000000e+00> : vector<16xf32>
    %317 = vector.multi_reduction <add>, %316, %cst_159 [1] : vector<16x36xf32> to vector<16xf32>
    %318 = vector.shape_cast %317 : vector<16xf32> to vector<16x1xf32>
    %cst_160 = arith.constant 3.600000e+01 : f32
    %319 = vector.broadcast %cst_160 : f32 to vector<16x1xf32>
    %320 = arith.divf %318, %319 : vector<16x1xf32>
    %321 = vector.broadcast %315 : vector<16x1xf32> to vector<16x36xf32>
    %322 = arith.subf %311, %321 : vector<16x36xf32>
    %323 = arith.mulf %315, %315 : vector<16x1xf32>
    %324 = arith.subf %320, %323 : vector<16x1xf32>
    %cst_161 = arith.constant 9.99999974E-6 : f32
    %325 = vector.broadcast %cst_161 : f32 to vector<16x1xf32>
    %326 = arith.addf %324, %325 : vector<16x1xf32>
    %327 = math.rsqrt %326 : vector<16x1xf32>
    %328 = vector.broadcast %327 : vector<16x1xf32> to vector<16x36xf32>
    %329 = arith.mulf %322, %328 : vector<16x36xf32>
    %c1_162 = arith.constant 1 : index
    %c0_163 = arith.constant 0 : index
    %c0_164 = arith.constant 0 : index
    %330 = vector.load %arg23[%c1_162, %c0_163, %c0_164] : memref<3x1x36xf32, #tpu.memory_space<vmem>>, vector<1x1x36xf32>
    %331 = vector.shape_cast %330 : vector<1x1x36xf32> to vector<1x36xf32>
    %332 = vector.broadcast %331 : vector<1x36xf32> to vector<16x36xf32>
    %333 = arith.mulf %329, %332 : vector<16x36xf32>
    %c1_165 = arith.constant 1 : index
    %c0_166 = arith.constant 0 : index
    %c0_167 = arith.constant 0 : index
    %334 = vector.load %arg24[%c1_165, %c0_166, %c0_167] : memref<3x1x36xf32, #tpu.memory_space<vmem>>, vector<1x1x36xf32>
    %335 = vector.shape_cast %334 : vector<1x1x36xf32> to vector<1x36xf32>
    %336 = vector.broadcast %335 : vector<1x36xf32> to vector<16x36xf32>
    %337 = arith.addf %333, %336 : vector<16x36xf32>
    %338 = arith.truncf %337 : vector<16x36xf32> to vector<16x36xbf16>
    %c2_168 = arith.constant 2 : index
    %c0_169 = arith.constant 0 : index
    %c0_170 = arith.constant 0 : index
    %339 = vector.load %arg13[%c2_168, %c0_169, %c0_170] : memref<3x36x108xbf16, #tpu.memory_space<vmem>>, vector<1x36x108xbf16>
    %340 = vector.shape_cast %339 : vector<1x36x108xbf16> to vector<36x108xbf16>
    %cst_171 = arith.constant dense<0.000000e+00> : vector<16x108xf32>
    %341 = tpu.matmul %338, %340, %cst_171 {dimension_numbers = #tpu.dot_dimension_numbers<[1], [0], [0], [1], [0, 0, 1, 1], [], []>} : vector<16x36xbf16>, vector<36x108xbf16>, vector<16x108xf32> -> vector<16x108xf32>
    %c2_172 = arith.constant 2 : index
    %c0_173 = arith.constant 0 : index
    %c0_174 = arith.constant 0 : index
    %342 = vector.load %arg14[%c2_172, %c0_173, %c0_174] : memref<3x1x108xf32, #tpu.memory_space<vmem>>, vector<1x1x108xf32>
    %343 = vector.shape_cast %342 : vector<1x1x108xf32> to vector<1x108xf32>
    %344 = vector.broadcast %343 : vector<1x108xf32> to vector<16x108xf32>
    %345 = arith.addf %341, %344 : vector<16x108xf32>
    %346 = vector.extract_strided_slice %345 {offsets = [0, 0], sizes = [16, 18], strides = [1, 1]} : vector<16x108xf32> to vector<16x18xf32>
    %347 = vector.extract_strided_slice %345 {offsets = [0, 18], sizes = [16, 18], strides = [1, 1]} : vector<16x108xf32> to vector<16x18xf32>
    %348 = vector.extract_strided_slice %345 {offsets = [0, 36], sizes = [16, 18], strides = [1, 1]} : vector<16x108xf32> to vector<16x18xf32>
    %349 = arith.truncf %346 : vector<16x18xf32> to vector<16x18xbf16>
    %350 = arith.truncf %347 : vector<16x18xf32> to vector<16x18xbf16>
    %cst_175 = arith.constant dense<0.000000e+00> : vector<16x16xf32>
    %351 = tpu.matmul %349, %350, %cst_175 {dimension_numbers = #tpu.dot_dimension_numbers<[1], [1], [0], [0], [0, 0, 1, 0], [], []>} : vector<16x18xbf16>, vector<16x18xbf16>, vector<16x16xf32> -> vector<16x16xf32>
    %cst_176 = arith.constant 0.235702261 : f32
    %352 = vector.broadcast %cst_176 : f32 to vector<16x16xf32>
    %353 = arith.mulf %351, %352 : vector<16x16xf32>
    %354 = arith.addf %353, %43 : vector<16x16xf32>
    %cst_177 = arith.constant dense<0xFF800000> : vector<16xf32>
    %355 = vector.multi_reduction <maximumf>, %354, %cst_177 [1] : vector<16x16xf32> to vector<16xf32>
    %356 = vector.shape_cast %355 : vector<16xf32> to vector<16x1xf32>
    %357 = vector.broadcast %356 : vector<16x1xf32> to vector<16x16xf32>
    %358 = arith.subf %354, %357 : vector<16x16xf32>
    %359 = math.exp %358 : vector<16x16xf32>
    %cst_178 = arith.constant dense<0.000000e+00> : vector<16xf32>
    %360 = vector.multi_reduction <add>, %359, %cst_178 [1] : vector<16x16xf32> to vector<16xf32>
    %361 = vector.shape_cast %360 : vector<16xf32> to vector<16x1xf32>
    %362 = tpu.reciprocal %361 {approx = true} : vector<16x1xf32> -> vector<16x1xf32>
    %363 = vector.broadcast %362 : vector<16x1xf32> to vector<16x16xf32>
    %364 = arith.mulf %359, %363 : vector<16x16xf32>
    %365 = arith.truncf %364 : vector<16x16xf32> to vector<16x16xbf16>
    %366 = arith.truncf %348 : vector<16x18xf32> to vector<16x18xbf16>
    %cst_179 = arith.constant dense<0.000000e+00> : vector<16x18xf32>
    %367 = tpu.matmul %365, %366, %cst_179 {dimension_numbers = #tpu.dot_dimension_numbers<[1], [0], [0], [1], [0, 0, 1, 1], [], []>} : vector<16x16xbf16>, vector<16x18xbf16>, vector<16x18xf32> -> vector<16x18xf32>
    %368 = arith.truncf %367 : vector<16x18xf32> to vector<16x18xbf16>
    %c4 = arith.constant 4 : index
    %c0_180 = arith.constant 0 : index
    %c0_181 = arith.constant 0 : index
    %369 = vector.load %arg15[%c4, %c0_180, %c0_181] : memref<6x18x36xbf16, #tpu.memory_space<vmem>>, vector<1x18x36xbf16>
    %370 = vector.shape_cast %369 : vector<1x18x36xbf16> to vector<18x36xbf16>
    %cst_182 = arith.constant dense<0.000000e+00> : vector<16x36xf32>
    %371 = tpu.matmul %368, %370, %cst_182 {dimension_numbers = #tpu.dot_dimension_numbers<[1], [0], [0], [1], [0, 0, 1, 1], [], []>} : vector<16x18xbf16>, vector<18x36xbf16>, vector<16x36xf32> -> vector<16x36xf32>
    %372 = vector.extract_strided_slice %345 {offsets = [0, 54], sizes = [16, 18], strides = [1, 1]} : vector<16x108xf32> to vector<16x18xf32>
    %373 = vector.extract_strided_slice %345 {offsets = [0, 72], sizes = [16, 18], strides = [1, 1]} : vector<16x108xf32> to vector<16x18xf32>
    %374 = vector.extract_strided_slice %345 {offsets = [0, 90], sizes = [16, 18], strides = [1, 1]} : vector<16x108xf32> to vector<16x18xf32>
    %375 = arith.truncf %372 : vector<16x18xf32> to vector<16x18xbf16>
    %376 = arith.truncf %373 : vector<16x18xf32> to vector<16x18xbf16>
    %cst_183 = arith.constant dense<0.000000e+00> : vector<16x16xf32>
    %377 = tpu.matmul %375, %376, %cst_183 {dimension_numbers = #tpu.dot_dimension_numbers<[1], [1], [0], [0], [0, 0, 1, 0], [], []>} : vector<16x18xbf16>, vector<16x18xbf16>, vector<16x16xf32> -> vector<16x16xf32>
    %cst_184 = arith.constant 0.235702261 : f32
    %378 = vector.broadcast %cst_184 : f32 to vector<16x16xf32>
    %379 = arith.mulf %377, %378 : vector<16x16xf32>
    %380 = arith.addf %379, %43 : vector<16x16xf32>
    %cst_185 = arith.constant dense<0xFF800000> : vector<16xf32>
    %381 = vector.multi_reduction <maximumf>, %380, %cst_185 [1] : vector<16x16xf32> to vector<16xf32>
    %382 = vector.shape_cast %381 : vector<16xf32> to vector<16x1xf32>
    %383 = vector.broadcast %382 : vector<16x1xf32> to vector<16x16xf32>
    %384 = arith.subf %380, %383 : vector<16x16xf32>
    %385 = math.exp %384 : vector<16x16xf32>
    %cst_186 = arith.constant dense<0.000000e+00> : vector<16xf32>
    %386 = vector.multi_reduction <add>, %385, %cst_186 [1] : vector<16x16xf32> to vector<16xf32>
    %387 = vector.shape_cast %386 : vector<16xf32> to vector<16x1xf32>
    %388 = tpu.reciprocal %387 {approx = true} : vector<16x1xf32> -> vector<16x1xf32>
    %389 = vector.broadcast %388 : vector<16x1xf32> to vector<16x16xf32>
    %390 = arith.mulf %385, %389 : vector<16x16xf32>
    %391 = arith.truncf %390 : vector<16x16xf32> to vector<16x16xbf16>
    %392 = arith.truncf %374 : vector<16x18xf32> to vector<16x18xbf16>
    %cst_187 = arith.constant dense<0.000000e+00> : vector<16x18xf32>
    %393 = tpu.matmul %391, %392, %cst_187 {dimension_numbers = #tpu.dot_dimension_numbers<[1], [0], [0], [1], [0, 0, 1, 1], [], []>} : vector<16x16xbf16>, vector<16x18xbf16>, vector<16x18xf32> -> vector<16x18xf32>
    %394 = arith.truncf %393 : vector<16x18xf32> to vector<16x18xbf16>
    %c5 = arith.constant 5 : index
    %c0_188 = arith.constant 0 : index
    %c0_189 = arith.constant 0 : index
    %395 = vector.load %arg15[%c5, %c0_188, %c0_189] : memref<6x18x36xbf16, #tpu.memory_space<vmem>>, vector<1x18x36xbf16>
    %396 = vector.shape_cast %395 : vector<1x18x36xbf16> to vector<18x36xbf16>
    %cst_190 = arith.constant dense<0.000000e+00> : vector<16x36xf32>
    %397 = tpu.matmul %394, %396, %cst_190 {dimension_numbers = #tpu.dot_dimension_numbers<[1], [0], [0], [1], [0, 0, 1, 1], [], []>} : vector<16x18xbf16>, vector<18x36xbf16>, vector<16x36xf32> -> vector<16x36xf32>
    %398 = arith.addf %371, %397 : vector<16x36xf32>
    %c2_191 = arith.constant 2 : index
    %c0_192 = arith.constant 0 : index
    %c0_193 = arith.constant 0 : index
    %399 = vector.load %arg16[%c2_191, %c0_192, %c0_193] : memref<3x1x36xf32, #tpu.memory_space<vmem>>, vector<1x1x36xf32>
    %400 = vector.shape_cast %399 : vector<1x1x36xf32> to vector<1x36xf32>
    %401 = vector.broadcast %400 : vector<1x36xf32> to vector<16x36xf32>
    %402 = arith.addf %398, %401 : vector<16x36xf32>
    %403 = arith.addf %337, %402 : vector<16x36xf32>
    %cst_194 = arith.constant dense<0.000000e+00> : vector<16xf32>
    %404 = vector.multi_reduction <add>, %403, %cst_194 [1] : vector<16x36xf32> to vector<16xf32>
    %405 = vector.shape_cast %404 : vector<16xf32> to vector<16x1xf32>
    %cst_195 = arith.constant 3.600000e+01 : f32
    %406 = vector.broadcast %cst_195 : f32 to vector<16x1xf32>
    %407 = arith.divf %405, %406 : vector<16x1xf32>
    %408 = arith.mulf %403, %403 : vector<16x36xf32>
    %cst_196 = arith.constant dense<0.000000e+00> : vector<16xf32>
    %409 = vector.multi_reduction <add>, %408, %cst_196 [1] : vector<16x36xf32> to vector<16xf32>
    %410 = vector.shape_cast %409 : vector<16xf32> to vector<16x1xf32>
    %cst_197 = arith.constant 3.600000e+01 : f32
    %411 = vector.broadcast %cst_197 : f32 to vector<16x1xf32>
    %412 = arith.divf %410, %411 : vector<16x1xf32>
    %413 = vector.broadcast %407 : vector<16x1xf32> to vector<16x36xf32>
    %414 = arith.subf %403, %413 : vector<16x36xf32>
    %415 = arith.mulf %407, %407 : vector<16x1xf32>
    %416 = arith.subf %412, %415 : vector<16x1xf32>
    %cst_198 = arith.constant 9.99999974E-6 : f32
    %417 = vector.broadcast %cst_198 : f32 to vector<16x1xf32>
    %418 = arith.addf %416, %417 : vector<16x1xf32>
    %419 = math.rsqrt %418 : vector<16x1xf32>
    %420 = vector.broadcast %419 : vector<16x1xf32> to vector<16x36xf32>
    %421 = arith.mulf %414, %420 : vector<16x36xf32>
    %c2_199 = arith.constant 2 : index
    %c0_200 = arith.constant 0 : index
    %c0_201 = arith.constant 0 : index
    %422 = vector.load %arg21[%c2_199, %c0_200, %c0_201] : memref<3x1x36xf32, #tpu.memory_space<vmem>>, vector<1x1x36xf32>
    %423 = vector.shape_cast %422 : vector<1x1x36xf32> to vector<1x36xf32>
    %424 = vector.broadcast %423 : vector<1x36xf32> to vector<16x36xf32>
    %425 = arith.mulf %421, %424 : vector<16x36xf32>
    %c2_202 = arith.constant 2 : index
    %c0_203 = arith.constant 0 : index
    %c0_204 = arith.constant 0 : index
    %426 = vector.load %arg22[%c2_202, %c0_203, %c0_204] : memref<3x1x36xf32, #tpu.memory_space<vmem>>, vector<1x1x36xf32>
    %427 = vector.shape_cast %426 : vector<1x1x36xf32> to vector<1x36xf32>
    %428 = vector.broadcast %427 : vector<1x36xf32> to vector<16x36xf32>
    %429 = arith.addf %425, %428 : vector<16x36xf32>
    %430 = arith.truncf %429 : vector<16x36xf32> to vector<16x36xbf16>
    %c2_205 = arith.constant 2 : index
    %c0_206 = arith.constant 0 : index
    %c0_207 = arith.constant 0 : index
    %431 = vector.load %arg17[%c2_205, %c0_206, %c0_207] : memref<3x36x32xbf16, #tpu.memory_space<vmem>>, vector<1x36x32xbf16>
    %432 = vector.shape_cast %431 : vector<1x36x32xbf16> to vector<36x32xbf16>
    %cst_208 = arith.constant dense<0.000000e+00> : vector<16x32xf32>
    %433 = tpu.matmul %430, %432, %cst_208 {dimension_numbers = #tpu.dot_dimension_numbers<[1], [0], [0], [1], [0, 0, 1, 1], [], []>} : vector<16x36xbf16>, vector<36x32xbf16>, vector<16x32xf32> -> vector<16x32xf32>
    %c2_209 = arith.constant 2 : index
    %c0_210 = arith.constant 0 : index
    %c0_211 = arith.constant 0 : index
    %434 = vector.load %arg18[%c2_209, %c0_210, %c0_211] : memref<3x1x32xf32, #tpu.memory_space<vmem>>, vector<1x1x32xf32>
    %435 = vector.shape_cast %434 : vector<1x1x32xf32> to vector<1x32xf32>
    %436 = vector.broadcast %435 : vector<1x32xf32> to vector<16x32xf32>
    %437 = arith.addf %433, %436 : vector<16x32xf32>
    %cst_212 = arith.constant 0.000000e+00 : f32
    %438 = vector.broadcast %cst_212 : f32 to vector<16x32xf32>
    %439 = arith.maximumf %437, %438 : vector<16x32xf32>
    %440 = arith.truncf %439 : vector<16x32xf32> to vector<16x32xbf16>
    %c2_213 = arith.constant 2 : index
    %c0_214 = arith.constant 0 : index
    %c0_215 = arith.constant 0 : index
    %441 = vector.load %arg19[%c2_213, %c0_214, %c0_215] : memref<3x32x36xbf16, #tpu.memory_space<vmem>>, vector<1x32x36xbf16>
    %442 = vector.shape_cast %441 : vector<1x32x36xbf16> to vector<32x36xbf16>
    %cst_216 = arith.constant dense<0.000000e+00> : vector<16x36xf32>
    %443 = tpu.matmul %440, %442, %cst_216 {dimension_numbers = #tpu.dot_dimension_numbers<[1], [0], [0], [1], [0, 0, 1, 1], [], []>} : vector<16x32xbf16>, vector<32x36xbf16>, vector<16x36xf32> -> vector<16x36xf32>
    %c2_217 = arith.constant 2 : index
    %c0_218 = arith.constant 0 : index
    %c0_219 = arith.constant 0 : index
    %444 = vector.load %arg20[%c2_217, %c0_218, %c0_219] : memref<3x1x36xf32, #tpu.memory_space<vmem>>, vector<1x1x36xf32>
    %445 = vector.shape_cast %444 : vector<1x1x36xf32> to vector<1x36xf32>
    %446 = vector.broadcast %445 : vector<1x36xf32> to vector<16x36xf32>
    %447 = arith.addf %443, %446 : vector<16x36xf32>
    %448 = arith.addf %429, %447 : vector<16x36xf32>
    %cst_220 = arith.constant dense<0.000000e+00> : vector<16xf32>
    %449 = vector.multi_reduction <add>, %448, %cst_220 [1] : vector<16x36xf32> to vector<16xf32>
    %450 = vector.shape_cast %449 : vector<16xf32> to vector<16x1xf32>
    %cst_221 = arith.constant 3.600000e+01 : f32
    %451 = vector.broadcast %cst_221 : f32 to vector<16x1xf32>
    %452 = arith.divf %450, %451 : vector<16x1xf32>
    %453 = arith.mulf %448, %448 : vector<16x36xf32>
    %cst_222 = arith.constant dense<0.000000e+00> : vector<16xf32>
    %454 = vector.multi_reduction <add>, %453, %cst_222 [1] : vector<16x36xf32> to vector<16xf32>
    %455 = vector.shape_cast %454 : vector<16xf32> to vector<16x1xf32>
    %cst_223 = arith.constant 3.600000e+01 : f32
    %456 = vector.broadcast %cst_223 : f32 to vector<16x1xf32>
    %457 = arith.divf %455, %456 : vector<16x1xf32>
    %458 = vector.broadcast %452 : vector<16x1xf32> to vector<16x36xf32>
    %459 = arith.subf %448, %458 : vector<16x36xf32>
    %460 = arith.mulf %452, %452 : vector<16x1xf32>
    %461 = arith.subf %457, %460 : vector<16x1xf32>
    %cst_224 = arith.constant 9.99999974E-6 : f32
    %462 = vector.broadcast %cst_224 : f32 to vector<16x1xf32>
    %463 = arith.addf %461, %462 : vector<16x1xf32>
    %464 = math.rsqrt %463 : vector<16x1xf32>
    %465 = vector.broadcast %464 : vector<16x1xf32> to vector<16x36xf32>
    %466 = arith.mulf %459, %465 : vector<16x36xf32>
    %c2_225 = arith.constant 2 : index
    %c0_226 = arith.constant 0 : index
    %c0_227 = arith.constant 0 : index
    %467 = vector.load %arg23[%c2_225, %c0_226, %c0_227] : memref<3x1x36xf32, #tpu.memory_space<vmem>>, vector<1x1x36xf32>
    %468 = vector.shape_cast %467 : vector<1x1x36xf32> to vector<1x36xf32>
    %469 = vector.broadcast %468 : vector<1x36xf32> to vector<16x36xf32>
    %470 = arith.mulf %466, %469 : vector<16x36xf32>
    %c2_228 = arith.constant 2 : index
    %c0_229 = arith.constant 0 : index
    %c0_230 = arith.constant 0 : index
    %471 = vector.load %arg24[%c2_228, %c0_229, %c0_230] : memref<3x1x36xf32, #tpu.memory_space<vmem>>, vector<1x1x36xf32>
    %472 = vector.shape_cast %471 : vector<1x1x36xf32> to vector<1x36xf32>
    %473 = vector.broadcast %472 : vector<1x36xf32> to vector<16x36xf32>
    %474 = arith.addf %470, %473 : vector<16x36xf32>
    %475 = arith.truncf %474 : vector<16x36xf32> to vector<16x36xbf16>
    %c0_231 = arith.constant 0 : index
    %c0_232 = arith.constant 0 : index
    %476 = vector.load %arg25[%c0_231, %c0_232] : memref<36x128xbf16, #tpu.memory_space<vmem>>, vector<36x128xbf16>
    %cst_233 = arith.constant dense<0.000000e+00> : vector<16x128xf32>
    %477 = tpu.matmul %475, %476, %cst_233 {dimension_numbers = #tpu.dot_dimension_numbers<[1], [0], [0], [1], [0, 0, 1, 1], [], []>} : vector<16x36xbf16>, vector<36x128xbf16>, vector<16x128xf32> -> vector<16x128xf32>
    %c0_234 = arith.constant 0 : index
    %c0_235 = arith.constant 0 : index
    %478 = vector.load %arg26[%c0_234, %c0_235] : memref<1x128xf32, #tpu.memory_space<vmem>>, vector<1x128xf32>
    %479 = vector.broadcast %478 : vector<1x128xf32> to vector<16x128xf32>
    %480 = arith.addf %477, %479 : vector<16x128xf32>
    %c0_236 = arith.constant 0 : index
    %c0_237 = arith.constant 0 : index
    %481 = vector.load %arg27[%c0_236, %c0_237] : memref<16x128xf32, #tpu.memory_space<vmem>>, vector<16x128xf32>
    tpu.vector_store %arg27[%c0_236, %c0_237], %480 {strides = array<i32>} : memref<16x128xf32, #tpu.memory_space<vmem>>, vector<16x128xf32>,
    %c0_238 = arith.constant 0 : index
    %c4_239 = arith.constant 4 : index
    %482 = vector.load %arg27[%c0_238, %c4_239] : memref<16x128xf32, #tpu.memory_space<vmem>>, vector<2x9xf32>
    tpu.vector_store %arg27[%c0_238, %c4_239], %15 {strides = array<i32>} : memref<16x128xf32, #tpu.memory_space<vmem>>, vector<2x9xf32>,
    return
  }
}

</mosaic_0001>

<bundles_post_ra>
// kernel: tpu_custom_call.1
= control target key start
LH: loop header
LB: loop body
LE: loop exit
PB: predicated region body
PF: predicated region fallthrough
CT: control target
= control target key end

     0   :  { %s4639_s0 = inlined_call_operand.hbm [shape: f32[2,36], index: 0, kind: input, shape index: {}]   ;;  %s4640_s1 = inlined_call_operand.hbm [shape: f32[16,36], index: 1, kind: input, shape index: {}]   ;;  %s4641_s2 = inlined_call_operand.vmem [shape: f32[16,2], index: 2, kind: input, shape index: {}]   ;;  %s4642_s3 = inlined_call_operand.hbm [shape: f32[2,16], index: 3, kind: input, shape index: {}]   ;;  %s4643_s4 = inlined_call_operand.hbm [shape: f32[1,16], index: 4, kind: input, shape index: {}]   ;;  %s4644_s5 = inlined_call_operand.hbm [shape: f32[1,9], index: 5, kind: input, shape index: {}]   ;;  %s4645_s6 = inlined_call_operand.hbm [shape: f32[16,16], index: 6, kind: input, shape index: {}]   ;;  %s4646_s7 = inlined_call_operand.hbm [shape: f32[1,36], index: 7, kind: input, shape index: {}]   ;;  %s4647_s8 = inlined_call_operand.hbm [shape: f32[1,36], index: 8, kind: input, shape index: {}]   ;;  %s4648_s9 = inlined_call_operand.vmem [shape: bf16[36,32], index: 9, kind: input, shape index: {}]   ;;  %s4649_s10 = inlined_call_operand.hbm [shape: f32[1,32], index: 10, kind: input, shape index: {}]   ;;  %s4650_s11 = inlined_call_operand.vmem [shape: bf16[32,9], index: 11, kind: input, shape index: {}]   ;;  %s4651_s12 = inlined_call_operand.hbm [shape: f32[1,9], index: 12, kind: input, shape index: {}]   ;;  %s4652_s13 = inlined_call_operand.vmem [shape: bf16[3,36,108], index: 13, kind: input, shape index: {}]   ;;  %s4653_s14 = inlined_call_operand.hbm [shape: f32[3,1,108], index: 14, kind: input, shape index: {}]   ;;  %s4654_s15 = inlined_call_operand.vmem [shape: bf16[6,18,36], index: 15, kind: input, shape index: {}]   ;;  %s4655_s16 = inlined_call_operand.hbm [shape: f32[3,1,36], index: 16, kind: input, shape index: {}]   ;;  %s4656_s17 = inlined_call_operand.vmem [shape: bf16[3,36,32], index: 17, kind: input, shape index: {}]   ;;  %s4657_s18 = inlined_call_operand.vmem [shape: f32[3,1,32], index: 18, kind: input, shape index: {}]   ;;  %s4658_s19 = inlined_call_operand.vmem [shape: bf16[3,32,36], index: 19, kind: input, shape index: {}]   ;;  %s4659_s20 = inlined_call_operand.vmem [shape: f32[3,1,36], index: 20, kind: input, shape index: {}]   ;;  %s4660_s21 = inlined_call_operand.vmem [shape: f32[3,1,36], index: 21, kind: input, shape index: {}]   ;;  %s4661_s22 = inlined_call_operand.vmem [shape: f32[3,1,36], index: 22, kind: input, shape index: {}]   ;;  %s4662_s23 = inlined_call_operand.vmem [shape: f32[3,1,36], index: 23, kind: input, shape index: {}]   ;;  %s4663_s24 = inlined_call_operand.vmem [shape: f32[3,1,36], index: 24, kind: input, shape index: {}]   ;;  %s4664_s25 = inlined_call_operand.vmem [shape: bf16[36,128], index: 25, kind: input, shape index: {}]   ;;  %s4665_s26 = inlined_call_operand.vmem [shape: f32[1,128], index: 26, kind: input, shape index: {}]   ;;  %s4666_s27 = inlined_call_operand.hbm [shape: f32[16,128], index: 27, kind: output, shape index: {}]  }
   0x1   :  { %4681 = sst [smem:[#allocation31_spill]] %s4639_s0 }
   0x2   :  { %4682 = sst [smem:[#allocation32_spill]] %s4640_s1 }
   0x3   :  { %4683 = sst [smem:[#allocation33_spill]] %s4641_s2 }
   0x4   :  { %4684 = sst [smem:[#allocation34_spill]] %s4642_s3 }
   0x5   :  { %4685 = sst [smem:[#allocation35_spill]] %s4643_s4 }
   0x6   :  { %4686 = sst [smem:[#allocation36_spill]] %s4644_s5 }
   0x7   :  { %4687 = sst [smem:[#allocation37_spill]] %s4645_s6 }
   0x8   :  { %4688 = sst [smem:[#allocation38_spill]] %s4646_s7 }
   0x9   :  { %4689 = sst [smem:[#allocation39_spill]] %s4647_s8 }
   0xa   :  { %4690 = sst [smem:[#allocation40_spill]] %s4648_s9 }
   0xb   :  { %4691 = sst [smem:[#allocation41_spill]] %s4649_s10 }
   0xc   :  { %4692 = sst [smem:[#allocation42_spill]] %s4650_s11 }
   0xd   :  { %4693 = sst [smem:[#allocation43_spill]] %s4664_s25 }
   0xe   :  { %4694 = sst [smem:[#allocation44_spill]] %s4665_s26 }
   0xf   :  { %4695 = sst [smem:[#allocation45_spill]] %s4666_s27 }
  0x10   :  { %32 = vsyncpa [#allocation3], 0 }
  0x11   :  { %33 = vsyncpa [#allocation6], 0 }
  0x12   :  { %34 = vsyncpa [#allocation9], 0 }
  0x13   :  { %35 = vsyncpa [#allocation12], 0 }
  0x14   :  { %36 = vsyncpa [#allocation15], 0 }
  0x15   :  { %37 = vsyncpa [#allocation18], 0 }
  0x16   :  { %38 = vsyncpa [#allocation21], 0 }
  0x17   :  { %39 = vsyncpa [#allocation4], 0  ;;  %s3796_s7 = smov [#allocation5]   ;;  %s4696_s9 = sld [smem:[#allocation32_spill]] }
  0x18   :  { %s55_s4 = sshll.u32 %s3796_s7, 4  ;;  %s56_s4 = int_to_ptr.vmem [resolvable:$true] %s55_s4 }
  0x1d   :  { %s3494_s5 = scalar_lea.hbm %s4696_s9, 256 }
  0x1e   :  { %p3495_p0 = scmp.ne.s32.totalorder %s4696_s9, %s3494_s5  ;;  %p3498_p1 = scmp.lt.u32.totalorder %s3494_s5, %s4696_s9 }
  0x20   :  { %p3500_p2 = pnand %p3498_p1, %p3495_p0 }
  0x22   :  { %3503 = shalt.err (!%p3500_p2)
}
  0x23   :  { %s3504_s1 = scalar_lea.vmem %s56_s4, 256  ;;  %p3509_p4 = scmp.lt.s32.totalorder %s56_s4, %s56_s4 }
  0x24   :  { %p3505_p3 = scmp.ne.s32.totalorder %s56_s4, %s3504_s1  ;;  %p3510_p5 = scmp.lt.s32.totalorder %s3504_s1, %s3504_s1 }
  0x26   :  { %p3511_p6 = por %p3510_p5, %p3509_p4 }
  0x28   :  { %p3512_p7 = pnand %p3511_p6, %p3505_p3 }
  0x2a   :  { %3515 = shalt.err (!%p3512_p7)
}
  0x2b   :  { %s3797_s6 = smov 128   ;;  %s3798_s11 = smov 8  }
  0x2c   :  { %61 = dma.hbm_to_vmem [thread:$0]  %s4696_s9, 256, %s56_s4, [#allocation6], %s3797_s6, %s3797_s6, %s3798_s11  }
  0x2d   :  { %s3799_s7 = smov [#allocation8]   ;;  %s3800_s30 = smov [#allocation11]  }
  0x2e   :  { %s80_s8 = sshll.u32 %s3799_s7, 4  ;;  %s99_s5 = sshll.u32 %s3800_s30, 4  ;;  %s81_s8 = int_to_ptr.vmem [resolvable:$true] %s80_s8  ;;  %s100_s5 = int_to_ptr.vmem [resolvable:$true] %s99_s5 }
  0x2f   :  { %s4697_s10 = sld [smem:[#allocation35_spill]] }
  0x35   :  { %s3516_s29 = scalar_lea.hbm %s4697_s10, 16 }
  0x36   :  { %p3517_p8 = scmp.ne.s32.totalorder %s4697_s10, %s3516_s29  ;;  %p3520_p9 = scmp.lt.u32.totalorder %s3516_s29, %s4697_s10 }
  0x38   :  { %p3522_p10 = pnand %p3520_p9, %p3517_p8 }
  0x3a   :  { %3525 = shalt.err (!%p3522_p10)
}
  0x3b   :  { %s3526_s4 = scalar_lea.vmem %s81_s8, 16  ;;  %s3530_s9 = scalar_lea.vmem %s81_s8, 32 }
  0x3c   :  { %p3527_p11 = scmp.ne.s32.totalorder %s81_s8, %s3526_s4  ;;  %p3531_p12 = scmp.lt.s32.totalorder %s81_s8, %s81_s8 }
  0x3d   :  { %p3532_p13 = scmp.lt.s32.totalorder %s3530_s9, %s3526_s4 }
  0x3f   :  { %p3533_p0 = por %p3532_p13, %p3531_p12 }
  0x41   :  { %p3534_p1 = pnand %p3533_p0, %p3527_p11 }
  0x43   :  { %3537 = shalt.err (!%p3534_p1)
}
  0x44   :  { %83 = dma.hbm_to_vmem [thread:$0]  %s4697_s10, 16, %s81_s8, [#allocation9]  }
  0x45   :  { %s4698_s30 = sld [smem:[#allocation37_spill]] }
  0x4b   :  { %s3538_s25 = scalar_lea.hbm %s4698_s30, 256 }
  0x4c   :  { %p3539_p2 = scmp.ne.s32.totalorder %s4698_s30, %s3538_s25  ;;  %p3542_p3 = scmp.lt.u32.totalorder %s3538_s25, %s4698_s30 }
  0x4e   :  { %p3544_p4 = pnand %p3542_p3, %p3539_p2 }
  0x50   :  { %3547 = shalt.err (!%p3544_p4)
}
  0x51   :  { %s3548_s1 = scalar_lea.vmem %s100_s5, 256  ;;  %p3553_p6 = scmp.lt.s32.totalorder %s100_s5, %s100_s5 }
  0x52   :  { %p3549_p5 = scmp.ne.s32.totalorder %s100_s5, %s3548_s1  ;;  %p3554_p7 = scmp.lt.s32.totalorder %s3548_s1, %s3548_s1 }
  0x54   :  { %p3555_p8 = por %p3554_p7, %p3553_p6 }
  0x56   :  { %p3556_p9 = pnand %p3555_p8, %p3549_p5 }
  0x58   :  { %3559 = shalt.err (!%p3556_p9)
}
  0x59   :  { %105 = dma.hbm_to_vmem [thread:$0]  %s4698_s30, 256, %s100_s5, [#allocation12], %s3797_s6, %s3797_s6, %s3798_s11  }
  0x5a   :  { %s3801_s4 = smov [#allocation14]   ;;  %s3802_s2 = smov [#allocation17]  }
  0x5b   :  { %s122_s9 = sshll.u32 %s3801_s4, 4  ;;  %s146_s3 = sshll.u32 %s3802_s2, 4  ;;  %s123_s9 = int_to_ptr.vmem [resolvable:$true] %s122_s9  ;;  %s147_s3 = int_to_ptr.vmem [resolvable:$true] %s146_s3 }
  0x5c   :  { %s4699_s25 = sld [smem:[#allocation39_spill]] }
  0x62   :  { %s3560_s26 = scalar_lea.hbm %s4699_s25, 16 }
  0x63   :  { %p3561_p10 = scmp.ne.s32.totalorder %s4699_s25, %s3560_s26  ;;  %p3564_p11 = scmp.lt.u32.totalorder %s3560_s26, %s4699_s25 }
  0x65   :  { %p3566_p12 = pnand %p3564_p11, %p3561_p10 }
  0x67   :  { %3569 = shalt.err (!%p3566_p12)
}
  0x68   :  { %s3570_s5 = scalar_lea.vmem %s123_s9, 16  ;;  %s3574_s30 = scalar_lea.vmem %s123_s9, 32 }
  0x69   :  { %p3571_p13 = scmp.ne.s32.totalorder %s123_s9, %s3570_s5  ;;  %p3575_p0 = scmp.lt.s32.totalorder %s123_s9, %s123_s9 }
  0x6a   :  { %p3576_p1 = scmp.lt.s32.totalorder %s3574_s30, %s3570_s5 }
  0x6c   :  { %p3577_p2 = por %p3576_p1, %p3575_p0 }
  0x6e   :  { %p3578_p3 = pnand %p3577_p2, %p3571_p13 }
  0x70   :  { %3581 = shalt.err (!%p3578_p3)
}
  0x71   :  { %125 = dma.hbm_to_vmem [thread:$0]  %s4699_s25, 16, %s123_s9, [#allocation15]  }
  0x72   :  { %s3582_s27 = scalar_lea.hbm %s4651_s12, 16 }
  0x73   :  { %p3583_p4 = scmp.ne.s32.totalorder %s4651_s12, %s3582_s27  ;;  %p3586_p5 = scmp.lt.u32.totalorder %s3582_s27, %s4651_s12 }
  0x75   :  { %p3588_p6 = pnand %p3586_p5, %p3583_p4 }
  0x77   :  { %3591 = shalt.err (!%p3588_p6)
}
  0x78   :  { %s3592_s29 = scalar_lea.vmem %s147_s3, 16  ;;  %s3596_s1 = scalar_lea.vmem %s147_s3, 32 }
  0x79   :  { %p3593_p7 = scmp.ne.s32.totalorder %s147_s3, %s3592_s29  ;;  %p3597_p8 = scmp.lt.s32.totalorder %s147_s3, %s147_s3 }
  0x7a   :  { %p3598_p9 = scmp.lt.s32.totalorder %s3596_s1, %s3592_s29 }
  0x7c   :  { %p3599_p10 = por %p3598_p9, %p3597_p8 }
  0x7e   :  { %p3600_p11 = pnand %p3599_p10, %p3593_p7 }
  0x80   :  { %3603 = shalt.err (!%p3600_p11)
}
  0x81   :  { %149 = dma.hbm_to_vmem [thread:$0]  %s4651_s12, 16, %s147_s3, [#allocation18]  }
  0x82   :  { %s3803_s5 = smov [#allocation2]   ;;  %s3804_s8 = smov [#allocation7]  }
  0x83   :  { %s46_s30 = sshll.u32 %s3803_s5, 4  ;;  %s70_s10 = sshll.u32 %s3804_s8, 4  ;;  %s47_s30 = int_to_ptr.vmem [resolvable:$true] %s46_s30  ;;  %s71_s10 = int_to_ptr.vmem [resolvable:$true] %s70_s10 }
  0x84   :  { %s4700_s27 = sld [smem:[#allocation31_spill]] }
  0x8a   :  { %s3604_s7 = scalar_lea.hbm %s4700_s27, 32 }
  0x8b   :  { %p3605_p12 = scmp.ne.s32.totalorder %s4700_s27, %s3604_s7  ;;  %p3608_p13 = scmp.lt.u32.totalorder %s3604_s7, %s4700_s27 }
  0x8d   :  { %p3610_p0 = pnand %p3608_p13, %p3605_p12 }
  0x8f   :  { %3613 = shalt.err (!%p3610_p0)
}
  0x90   :  { %s3614_s12 = scalar_lea.vmem %s47_s30, 32  ;;  %p3619_p2 = scmp.lt.s32.totalorder %s47_s30, %s47_s30 }
  0x91   :  { %p3615_p1 = scmp.ne.s32.totalorder %s47_s30, %s3614_s12  ;;  %p3620_p3 = scmp.lt.s32.totalorder %s3614_s12, %s3614_s12 }
  0x93   :  { %p3621_p4 = por %p3620_p3, %p3619_p2 }
  0x95   :  { %p3622_p5 = pnand %p3621_p4, %p3615_p1 }
  0x97   :  { %3625 = shalt.err (!%p3622_p5)
}
  0x98   :  { %49 = dma.hbm_to_vmem [thread:$0]  %s4700_s27, 32, %s47_s30, [#allocation3]  }
  0x99   :  { %s4701_s5 = sld [smem:[#allocation34_spill]] }
  0x9f   :  { %s3626_s8 = scalar_lea.hbm %s4701_s5, 32 }
  0xa0   :  { %p3627_p6 = scmp.ne.s32.totalorder %s4701_s5, %s3626_s8  ;;  %p3630_p7 = scmp.lt.u32.totalorder %s3626_s8, %s4701_s5 }
  0xa2   :  { %p3632_p8 = pnand %p3630_p7, %p3627_p6 }
  0xa4   :  { %3635 = shalt.err (!%p3632_p8)
}
  0xa5   :  { %s3636_s28 = scalar_lea.vmem %s71_s10, 32  ;;  %p3641_p10 = scmp.lt.s32.totalorder %s71_s10, %s71_s10 }
  0xa6   :  { %p3637_p9 = scmp.ne.s32.totalorder %s71_s10, %s3636_s28  ;;  %p3642_p11 = scmp.lt.s32.totalorder %s3636_s28, %s3636_s28 }
  0xa8   :  { %p3643_p12 = por %p3642_p11, %p3641_p10 }
  0xaa   :  { %p3644_p13 = pnand %p3643_p12, %p3637_p9 }
  0xac   :  { %3647 = shalt.err (!%p3644_p13)
}
  0xad   :  { %73 = dma.hbm_to_vmem [thread:$0]  %s4701_s5, 32, %s71_s10, [#allocation6]  }
  0xae   :  { %s3805_s0 = smov [#allocation10]   ;;  %s3806_s12 = smov [#allocation13]  }
  0xaf   :  { %s90_s29 = sshll.u32 %s3805_s0, 4  ;;  %s112_s3 = sshll.u32 %s3806_s12, 4  ;;  %s91_s29 = int_to_ptr.vmem [resolvable:$true] %s90_s29  ;;  %s113_s3 = int_to_ptr.vmem [resolvable:$true] %s112_s3 }
  0xb0   :  { %s4702_s25 = sld [smem:[#allocation36_spill]] }
  0xb6   :  { %s3648_s8 = scalar_lea.hbm %s4702_s25, 16 }
  0xb7   :  { %p3649_p0 = scmp.ne.s32.totalorder %s4702_s25, %s3648_s8  ;;  %p3652_p1 = scmp.lt.u32.totalorder %s3648_s8, %s4702_s25 }
  0xb9   :  { %p3654_p2 = pnand %p3652_p1, %p3649_p0 }
  0xbb   :  { %3657 = shalt.err (!%p3654_p2)
}
  0xbc   :  { %s3658_s10 = scalar_lea.vmem %s91_s29, 16  ;;  %s3662_s5 = scalar_lea.vmem %s91_s29, 32 }
  0xbd   :  { %p3659_p3 = scmp.ne.s32.totalorder %s91_s29, %s3658_s10  ;;  %p3663_p4 = scmp.lt.s32.totalorder %s91_s29, %s91_s29 }
  0xbe   :  { %p3664_p5 = scmp.lt.s32.totalorder %s3662_s5, %s3658_s10 }
  0xc0   :  { %p3665_p6 = por %p3664_p5, %p3663_p4 }
  0xc2   :  { %p3666_p7 = pnand %p3665_p6, %p3659_p3 }
  0xc4   :  { %3669 = shalt.err (!%p3666_p7)
}
  0xc5   :  { %93 = dma.hbm_to_vmem [thread:$0]  %s4702_s25, 16, %s91_s29, [#allocation9]  }
  0xc6   :  { %s4703_s12 = sld [smem:[#allocation38_spill]] }
  0xcc   :  { %s3670_s1 = scalar_lea.hbm %s4703_s12, 16 }
  0xcd   :  { %p3671_p8 = scmp.ne.s32.totalorder %s4703_s12, %s3670_s1  ;;  %p3674_p9 = scmp.lt.u32.totalorder %s3670_s1, %s4703_s12 }
  0xcf   :  { %p3676_p10 = pnand %p3674_p9, %p3671_p8 }
  0xd1   :  { %3679 = shalt.err (!%p3676_p10)
}
  0xd2   :  { %s3680_s7 = scalar_lea.vmem %s113_s3, 16  ;;  %s3684_s26 = scalar_lea.vmem %s113_s3, 32 }
  0xd3   :  { %p3681_p11 = scmp.ne.s32.totalorder %s113_s3, %s3680_s7  ;;  %p3685_p12 = scmp.lt.s32.totalorder %s113_s3, %s113_s3 }
  0xd4   :  { %p3686_p13 = scmp.lt.s32.totalorder %s3684_s26, %s3680_s7 }
  0xd6   :  { %p3687_p0 = por %p3686_p13, %p3685_p12 }
  0xd8   :  { %p3688_p1 = pnand %p3687_p0, %p3681_p11 }
  0xda   :  { %3691 = shalt.err (!%p3688_p1)
}
  0xdb   :  { %115 = dma.hbm_to_vmem [thread:$0]  %s4703_s12, 16, %s113_s3, [#allocation12]  }
  0xdc   :  { %s3807_s10 = smov [#allocation16]   ;;  %s3808_s28 = smov [#allocation19]  }
  0xdd   :  { %s134_s5 = sshll.u32 %s3807_s10, 4  ;;  %s157_s30 = sshll.u32 %s3808_s28, 4  ;;  %s135_s5 = int_to_ptr.vmem [resolvable:$true] %s134_s5  ;;  %s158_s30 = int_to_ptr.vmem [resolvable:$true] %s157_s30 }
  0xde   :  { %s4704_s1 = sld [smem:[#allocation41_spill]] }
  0xe4   :  { %s3692_s9 = scalar_lea.hbm %s4704_s1, 16 }
  0xe5   :  { %p3693_p2 = scmp.ne.s32.totalorder %s4704_s1, %s3692_s9  ;;  %p3696_p3 = scmp.lt.u32.totalorder %s3692_s9, %s4704_s1 }
  0xe7   :  { %p3698_p4 = pnand %p3696_p3, %p3693_p2 }
  0xe9   :  { %3701 = shalt.err (!%p3698_p4)
}
  0xea   :  { %s3702_s3 = scalar_lea.vmem %s135_s5, 16  ;;  %s3706_s12 = scalar_lea.vmem %s135_s5, 32 }
  0xeb   :  { %p3703_p5 = scmp.ne.s32.totalorder %s135_s5, %s3702_s3  ;;  %p3707_p6 = scmp.lt.s32.totalorder %s135_s5, %s135_s5 }
  0xec   :  { %p3708_p7 = scmp.lt.s32.totalorder %s3706_s12, %s3702_s3 }
  0xee   :  { %p3709_p8 = por %p3708_p7, %p3707_p6 }
  0xf0   :  { %p3710_p9 = pnand %p3709_p8, %p3703_p5 }
  0xf2   :  { %3713 = shalt.err (!%p3710_p9)
}
  0xf3   :  { %137 = dma.hbm_to_vmem [thread:$0]  %s4704_s1, 16, %s135_s5, [#allocation15]  }
  0xf4   :  { %s3714_s28 = scalar_lea.hbm %s4653_s14, 48 }
  0xf5   :  { %p3715_p10 = scmp.ne.s32.totalorder %s4653_s14, %s3714_s28  ;;  %p3718_p11 = scmp.lt.u32.totalorder %s3714_s28, %s4653_s14 }
  0xf7   :  { %p3720_p12 = pnand %p3718_p11, %p3715_p10 }
  0xf9   :  { %3723 = shalt.err (!%p3720_p12)
}
  0xfa   :  { %s3724_s4 = scalar_lea.vmem %s158_s30, 48  ;;  %s3728_s2 = scalar_lea.vmem %s158_s30, 64 }
  0xfb   :  { %p3725_p13 = scmp.ne.s32.totalorder %s158_s30, %s3724_s4  ;;  %p3729_p0 = scmp.lt.s32.totalorder %s158_s30, %s158_s30 }
  0xfc   :  { %p3730_p1 = scmp.lt.s32.totalorder %s3728_s2, %s3724_s4 }
  0xfe   :  { %p3731_p2 = por %p3730_p1, %p3729_p0 }
 0x100   :  { %p3732_p3 = pnand %p3731_p2, %p3725_p13 }
 0x102   :  { %3735 = shalt.err (!%p3732_p3)
}
 0x103   :  { %s3809_s5 = smov 16   ;;  %s3810_s1 = smov 1  }
 0x104   :  { %163 = dma.hbm_to_vmem [thread:$0]  %s4653_s14, 48, %s158_s30, [#allocation18], %s3809_s5, %s3809_s5, %s3810_s1  }
 0x105   :  { %s3811_s12 = smov [#allocation20]   ;;  %s3736_s10 = scalar_lea.hbm %s4655_s16, 48 }
 0x106   :  { %s171_s26 = sshll.u32 %s3811_s12, 4  ;;  %p3737_p4 = scmp.ne.s32.totalorder %s4655_s16, %s3736_s10  ;;  %s172_s26 = int_to_ptr.vmem [resolvable:$true] %s171_s26 }
 0x107   :  { %p3740_p5 = scmp.lt.u32.totalorder %s3736_s10, %s4655_s16 }
 0x109   :  { %p3742_p6 = pnand %p3740_p5, %p3737_p4 }
 0x10b   :  { %3745 = shalt.err (!%p3742_p6)
}
 0x10c   :  { %s3746_s8 = scalar_lea.vmem %s172_s26, 48  ;;  %s3750_s14 = scalar_lea.vmem %s172_s26, 64 }
 0x10d   :  { %p3747_p7 = scmp.ne.s32.totalorder %s172_s26, %s3746_s8  ;;  %p3751_p8 = scmp.lt.s32.totalorder %s172_s26, %s172_s26 }
 0x10e   :  { %p3752_p9 = scmp.lt.s32.totalorder %s3750_s14, %s3746_s8 }
 0x110   :  { %p3753_p10 = por %p3752_p9, %p3751_p8 }
 0x112   :  { %p3754_p11 = pnand %p3753_p10, %p3747_p7 }
 0x114   :  { %3757 = shalt.err (!%p3754_p11)
}
 0x115   :  { %177 = dma.hbm_to_vmem [thread:$0]  %s4655_s16, 48, %s172_s26, [#allocation21], %s3809_s5, %s3809_s5, %s3810_s1  }
 0x116   :  { %3780 = dma.done.wait [#allocation3], 32  }
 0x117   :  { %3781 = vsyncadd [#allocation3], 4294967264 }
 0x118   :  { %3782 = dma.done.wait [#allocation6], 288  }
 0x119   :  { %3783 = vsyncadd [#allocation6], 4294967008 }
 0x11a   :  { %3784 = dma.done.wait [#allocation9], 32  }
 0x11b   :  { %3785 = vsyncadd [#allocation9], 4294967264 }
 0x11c   :  { %3786 = dma.done.wait [#allocation12], 272  }
 0x11d   :  { %3787 = vsyncadd [#allocation12], 4294967024 }
 0x11e   :  { %3788 = dma.done.wait [#allocation15], 32  }
 0x11f   :  { %3789 = vsyncadd [#allocation15], 4294967264 }
 0x120   :  { %3790 = dma.done.wait [#allocation18], 64  }
 0x121   :  { %3791 = vsyncadd [#allocation18], 4294967232 }
 0x122   :  { %3792 = dma.done.wait [#allocation21], 48  }
 0x123   :  { %3793 = vsyncadd [#allocation21], 4294967248  ;;  %v3812_v0 = vmov 0.0   ;;  %vm3813_vm0 = vmmov 0   ;;  %s4705_s5 = sld [smem:[#allocation40_spill]]  ;;  %vm270_vm1 = vcmask 1041408   ;;  %v519_v48 = vlaneseq }
 0x124   :  { %3110 = vmatprep.subr.bf16.mxu0 %v3812_v0  ;;  %3116 = vmatprep.mubr.msk.bf16.mxu0 %vm3813_vm0, %v3812_v0  ;;  %v235_v5 = vld [vmem:[#allocation2] sm:$0x3]  ;;  %vm266_vm2 = vcmask 293888   ;;  %s4706_s25 = sld [smem:[#allocation42_spill]]  ;;  %v2853_v9 = vld [vmem:[#allocation16] ss:$0 sm:$0xff] }
 0x125   :  { %3120 = vmatprep.subr.bf16.mxu1 %v3812_v0  ;;  %3124 = vmatprep.mubr.msk.bf16.mxu1 %vm3813_vm0, %v3812_v0  ;;  %v238_v6 = vpack.c.bf16 %v235_v5, %v235_v5  ;;  %vm339_vm3 = vcmask 261120   ;;  %v2858_v17 = vld [vmem:[#allocation17] ss:$0 sm:$0xff]  ;;  %vm383_vm4 = vcmask 66560   ;;  %v2862_v24 = vld [vmem:[#allocation10] ss:$0 sm:$0xff] }
 0x126   :  { %s4707_s9 = sld [smem:[#allocation33_spill]]  ;;  %vm411_vm6 = vcmask 15360   ;;  %v407_v29 = vld [vmem:[#allocation7] sm:$0x3]  ;;  %v2863_v30 = vld [vmem:[#allocation8] ss:$0 sm:$0xff] }
 0x127   :  { %vm408_vm7 = vcmp.gt.f32.partialorder %v407_v29, 0.5  ;;  %v3383_v34 = vld [vmem:[%s4652_s13] sm:$0xff]   ;;  %v500_v35 = vld [vmem:[#allocation11] sm:$0xff]  ;;  %vm504_vm10 = vcmask 130048   ;;  %v3384_v45 = vld [vmem:[%s4652_s13 + $0x8] sm:$0xff]   ;;  %v520_v49 = vshrl.u32 %v519_v48, 7 }
 0x128   :  { %v501_v37 = vld [vmem:[#allocation11 + $0x8] sm:$0xff]  ;;  %v3385_v46 = vld [vmem:[%s4652_s13 + $0x10] ss:$0 sps:$4 sm:$0x33]   ;;  %v514_v50 = vld [vmem:[#allocation14] sm:$0x1] }
 0x129   :  { %v3378_v1 = vld [vmem:[%s4705_s5] sm:$0xff]   ;;  %v3379_v2 = vld [vmem:[%s4705_s5 + $0x8] sm:$0xff]   ;;  %v3380_v3 = vld [vmem:[%s4705_s5 + $0x10] ss:$0 sps:$4 sm:$0x33]   ;;  %v652_v47 = vsel %vm270_vm1, %v3385_v46, 0 }
 0x12a   :  { %3111 = vmatpush3.bf16.msra.mxu0 %v3378_v1  ;;  %v272_v4 = vsel %vm270_vm1, %v3380_v3, 0  ;;  %v3381_v7 = vld [vmem:[%s4706_s25] sm:$0xff]   ;;  %v3382_v8 = vld [vmem:[%s4706_s25 + $0x8] sm:$0xff]   ;;  %v515_v51 = vand.u32 2147483647, %v514_v50  ;;  %v521_v52 = vsub.s32 0, %v520_v49 }
 0x12b   :  { %3112 = vmatprep.subr.bf16.mxu0 %v3812_v0  ;;  %3121 = vmatpush3.bf16.msra.mxu1 %v3381_v7  ;;  %v517_v54 = vld [vmem:[#allocation5 + $0x8] sm:$0xff]  ;;  %v516_v55 = vld [vmem:[#allocation5] sm:$0xff]  ;;  %s3814_s7 = smov 56   ;;  %s3815_s3 = smov 110   ;;  %vm699_vm13 = vcmask 146432  }
 0x12c   :  { %3122 = vmatprep.subr.bf16.mxu1 %v3812_v0  ;;  %v236_v28 = vld [vmem:[%s4707_s9] sm:$0xff]  ;;  %v237_v33 = vld [vmem:[%s4707_s9 + $0x8] sm:$0xff]  ;;  %v522_v53 = vrot.slane %v515_v51, %v521_v52  ;;  %s3816_s12 = smov 74   ;;  %s3818_s26 = smov 92  }
 0x12d   :  { %v2867_v58 = vld [vmem:[#allocation13] ss:$0 sm:$0xff]  ;;  %s3819_s29 = smov 38   ;;  %s4709_s30 = sld [smem:[#allocation44_spill]] }
 0x12e   :  { %3113 = vmatpush3.bf16.msra.mxu0 %v3379_v2  ;;  %v525_v56 = vmul.f32 %v522_v53, %v517_v54  ;;  %v524_v57 = vmul.f32 %v522_v53, %v516_v55 }
 0x12f   :  { %3114 = vmatprep.subr.bf16.mxu0 %v3812_v0  ;;  %3123 = vmatpush3.bf16.msra.mxu1 %v3382_v8 }
 0x130   :  { %3138 = vmatprep.subr.bf16.mxu1 %v3812_v0  ;;  %v533_v59 = vadd.f32 %v2867_v58, %v525_v56  ;;  %v532_v60 = vadd.f32 %v2867_v58, %v524_v57 }
 0x132   :  { %3115 = vmatpush3.bf16.msra.mxu0 %v272_v4 }
 0x135   :  { %3117 = vmatmul.mubr.msk.bf16.vlgmr.msra.gmra.mrb[0].mxu0 %vm266_vm2, %v238_v6 }
 0x136   :  { %3130 = vmatprep.mubr.msk.f32.mxu0 %vm411_vm6, %v236_v28 }
 0x208   :  { %v308_v10 = vpop.f32.mrb[0].mxu0 }
 0x209   :  { %v309_v11 = vadd.f32 %v2853_v9, %v308_v10  ;;  %v3118_v12 = vpop.f32.mrb[1].mxu0 }
 0x20a   :  { %v311_v13 = vpop.f32.mrb[2].mxu0 }
 0x20b   :  { %v314_v14 = vmax.f32 %v309_v11, 0.0  ;;  %v3119_v15 = vpop.f32.mrb[3].mxu0 }
 0x20d   :  { %v315_v16 = vpack.c.bf16 %v314_v14, %v314_v14 }
 0x20f   :  { %3125 = vmatmul.mubr.msk.bf16.vlgmr.msra.gmra.mrb[0].mxu1 %vm339_vm3, %v315_v16 }
 0x210   :  { %3144 = vmatprep.mubr.msk.bf16.mxu1 %vm3813_vm0, %v3812_v0  ;;  %3139 = vmatpush3.bf16.msra.mxu1 %v3383_v34 }
 0x211   :  { %3140 = vmatprep.subr.bf16.mxu1 %v3812_v0 }
 0x214   :  { %3141 = vmatpush3.bf16.msra.mxu1 %v3384_v45 }
 0x215   :  { %3142 = vmatprep.subr.bf16.mxu1 %v3812_v0 }
 0x218   :  { %3143 = vmatpush3.bf16.msra.mxu1 %v652_v47 }
 0x219   :  { %3160 = vmatprep.subr.bf16.mxu1 %v3812_v0 }
 0x2e2   :  { %v377_v18 = vpop.f32.mrb[0].mxu1 }
 0x2e3   :  { %v4142_v19 = vadd.f32 %v2858_v17, %v377_v18  ;;  %v3126_v20 = vpop.f32.mrb[1].mxu1 }
 0x2e4   :  { %v380_v21 = vpop.f32.mrb[2].mxu1 }
 0x2e5   :  { %v3127_v22 = vpop.f32.mrb[3].mxu1  ;;  %v384_v23 = vsel %vm383_vm4, %v4142_v19, -inf }
 0x2e6   :  { %385 = vmax.xlane.f32.xlu0 %v384_v23 }
 0x373   :  { %v386_v25 = vpop.xlane.xlu0 %385 }
 0x374   :  { %vm387_vm5 = vcmp.ge.f32.partialorder %v4142_v19, %v386_v25 }
 0x375   :  { %v395_v26 = vsel %vm387_vm5, %v2862_v24, 9.0  ;;  %v3817_v24 = vmov -1e+09  }
 0x376   :  { %v396_v27 = vsel %vm383_vm4, %v395_v26, inf  ;;  %vm967_vm4 = vcmask 1040384  }
 0x377   :  { %397 = vmin.xlane.f32.xlu0 %v396_v27 }
 0x404   :  { %v398_v31 = vpop.xlane.xlu0 %397 }
 0x405   :  { %vm406_vm8 = vcmp.lt.f32.partialorder %v2863_v30, %v398_v31 }
 0x406   :  { %vm409_vm9 = vmand %vm406_vm8, %vm408_vm7 }
 0x407   :  { %v410_v32 = vsel %vm409_vm9, 1.0, %v3812_v0 }
 0x408   :  { %3128 = vmatprep.subr.msk.mxu0 %vm270_vm1, %v410_v32 }
 0x409   :  { %3129 = vmatpush3.msk.msra.mxu0 %vm270_vm1, %v410_v32 }
 0x40a   :  { %3131 = vmatmul.mubr.msk.f32.vlgmr.msra.gmra.mrb[4].mxu0 %vm411_vm6, %v237_v33  ;;  %3133 = vmatprep.subr.msk.mxu0 %vm270_vm1, %v235_v5 }
 0x40b   :  { %3134 = vmatpush3.msk.msra.mxu0 %vm270_vm1, %v235_v5  ;;  %3135 = vmatprep.mubr.msk.f32.mxu0 %vm411_vm6, %v236_v28  ;;  %v2871_v5 = vld [vmem:[#allocation19] ss:$0 sm:$0xff] }
 0x40c   :  { %3148 = vmatprep.subr.bf16.mxu0 %v3812_v0 }
 0x40e   :  { %3136 = vmatmul.mubr.msk.f32.vlgmr.msra.gmra.mrb[6].mxu0 %vm411_vm6, %v237_v33 }
 0x40f   :  { %3150 = vmatprep.mubr.msk.bf16.mxu0 %vm3813_vm0, %v3812_v0 }
 0x4dd   :  { %v4168_v36 = vpop.f32.mrb[4].mxu0 }
 0x4de   :  { %v4170_v38 = vpop.f32.mrb[5].mxu0  ;;  %v503_v40 = vmul.f32 %v4168_v36, %v501_v37  ;;  %vm497_vm15 = vcmp.gt.f32.partialorder %v4168_v36, 0.5 }
 0x4df   :  { %v502_v39 = vmul.f32 %v500_v35, %v4170_v38  ;;  %vm496_vm14 = vcmp.gt.f32.partialorder %v4170_v38, 0.5  ;;  %v4218_v33 = vsel %vm497_vm15, 0.0, %v3817_v24 }
 0x4e0   :  { %v508_v42 = vsel %vm504_vm10, %v503_v40, 0.0  ;;  %v4215_v25 = vsel %vm496_vm14, 0.0, %v3817_v24 }
 0x4e1   :  { %v505_v41 = vsel %vm504_vm10, %v502_v39, 0.0  ;;  %v3137_v43 = vpop.f32.mrb[6].mxu0 }
 0x4e2   :  { %506 = vadd.xlane.f32.xlu1 %v505_v41  ;;  %v603_v44 = vpop.f32.mrb[7].mxu0  ;;  %v613_v62 = vadd.f32 %v3137_v43, %v533_v59 }
 0x4e3   :  { %v612_v63 = vadd.f32 %v603_v44, %v532_v60 }
 0x4e6   :  { %509 = vadd.xlane.f32.xlu1 %v508_v42 }
 0x56f   :  { %v507_v61 = vpop.xlane.xlu1 %506 }
 0x570   :  { %vm511_vm11 = vcmp.gt.f32.partialorder %v507_v61, 0.5 }
 0x571   :  { %v4185_v2 = vsel %vm511_vm11, %v612_v63, 0.0 }
 0x573   :  { %v510_v1 = vpop.xlane.xlu1 %509 }
 0x574   :  { %vm512_vm12 = vcmp.gt.f32.partialorder %v510_v1, 0.5 }
 0x575   :  { %v4187_v3 = vsel %vm512_vm12, %v613_v62, 0.0 }
 0x576   :  { %v620_v4 = vpack.c.bf16 %v4187_v3, %v4185_v2 }
 0x578   :  { %3145 = vmatmul.mubr.msk.bf16.vlgmr.msra.gmra.mrb[4].mxu1 %vm266_vm2, %v620_v4 }
 0x579   :  { %3162 = vmatprep.mubr.msk.bf16.mxu1 %vm3813_vm0, %v3812_v0 }
 0x64b   :  { %v688_v6 = vpop.f32.mrb[4].mxu1 }
 0x64c   :  { %v3146_v7 = vpop.f32.mrb[5].mxu1  ;;  %v689_v9 = vadd.f32 %v2871_v5, %v688_v6 }
 0x64d   :  { %v691_v8 = vpop.f32.mrb[6].mxu1 }
 0x64e   :  { %v692_v10 = vadd.f32 %v2871_v5, %v691_v8  ;;  %v3147_v11 = vpop.f32.mrb[7].mxu1 }
 0x650   :  { %v4194_v12 = vpack.c.bf16 %v692_v10, %v689_v9 }
 0x652   :  { %827 = vrot.lane.b32.xlu1 %v4194_v12, %s3814_s7  ;;  %697 = vrot.lane.b32.xlu0 %v4194_v12, %s3815_s3 }
 0x656   :  { %825 = vrot.lane.b32.xlu1 %v4194_v12, %s3816_s12 }
 0x6c4   :  { %v828_v13 = vpop.permute.xlu1 %827  ;;  %v698_v14 = vpop.permute.xlu0 %697 }
 0x6c5   :  { %v833_v15 = vsel %vm699_vm13, %v828_v13, 0  ;;  %v704_v16 = vsel %vm699_vm13, %v698_v14, 0 }
 0x6c6   :  { %3149 = vmatpush3.bf16.xpose.msra.mxu0 %v704_v16  ;;  %3161 = vmatpush3.bf16.xpose.msra.mxu1 %v833_v15  ;;  %v3386_v16 = vld [vmem:[%s4654_s15] sm:$0xff]  }
 0x6c7   :  { %3154 = vmatprep.subr.bf16.mxu0 %v3812_v0  ;;  %3172 = vmatprep.subr.bf16.mxu1 %v3812_v0 }
 0x6c8   :  { %v826_v17 = vpop.permute.xlu1 %825 }
 0x6cd   :  { %3151 = vmatmul.mubr.msk.bf16.vlgmr.msra.gmra.mrb[8].mxu0 %vm699_vm13, %v4194_v12  ;;  %3163 = vmatmul.mubr.msk.bf16.vlgmr.msra.gmra.mrb[8].mxu1 %vm699_vm13, %v826_v17 }
 0x6ce   :  { %3156 = vmatprep.mubr.msk.bf16.mxu0 %vm3813_vm0, %v3812_v0  ;;  %3176 = vmatprep.mubr.msk.bf16.mxu1 %vm3813_vm0, %v3812_v0 }
 0x7a0   :  { %v740_v18 = vpop.f32.mrb[8].mxu0  ;;  %v869_v20 = vpop.f32.mrb[8].mxu1 }
 0x7a1   :  { %v747_v21 = vmul.f32 0.23570226, %v740_v18  ;;  %v3152_v22 = vpop.f32.mrb[9].mxu0  ;;  %v3164_v23 = vpop.f32.mrb[9].mxu1  ;;  %v876_v28 = vmul.f32 0.23570226, %v869_v20 }
 0x7a2   :  { %v743_v26 = vpop.f32.mrb[10].mxu0  ;;  %v872_v27 = vpop.f32.mrb[10].mxu1  ;;  %v3387_v18 = vld [vmem:[%s4654_s15 + $0x8] ss:$0 sps:$4 sm:$0x11]  }
 0x7a3   :  { %v748_v29 = vmul.f32 0.23570226, %v743_v26  ;;  %v3153_v30 = vpop.f32.mrb[11].mxu0  ;;  %v3165_v31 = vpop.f32.mrb[11].mxu1  ;;  %v749_v32 = vadd.f32 %v747_v21, %v4215_v25  ;;  %v877_v36 = vmul.f32 0.23570226, %v872_v27  ;;  %v878_v38 = vadd.f32 %v876_v28, %v4215_v25 }
 0x7a4   :  { %v1025_v20 = vsel %vm967_vm4, %v3387_v18, 0  ;;  %v3388_v21 = vld [vmem:[%s4654_s15 + $0xc] sm:$0xff]   ;;  %v3389_v22 = vld [vmem:[%s4654_s15 + $0x14] ss:$0 sps:$4 sm:$0x11]  }
 0x7a5   :  { %v751_v34 = vsel %vm504_vm10, %v749_v32, -inf  ;;  %v750_v35 = vadd.f32 %v748_v29, %v4218_v33  ;;  %v880_v39 = vsel %vm504_vm10, %v878_v38, -inf  ;;  %v879_v40 = vadd.f32 %v877_v36, %v4218_v33  ;;  %3173 = vmatpush3.bf16.msra.mxu1 %v3388_v21  ;;  %v2891_v21 = vld [vmem:[%s4661_s22] ss:$0 sm:$0xff] }
 0x7a6   :  { %752 = vmax.xlane.f32.xlu1 %v751_v34  ;;  %3174 = vmatprep.subr.bf16.mxu1 %v3812_v0  ;;  %v969_v23 = vsel %vm967_vm4, %v3389_v22, 0 }
 0x7a7   :  { %v754_v37 = vsel %vm504_vm10, %v750_v35, -inf  ;;  %v883_v41 = vsel %vm504_vm10, %v879_v40, -inf }
 0x7a8   :  { %755 = vmax.xlane.f32.xlu0 %v754_v37 }
 0x7a9   :  { %3175 = vmatpush3.bf16.msra.mxu1 %v969_v23 }
 0x7aa   :  { %3188 = vmatprep.subr.bf16.mxu1 %v3812_v0 }
 0x7ac   :  { %881 = vmax.xlane.f32.xlu0 %v880_v39 }
 0x7b0   :  { %884 = vmax.xlane.f32.xlu0 %v883_v41  ;;  %v2889_v41 = vld [vmem:[#allocation20] ss:$0 sm:$0xff] }
 0x833   :  { %v753_v42 = vpop.xlane.xlu1 %752 }
 0x834   :  { %v757_v43 = vsub.f32 %v749_v32, %v753_v42 }
 0x835   :  { %v756_v44 = vpop.xlane.xlu0 %755 }
 0x836   :  { %v759_v45 = vmul.f32 1.442695, %v757_v43  ;;  %v758_v46 = vsub.f32 %v750_v35, %v756_v44 }
 0x838   :  { %3422 = vpow2.f32 %v759_v45  ;;  %v761_v47 = vmul.f32 1.442695, %v758_v46 }
 0x839   :  { %v882_v48 = vpop.xlane.xlu0 %881 }
 0x83a   :  { %3424 = vpow2.f32 %v761_v47  ;;  %v886_v49 = vsub.f32 %v878_v38, %v882_v48 }
 0x83c   :  { %v888_v50 = vmul.f32 1.442695, %v886_v49 }
 0x83d   :  { %v885_v51 = vpop.xlane.xlu0 %884 }
 0x83e   :  { %3426 = vpow2.f32 %v888_v50  ;;  %v887_v52 = vsub.f32 %v879_v40, %v885_v51 }
 0x840   :  { %v890_v53 = vmul.f32 1.442695, %v887_v52 }
 0x842   :  { %v3423_v54 = vpop.eup %3422  ;;  %3428 = vpow2.f32 %v890_v53 }
 0x843   :  { %v763_v55 = vsel %vm504_vm10, %v3423_v54, 0.0 }
 0x844   :  { %v3425_v56 = vpop.eup %3424  ;;  %764 = vadd.xlane.f32.xlu1 %v763_v55 }
 0x845   :  { %v766_v57 = vsel %vm504_vm10, %v3425_v56, 0.0 }
 0x846   :  { %767 = vadd.xlane.f32.xlu0 %v766_v57  ;;  %v3392_v57 = vld [vmem:[%s4656_s17 + $0x10] ss:$0 sps:$4 sm:$0x33]  }
 0x848   :  { %v3427_v58 = vpop.eup %3426 }
 0x849   :  { %v892_v59 = vsel %vm504_vm10, %v3427_v58, 0.0 }
 0x84a   :  { %893 = vadd.xlane.f32.xlu1 %v892_v59 }
 0x84c   :  { %v3429_v60 = vpop.eup %3428 }
 0x84d   :  { %v895_v61 = vsel %vm504_vm10, %v3429_v60, 0.0 }
 0x84e   :  { %896 = vadd.xlane.f32.xlu0 %v895_v61 }
 0x85b   :  { %774 = vrot.lane.b32.xlu1 %v4194_v12, %s3818_s26 }
 0x864   :  { %903 = vrot.lane.b32.xlu0 %v4194_v12, %s3819_s29 }
 0x8d1   :  { %v765_v62 = vpop.xlane.xlu1 %764 }
 0x8d2   :  { %3430 = vrcp.f32 %v765_v62 }
 0x8d3   :  { %v768_v63 = vpop.xlane.xlu0 %767 }
 0x8d4   :  { %3432 = vrcp.f32 %v768_v63 }
 0x8d7   :  { %v894_v1 = vpop.xlane.xlu1 %893 }
 0x8d8   :  { %3434 = vrcp.f32 %v894_v1 }
 0x8db   :  { %v897_v4 = vpop.xlane.xlu0 %896  ;;  %v775_v5 = vpop.permute.xlu1 %774 }
 0x8dc   :  { %v3431_v6 = vpop.eup %3430  ;;  %3436 = vrcp.f32 %v897_v4  ;;  %3155 = vmatpush3.bf16.msra.mxu0 %v775_v5 }
 0x8dd   :  { %3166 = vmatprep.subr.bf16.mxu0 %v3812_v0  ;;  %v771_v8 = vmul.f32 %v3431_v6, %v3423_v54 }
 0x8de   :  { %v3433_v7 = vpop.eup %3432 }
 0x8df   :  { %v772_v9 = vmul.f32 %v3433_v7, %v3425_v56  ;;  %v904_v11 = vpop.permute.xlu0 %903 }
 0x8e1   :  { %v773_v10 = vpack.c.bf16 %v772_v9, %v771_v8 }
 0x8e2   :  { %v3435_v12 = vpop.eup %3434 }
 0x8e3   :  { %3157 = vmatmul.mubr.msk.bf16.vlgmr.msra.gmra.mrb[12].mxu0 %vm504_vm10, %v773_v10  ;;  %v900_v14 = vmul.f32 %v3435_v12, %v3427_v58  ;;  %v1160_v58 = vsel %vm270_vm1, %v3392_v57, 0 }
 0x8e4   :  { %3167 = vmatpush3.bf16.msra.mxu0 %v904_v11  ;;  %3168 = vmatprep.mubr.msk.bf16.mxu0 %vm3813_vm0, %v3812_v0 }
 0x8e5   :  { %3180 = vmatprep.subr.bf16.mxu0 %v3812_v0 }
 0x8e6   :  { %v3437_v13 = vpop.eup %3436 }
 0x8e7   :  { %v901_v15 = vmul.f32 %v3437_v13, %v3429_v60 }
 0x8e9   :  { %v902_v17 = vpack.c.bf16 %v901_v15, %v900_v14  ;;  %v2890_v14 = vld [vmem:[%s4660_s21] ss:$0 sm:$0xff] }
 0x8eb   :  { %3169 = vmatmul.mubr.msk.bf16.vlgmr.msra.gmra.mrb[16].mxu0 %vm504_vm10, %v902_v17 }
 0x8ec   :  { %3181 = vmatpush3.bf16.msra.mxu0 %v3386_v16  ;;  %3184 = vmatprep.mubr.msk.bf16.mxu0 %vm3813_vm0, %v3812_v0 }
 0x8ed   :  { %3182 = vmatprep.subr.bf16.mxu0 %v3812_v0 }
 0x8f0   :  { %3183 = vmatpush3.bf16.msra.mxu0 %v1025_v20 }
 0x8f1   :  { %3198 = vmatprep.subr.bf16.mxu0 %v3812_v0 }
 0x9b6   :  { %v814_v24 = vpop.f32.mrb[12].mxu0 }
 0x9b7   :  { %v3158_v26 = vpop.f32.mrb[13].mxu0 }
 0x9b8   :  { %v817_v27 = vpop.f32.mrb[14].mxu0 }
 0x9b9   :  { %v821_v28 = vpack.c.bf16 %v817_v27, %v814_v24  ;;  %v3159_v29 = vpop.f32.mrb[15].mxu0  ;;  %v3393_v27 = vld [vmem:[%s4658_s19] sm:$0xff]  }
 0x9ba   :  { %v2892_v29 = vld [vmem:[%s4657_s18] ss:$0 sm:$0xff] }
 0x9bb   :  { %3185 = vmatmul.mubr.msk.bf16.vlgmr.msra.gmra.mrb[20].mxu0 %vm699_vm13, %v821_v28  ;;  %v3394_v28 = vld [vmem:[%s4658_s19 + $0x8] sm:$0xff]  }
 0x9bc   :  { %3202 = vmatprep.mubr.msk.bf16.mxu0 %vm3813_vm0, %v3812_v0  ;;  %3199 = vmatpush3.bf16.msra.mxu0 %v3393_v27 }
 0x9bd   :  { %3200 = vmatprep.subr.bf16.mxu0 %v3812_v0 }
 0x9be   :  { %v943_v30 = vpop.f32.mrb[16].mxu0 }
 0x9bf   :  { %v3170_v31 = vpop.f32.mrb[17].mxu0 }
 0x9c0   :  { %v946_v32 = vpop.f32.mrb[18].mxu0  ;;  %3201 = vmatpush3.bf16.msra.mxu0 %v3394_v28 }
 0x9c1   :  { %v950_v34 = vpack.c.bf16 %v946_v32, %v943_v30  ;;  %v3171_v35 = vpop.f32.mrb[19].mxu0  ;;  %3216 = vmatprep.subr.bf16.mxu0 %v3812_v0 }
 0x9c3   :  { %3177 = vmatmul.mubr.msk.bf16.vlgmr.msra.gmra.mrb[12].mxu1 %vm699_vm13, %v950_v34 }
 0x9c4   :  { %3194 = vmatprep.mubr.msk.bf16.mxu1 %vm3813_vm0, %v3812_v0 }
 0xa8e   :  { %v1061_v36 = vpop.f32.mrb[20].mxu0 }
 0xa8f   :  { %v3186_v37 = vpop.f32.mrb[21].mxu0 }
 0xa90   :  { %v1064_v38 = vpop.f32.mrb[22].mxu0 }
 0xa91   :  { %v3187_v39 = vpop.f32.mrb[23].mxu0 }
 0xa96   :  { %v1005_v40 = vpop.f32.mrb[12].mxu1 }
 0xa97   :  { %v1062_v42 = vadd.f32 %v1061_v36, %v1005_v40  ;;  %v3178_v43 = vpop.f32.mrb[13].mxu1  ;;  %v2897_v40 = vld [vmem:[%s4659_s20] ss:$0 sm:$0xff] }
 0xa98   :  { %v1008_v44 = vpop.f32.mrb[14].mxu1 }
 0xa99   :  { %v1075_v45 = vadd.f32 %v2889_v41, %v1062_v42  ;;  %v1065_v46 = vadd.f32 %v1064_v38, %v1008_v44  ;;  %v3179_v47 = vpop.f32.mrb[15].mxu1 }
 0xa9b   :  { %v1077_v48 = vadd.f32 %v1075_v45, %v4185_v2  ;;  %v1076_v49 = vadd.f32 %v2889_v41, %v1065_v46  ;;  %v3390_v2 = vld [vmem:[%s4656_s17] sm:$0xff]  }
 0xa9c   :  { %3189 = vmatpush3.bf16.msra.mxu1 %v3390_v2  ;;  %v3397_v2 = vld [vmem:[%s4652_s13 + $0x24] ss:$0 sps:$4 sm:$0x33]  }
 0xa9d   :  { %v1078_v50 = vadd.f32 %v1076_v49, %v4187_v3  ;;  %v1079_v51 = vsel %vm266_vm2, %v1077_v48, 0.0  ;;  %v1088_v52 = vmul.f32 %v1077_v48, %v1077_v48  ;;  %3190 = vmatprep.subr.bf16.mxu1 %v3812_v0  ;;  %v3391_v3 = vld [vmem:[%s4656_s17 + $0x8] sm:$0xff]  }
 0xa9e   :  { %1080 = vadd.xlane.f32.xlu1 %v1079_v51 }
 0xa9f   :  { %v1082_v53 = vsel %vm266_vm2, %v1078_v50, 0.0  ;;  %v1089_v54 = vmul.f32 %v1078_v50, %v1078_v50  ;;  %v1090_v55 = vsel %vm266_vm2, %v1088_v52, 0.0 }
 0xaa0   :  { %1083 = vadd.xlane.f32.xlu0 %v1082_v53  ;;  %3191 = vmatpush3.bf16.msra.mxu1 %v3391_v3  ;;  %v1357_v3 = vsel %vm270_vm1, %v3397_v2, 0 }
 0xaa1   :  { %v1093_v56 = vsel %vm266_vm2, %v1089_v54, 0.0  ;;  %3192 = vmatprep.subr.bf16.mxu1 %v3812_v0 }
 0xaa2   :  { %1091 = vadd.xlane.f32.xlu1 %v1090_v55  ;;  %v3395_v55 = vld [vmem:[%s4652_s13 + $0x14] sm:$0xff]  }
 0xaa4   :  { %1094 = vadd.xlane.f32.xlu0 %v1093_v56  ;;  %3193 = vmatpush3.bf16.msra.mxu1 %v1160_v58  ;;  %v3396_v56 = vld [vmem:[%s4652_s13 + $0x1c] sm:$0xff]  }
 0xaa5   :  { %3206 = vmatprep.subr.bf16.mxu1 %v3812_v0 }
 0xb2b   :  { %v1081_v59 = vpop.xlane.xlu1 %1080 }
 0xb2c   :  { %v1086_v60 = vmul.f32 0.027777778, %v1081_v59 }
 0xb2d   :  { %v1084_v61 = vpop.xlane.xlu0 %1083 }
 0xb2e   :  { %v1087_v62 = vmul.f32 0.027777778, %v1084_v61  ;;  %v1100_v1 = vmul.f32 %v1086_v60, %v1086_v60  ;;  %v1098_v12 = vsub.f32 %v1077_v48, %v1086_v60 }
 0xb2f   :  { %v1092_v63 = vpop.xlane.xlu1 %1091 }
 0xb30   :  { %v1096_v4 = vmul.f32 0.027777778, %v1092_v63  ;;  %v1101_v6 = vmul.f32 %v1087_v62, %v1087_v62  ;;  %v1099_v15 = vsub.f32 %v1078_v50, %v1087_v62 }
 0xb31   :  { %v1095_v5 = vpop.xlane.xlu0 %1094 }
 0xb32   :  { %v1102_v7 = vsub.f32 %v1096_v4, %v1100_v1  ;;  %v1097_v8 = vmul.f32 0.027777778, %v1095_v5 }
 0xb34   :  { %v1104_v9 = vadd.f32 1e-05, %v1102_v7  ;;  %v1103_v10 = vsub.f32 %v1097_v8, %v1101_v6 }
 0xb36   :  { %3438 = vrsqrt.f32 %v1104_v9  ;;  %v1105_v11 = vadd.f32 1e-05, %v1103_v10 }
 0xb38   :  { %3440 = vrsqrt.f32 %v1105_v11 }
 0xb40   :  { %v3439_v13 = vpop.eup %3438 }
 0xb41   :  { %v1108_v16 = vmul.f32 %v3439_v13, %v1098_v12  ;;  %v2901_v12 = vld [vmem:[%s4662_s23] ss:$0 sm:$0xff] }
 0xb42   :  { %v3441_v17 = vpop.eup %3440 }
 0xb43   :  { %v1109_v18 = vmul.f32 %v3441_v17, %v1099_v15  ;;  %v1117_v20 = vmul.f32 %v2890_v14, %v1108_v16 }
 0xb45   :  { %v1118_v22 = vmul.f32 %v2890_v14, %v1109_v18  ;;  %v1126_v23 = vadd.f32 %v2891_v21, %v1117_v20  ;;  %v2902_v18 = vld [vmem:[%s4663_s24] ss:$0 sm:$0xff] }
 0xb47   :  { %v1127_v24 = vadd.f32 %v2891_v21, %v1118_v22 }
 0xb49   :  { %v1128_v26 = vpack.c.bf16 %v1127_v24, %v1126_v23 }
 0xb4b   :  { %3195 = vmatmul.mubr.msk.bf16.vlgmr.msra.gmra.mrb[16].mxu1 %vm266_vm2, %v1128_v26 }
 0xb4c   :  { %3212 = vmatprep.mubr.msk.bf16.mxu1 %vm3813_vm0, %v3812_v0  ;;  %3207 = vmatpush3.bf16.msra.mxu1 %v3395_v55 }
 0xb4d   :  { %3208 = vmatprep.subr.bf16.mxu1 %v3812_v0 }
 0xb50   :  { %3209 = vmatpush3.bf16.msra.mxu1 %v3396_v56 }
 0xb51   :  { %3210 = vmatprep.subr.bf16.mxu1 %v3812_v0 }
 0xb54   :  { %3211 = vmatpush3.bf16.msra.mxu1 %v1357_v3 }
 0xb55   :  { %3228 = vmatprep.subr.bf16.mxu1 %v3812_v0 }
 0xc1e   :  { %v1196_v30 = vpop.f32.mrb[16].mxu1 }
 0xc1f   :  { %v1197_v31 = vadd.f32 %v2892_v29, %v1196_v30  ;;  %v3196_v32 = vpop.f32.mrb[17].mxu1 }
 0xc20   :  { %v1199_v34 = vpop.f32.mrb[18].mxu1 }
 0xc21   :  { %v1200_v35 = vadd.f32 %v2892_v29, %v1199_v34  ;;  %v3197_v36 = vpop.f32.mrb[19].mxu1  ;;  %v1203_v37 = vmax.f32 %v1197_v31, 0.0 }
 0xc23   :  { %v1204_v38 = vmax.f32 %v1200_v35, 0.0 }
 0xc25   :  { %v1205_v39 = vpack.c.bf16 %v1204_v38, %v1203_v37 }
 0xc27   :  { %3203 = vmatmul.mubr.msk.bf16.vlgmr.msra.gmra.mrb[24].mxu0 %vm339_vm3, %v1205_v39 }
 0xc28   :  { %3218 = vmatprep.mubr.msk.bf16.mxu0 %vm3813_vm0, %v3812_v0 }
 0xcfa   :  { %v1266_v41 = vpop.f32.mrb[24].mxu0 }
 0xcfb   :  { %v1267_v42 = vadd.f32 %v2897_v40, %v1266_v41  ;;  %v3204_v43 = vpop.f32.mrb[25].mxu0 }
 0xcfc   :  { %v1269_v44 = vpop.f32.mrb[26].mxu0 }
 0xcfd   :  { %v1273_v45 = vadd.f32 %v1267_v42, %v1126_v23  ;;  %v1270_v46 = vadd.f32 %v2897_v40, %v1269_v44  ;;  %v3205_v47 = vpop.f32.mrb[27].mxu0 }
 0xcff   :  { %v1274_v48 = vadd.f32 %v1270_v46, %v1127_v24  ;;  %v1275_v49 = vsel %vm266_vm2, %v1273_v45, 0.0  ;;  %v1283_v50 = vmul.f32 %v1273_v45, %v1273_v45  ;;  %v2908_v24 = vld [vmem:[#allocation19 + $0x1] ss:$0 sm:$0xff] }
 0xd00   :  { %1276 = vadd.xlane.f32.xlu1 %v1275_v49 }
 0xd01   :  { %v1278_v51 = vsel %vm266_vm2, %v1274_v48, 0.0  ;;  %v1284_v52 = vmul.f32 %v1274_v48, %v1274_v48  ;;  %v1285_v53 = vsel %vm266_vm2, %v1283_v50, 0.0 }
 0xd02   :  { %1279 = vadd.xlane.f32.xlu0 %v1278_v51 }
 0xd03   :  { %v1288_v54 = vsel %vm266_vm2, %v1284_v52, 0.0 }
 0xd04   :  { %1286 = vadd.xlane.f32.xlu1 %v1285_v53 }
 0xd06   :  { %1289 = vadd.xlane.f32.xlu0 %v1288_v54 }
 0xd8d   :  { %v1277_v57 = vpop.xlane.xlu1 %1276 }
 0xd8e   :  { %v1281_v58 = vmul.f32 0.027777778, %v1277_v57 }
 0xd8f   :  { %v1280_v59 = vpop.xlane.xlu0 %1279 }
 0xd90   :  { %v1282_v60 = vmul.f32 0.027777778, %v1280_v59  ;;  %v1295_v62 = vmul.f32 %v1281_v58, %v1281_v58  ;;  %v1293_v10 = vsub.f32 %v1273_v45, %v1281_v58 }
 0xd91   :  { %v1287_v61 = vpop.xlane.xlu1 %1286 }
 0xd92   :  { %v1291_v63 = vmul.f32 0.027777778, %v1287_v61  ;;  %v1296_v4 = vmul.f32 %v1282_v60, %v1282_v60  ;;  %v1294_v13 = vsub.f32 %v1274_v48, %v1282_v60 }
 0xd93   :  { %v1290_v1 = vpop.xlane.xlu0 %1289 }
 0xd94   :  { %v1297_v5 = vsub.f32 %v1291_v63, %v1295_v62  ;;  %v1292_v6 = vmul.f32 0.027777778, %v1290_v1 }
 0xd96   :  { %v1299_v7 = vadd.f32 1e-05, %v1297_v5  ;;  %v1298_v8 = vsub.f32 %v1292_v6, %v1296_v4 }
 0xd98   :  { %3442 = vrsqrt.f32 %v1299_v7  ;;  %v1300_v9 = vadd.f32 1e-05, %v1298_v8 }
 0xd9a   :  { %3444 = vrsqrt.f32 %v1300_v9 }
 0xda2   :  { %v3443_v11 = vpop.eup %3442 }
 0xda3   :  { %v1303_v14 = vmul.f32 %v3443_v11, %v1293_v10 }
 0xda4   :  { %v3445_v15 = vpop.eup %3444 }
 0xda5   :  { %v1304_v16 = vmul.f32 %v3445_v15, %v1294_v13  ;;  %v1312_v17 = vmul.f32 %v2901_v12, %v1303_v14 }
 0xda7   :  { %v1313_v20 = vmul.f32 %v2901_v12, %v1304_v16  ;;  %v4335_v21 = vadd.f32 %v2902_v18, %v1312_v17 }
 0xda9   :  { %v4337_v22 = vadd.f32 %v2902_v18, %v1313_v20 }
 0xdab   :  { %v1323_v23 = vpack.c.bf16 %v4337_v22, %v4335_v21 }
 0xdad   :  { %3213 = vmatmul.mubr.msk.bf16.vlgmr.msra.gmra.mrb[20].mxu1 %vm266_vm2, %v1323_v23 }
 0xdae   :  { %3230 = vmatprep.mubr.msk.bf16.mxu1 %vm3813_vm0, %v3812_v0 }
 0xe80   :  { %v1393_v26 = vpop.f32.mrb[20].mxu1 }
 0xe81   :  { %v3214_v27 = vpop.f32.mrb[21].mxu1  ;;  %v1394_v29 = vadd.f32 %v2908_v24, %v1393_v26 }
 0xe82   :  { %v1396_v28 = vpop.f32.mrb[22].mxu1 }
 0xe83   :  { %v1397_v30 = vadd.f32 %v2908_v24, %v1396_v28  ;;  %v3215_v31 = vpop.f32.mrb[23].mxu1 }
 0xe85   :  { %v4344_v32 = vpack.c.bf16 %v1397_v30, %v1394_v29 }
 0xe87   :  { %1532 = vrot.lane.b32.xlu0 %v4344_v32, %s3814_s7  ;;  %1402 = vrot.lane.b32.xlu1 %v4344_v32, %s3815_s3 }
 0xe8b   :  { %1530 = vrot.lane.b32.xlu1 %v4344_v32, %s3816_s12 }
 0xef9   :  { %v1533_v34 = vpop.permute.xlu0 %1532  ;;  %v1403_v35 = vpop.permute.xlu1 %1402 }
 0xefa   :  { %v1538_v36 = vsel %vm699_vm13, %v1533_v34, 0  ;;  %v1408_v37 = vsel %vm699_vm13, %v1403_v35, 0 }
 0xefb   :  { %3217 = vmatpush3.bf16.xpose.msra.mxu0 %v1408_v37  ;;  %3229 = vmatpush3.bf16.xpose.msra.mxu1 %v1538_v36  ;;  %v3398_v36 = vld [vmem:[%s4654_s15 + $0x18] sm:$0xff]  }
 0xefc   :  { %3222 = vmatprep.subr.bf16.mxu0 %v3812_v0  ;;  %3240 = vmatprep.subr.bf16.mxu1 %v3812_v0 }
 0xefd   :  { %v1531_v38 = vpop.permute.xlu1 %1530 }
 0xf02   :  { %3219 = vmatmul.mubr.msk.bf16.vlgmr.msra.gmra.mrb[28].mxu0 %vm699_vm13, %v4344_v32  ;;  %3231 = vmatmul.mubr.msk.bf16.vlgmr.msra.gmra.mrb[24].mxu1 %vm699_vm13, %v1531_v38  ;;  %v3399_v38 = vld [vmem:[%s4654_s15 + $0x20] ss:$0 sps:$4 sm:$0x11]  }
 0xf03   :  { %3224 = vmatprep.mubr.msk.bf16.mxu0 %vm3813_vm0, %v3812_v0  ;;  %3244 = vmatprep.mubr.msk.bf16.mxu1 %vm3813_vm0, %v3812_v0 }
 0xfd5   :  { %v1444_v39 = vpop.f32.mrb[28].mxu0  ;;  %v1574_v40 = vpop.f32.mrb[24].mxu1 }
 0xfd6   :  { %v1451_v41 = vmul.f32 0.23570226, %v1444_v39  ;;  %v3220_v42 = vpop.f32.mrb[29].mxu0  ;;  %v3232_v43 = vpop.f32.mrb[25].mxu1  ;;  %v1581_v44 = vmul.f32 0.23570226, %v1574_v40 }
 0xfd7   :  { %v1447_v45 = vpop.f32.mrb[30].mxu0  ;;  %v1577_v46 = vpop.f32.mrb[26].mxu1  ;;  %v1729_v39 = vsel %vm967_vm4, %v3399_v38, 0  ;;  %v3400_v40 = vld [vmem:[%s4654_s15 + $0x24] sm:$0xff]  }
 0xfd8   :  { %v1452_v47 = vmul.f32 0.23570226, %v1447_v45  ;;  %v1582_v48 = vmul.f32 0.23570226, %v1577_v46  ;;  %v3221_v49 = vpop.f32.mrb[31].mxu0  ;;  %v3233_v50 = vpop.f32.mrb[27].mxu1  ;;  %v1453_v51 = vadd.f32 %v1451_v41, %v4215_v25  ;;  %v1583_v56 = vadd.f32 %v1581_v44, %v4215_v25  ;;  %3241 = vmatpush3.bf16.msra.mxu1 %v3400_v40 }
 0xfd9   :  { %3242 = vmatprep.subr.bf16.mxu1 %v3812_v0  ;;  %v3401_v41 = vld [vmem:[%s4654_s15 + $0x2c] ss:$0 sps:$4 sm:$0x11]   ;;  %v2933_v40 = vld [vmem:[%s4661_s22 + $0x1] ss:$0 sm:$0xff] }
 0xfda   :  { %v1455_v52 = vsel %vm504_vm10, %v1453_v51, -inf  ;;  %v1454_v53 = vadd.f32 %v1452_v47, %v4218_v33  ;;  %v1584_v54 = vadd.f32 %v1582_v48, %v4218_v33  ;;  %v1585_v3 = vsel %vm504_vm10, %v1583_v56, -inf }
 0xfdb   :  { %1456 = vmax.xlane.f32.xlu1 %v1455_v52  ;;  %v1673_v42 = vsel %vm967_vm4, %v3401_v41, 0 }
 0xfdc   :  { %v1458_v55 = vsel %vm504_vm10, %v1454_v53, -inf  ;;  %v1588_v2 = vsel %vm504_vm10, %v1584_v54, -inf  ;;  %3243 = vmatpush3.bf16.msra.mxu1 %v1673_v42 }
 0xfdd   :  { %1459 = vmax.xlane.f32.xlu0 %v1458_v55  ;;  %3256 = vmatprep.subr.bf16.mxu1 %v3812_v0 }
 0xfdf   :  { %1589 = vmax.xlane.f32.xlu1 %v1588_v2 }
 0xfe1   :  { %1586 = vmax.xlane.f32.xlu0 %v1585_v3  ;;  %v2929_v3 = vld [vmem:[#allocation20 + $0x1] ss:$0 sm:$0xff] }
0x1068   :  { %v1457_v57 = vpop.xlane.xlu1 %1456 }
0x1069   :  { %v1461_v58 = vsub.f32 %v1453_v51, %v1457_v57 }
0x106a   :  { %v1460_v59 = vpop.xlane.xlu0 %1459 }
0x106b   :  { %v1463_v60 = vmul.f32 1.442695, %v1461_v58  ;;  %v1462_v61 = vsub.f32 %v1454_v53, %v1460_v59 }
0x106c   :  { %v1590_v62 = vpop.xlane.xlu1 %1589 }
0x106d   :  { %3446 = vpow2.f32 %v1463_v60  ;;  %v1465_v63 = vmul.f32 1.442695, %v1462_v61  ;;  %v1592_v1 = vsub.f32 %v1584_v54, %v1590_v62 }
0x106e   :  { %v1587_v4 = vpop.xlane.xlu0 %1586 }
0x106f   :  { %3448 = vpow2.f32 %v1465_v63  ;;  %v1595_v5 = vmul.f32 1.442695, %v1592_v1  ;;  %v1591_v6 = vsub.f32 %v1583_v56, %v1587_v4 }
0x1071   :  { %3450 = vpow2.f32 %v1595_v5  ;;  %v1593_v7 = vmul.f32 1.442695, %v1591_v6 }
0x1073   :  { %3452 = vpow2.f32 %v1593_v7 }
0x1077   :  { %v3447_v8 = vpop.eup %3446 }
0x1078   :  { %v1467_v9 = vsel %vm504_vm10, %v3447_v8, 0.0 }
0x1079   :  { %v3449_v10 = vpop.eup %3448  ;;  %1468 = vadd.xlane.f32.xlu0 %v1467_v9 }
0x107a   :  { %v1470_v11 = vsel %vm504_vm10, %v3449_v10, 0.0 }
0x107b   :  { %v3451_v12 = vpop.eup %3450  ;;  %1471 = vadd.xlane.f32.xlu1 %v1470_v11  ;;  %v3404_v11 = vld [vmem:[%s4656_s17 + $0x24] ss:$0 sps:$4 sm:$0x33]  }
0x107c   :  { %v1600_v14 = vsel %vm504_vm10, %v3451_v12, 0.0 }
0x107d   :  { %v3453_v13 = vpop.eup %3452 }
0x107e   :  { %v1597_v15 = vsel %vm504_vm10, %v3453_v13, 0.0 }
0x107f   :  { %1601 = vadd.xlane.f32.xlu1 %v1600_v14  ;;  %1598 = vadd.xlane.f32.xlu0 %v1597_v15 }
0x1090   :  { %1608 = vrot.lane.b32.xlu1 %v4344_v32, %s3819_s29 }
0x1095   :  { %1478 = vrot.lane.b32.xlu0 %v4344_v32, %s3818_s26 }
0x1106   :  { %v1469_v16 = vpop.xlane.xlu0 %1468 }
0x1107   :  { %3454 = vrcp.f32 %v1469_v16 }
0x1108   :  { %v1472_v17 = vpop.xlane.xlu1 %1471 }
0x1109   :  { %3456 = vrcp.f32 %v1472_v17 }
0x110c   :  { %v1602_v18 = vpop.xlane.xlu1 %1601  ;;  %v1599_v20 = vpop.xlane.xlu0 %1598 }
0x110d   :  { %3458 = vrcp.f32 %v1602_v18 }
0x110e   :  { %3460 = vrcp.f32 %v1599_v20 }
0x1110   :  { %v1479_v23 = vpop.permute.xlu0 %1478  ;;  %v1609_v32 = vpop.permute.xlu1 %1608 }
0x1111   :  { %v3455_v24 = vpop.eup %3454  ;;  %3223 = vmatpush3.bf16.msra.mxu0 %v1479_v23 }
0x1112   :  { %3234 = vmatprep.subr.bf16.mxu0 %v3812_v0  ;;  %v1475_v27 = vmul.f32 %v3455_v24, %v3447_v8 }
0x1113   :  { %v3457_v26 = vpop.eup %3456 }
0x1114   :  { %v1476_v28 = vmul.f32 %v3457_v26, %v3449_v10 }
0x1116   :  { %v1477_v29 = vpack.c.bf16 %v1476_v28, %v1475_v27 }
0x1117   :  { %v3459_v30 = vpop.eup %3458 }
0x1118   :  { %v3461_v31 = vpop.eup %3460  ;;  %3225 = vmatmul.mubr.msk.bf16.vlgmr.msra.gmra.mrb[32].mxu0 %vm504_vm10, %v1477_v29  ;;  %v1606_v34 = vmul.f32 %v3459_v30, %v3451_v12  ;;  %v1868_v12 = vsel %vm270_vm1, %v3404_v11, 0 }
0x1119   :  { %3235 = vmatpush3.bf16.msra.mxu0 %v1609_v32  ;;  %3236 = vmatprep.mubr.msk.bf16.mxu0 %vm3813_vm0, %v3812_v0  ;;  %v1605_v35 = vmul.f32 %v3461_v31, %v3453_v13 }
0x111a   :  { %3248 = vmatprep.subr.bf16.mxu0 %v3812_v0 }
0x111b   :  { %v1607_v37 = vpack.c.bf16 %v1606_v34, %v1605_v35  ;;  %v2931_v34 = vld [vmem:[%s4660_s21 + $0x1] ss:$0 sm:$0xff] }
0x1120   :  { %3237 = vmatmul.mubr.msk.bf16.vlgmr.msra.gmra.mrb[36].mxu0 %vm504_vm10, %v1607_v37 }
0x1121   :  { %3249 = vmatpush3.bf16.msra.mxu0 %v3398_v36  ;;  %3252 = vmatprep.mubr.msk.bf16.mxu0 %vm3813_vm0, %v3812_v0 }
0x1122   :  { %3250 = vmatprep.subr.bf16.mxu0 %v3812_v0 }
0x1125   :  { %3251 = vmatpush3.bf16.msra.mxu0 %v1729_v39 }
0x1126   :  { %3266 = vmatprep.subr.bf16.mxu0 %v3812_v0 }
0x11eb   :  { %v1518_v43 = vpop.f32.mrb[32].mxu0 }
0x11ec   :  { %v3226_v44 = vpop.f32.mrb[33].mxu0 }
0x11ed   :  { %v1521_v45 = vpop.f32.mrb[34].mxu0 }
0x11ee   :  { %v1525_v46 = vpack.c.bf16 %v1521_v45, %v1518_v43  ;;  %v3227_v47 = vpop.f32.mrb[35].mxu0  ;;  %v3405_v45 = vld [vmem:[%s4658_s19 + $0x10] sm:$0xff]  }
0x11ef   :  { %v2940_v47 = vld [vmem:[%s4657_s18 + $0x1] ss:$0 sm:$0xff] }
0x11f0   :  { %3253 = vmatmul.mubr.msk.bf16.vlgmr.msra.gmra.mrb[40].mxu0 %vm699_vm13, %v1525_v46  ;;  %v3406_v46 = vld [vmem:[%s4658_s19 + $0x18] sm:$0xff]  }
0x11f1   :  { %3270 = vmatprep.mubr.msk.bf16.mxu0 %vm3813_vm0, %v3812_v0  ;;  %3267 = vmatpush3.bf16.msra.mxu0 %v3405_v45 }
0x11f2   :  { %3268 = vmatprep.subr.bf16.mxu0 %v3812_v0 }
0x11f3   :  { %v1648_v48 = vpop.f32.mrb[36].mxu0 }
0x11f4   :  { %v3238_v49 = vpop.f32.mrb[37].mxu0 }
0x11f5   :  { %v1651_v50 = vpop.f32.mrb[38].mxu0  ;;  %3269 = vmatpush3.bf16.msra.mxu0 %v3406_v46 }
0x11f6   :  { %v1655_v51 = vpack.c.bf16 %v1651_v50, %v1648_v48  ;;  %v3239_v52 = vpop.f32.mrb[39].mxu0  ;;  %3284 = vmatprep.subr.bf16.mxu0 %v3812_v0 }
0x11f8   :  { %3245 = vmatmul.mubr.msk.bf16.vlgmr.msra.gmra.mrb[28].mxu1 %vm699_vm13, %v1655_v51 }
0x11f9   :  { %3262 = vmatprep.mubr.msk.bf16.mxu1 %vm3813_vm0, %v3812_v0 }
0x12c3   :  { %v1765_v53 = vpop.f32.mrb[40].mxu0 }
0x12c4   :  { %v3254_v54 = vpop.f32.mrb[41].mxu0 }
0x12c5   :  { %v1768_v55 = vpop.f32.mrb[42].mxu0 }
0x12c6   :  { %v3255_v56 = vpop.f32.mrb[43].mxu0 }
0x12cb   :  { %v1709_v2 = vpop.f32.mrb[28].mxu1 }
0x12cc   :  { %v1766_v57 = vadd.f32 %v1765_v53, %v1709_v2  ;;  %v3246_v58 = vpop.f32.mrb[29].mxu1  ;;  %v2950_v2 = vld [vmem:[%s4659_s20 + $0x1] ss:$0 sm:$0xff] }
0x12cd   :  { %v1712_v59 = vpop.f32.mrb[30].mxu1 }
0x12ce   :  { %v1780_v60 = vadd.f32 %v2929_v3, %v1766_v57  ;;  %v1769_v61 = vadd.f32 %v1768_v55, %v1712_v59  ;;  %v3247_v62 = vpop.f32.mrb[31].mxu1 }
0x12d0   :  { %v1782_v63 = vadd.f32 %v1780_v60, %v4335_v21  ;;  %v1781_v1 = vadd.f32 %v2929_v3, %v1769_v61  ;;  %v3402_v21 = vld [vmem:[%s4656_s17 + $0x14] sm:$0xff]  }
0x12d1   :  { %3257 = vmatpush3.bf16.msra.mxu1 %v3402_v21  ;;  %v3409_v21 = vld [vmem:[%s4652_s13 + $0x38] ss:$0 sps:$4 sm:$0x33]  }
0x12d2   :  { %v1783_v4 = vadd.f32 %v1781_v1, %v4337_v22  ;;  %v1784_v5 = vsel %vm266_vm2, %v1782_v63, 0.0  ;;  %v1792_v8 = vmul.f32 %v1782_v63, %v1782_v63  ;;  %3258 = vmatprep.subr.bf16.mxu1 %v3812_v0  ;;  %v3403_v22 = vld [vmem:[%s4656_s17 + $0x1c] sm:$0xff]  }
0x12d3   :  { %1785 = vadd.xlane.f32.xlu1 %v1784_v5 }
0x12d4   :  { %v1787_v6 = vsel %vm266_vm2, %v1783_v4, 0.0  ;;  %v1793_v7 = vmul.f32 %v1783_v4, %v1783_v4  ;;  %v1794_v10 = vsel %vm266_vm2, %v1792_v8, 0.0 }
0x12d5   :  { %1788 = vadd.xlane.f32.xlu0 %v1787_v6  ;;  %3259 = vmatpush3.bf16.msra.mxu1 %v3403_v22  ;;  %v2069_v22 = vsel %vm270_vm1, %v3409_v21, 0 }
0x12d6   :  { %v1797_v9 = vsel %vm266_vm2, %v1793_v7, 0.0  ;;  %3260 = vmatprep.subr.bf16.mxu1 %v3812_v0 }
0x12d7   :  { %1798 = vadd.xlane.f32.xlu1 %v1797_v9  ;;  %v3407_v9 = vld [vmem:[%s4652_s13 + $0x28] sm:$0xff]  }
0x12d9   :  { %1795 = vadd.xlane.f32.xlu0 %v1794_v10  ;;  %3261 = vmatpush3.bf16.msra.mxu1 %v1868_v12  ;;  %v3408_v10 = vld [vmem:[%s4652_s13 + $0x30] sm:$0xff]  }
0x12da   :  { %3274 = vmatprep.subr.bf16.mxu1 %v3812_v0 }
0x1360   :  { %v1786_v13 = vpop.xlane.xlu1 %1785 }
0x1361   :  { %v1790_v15 = vmul.f32 0.027777778, %v1786_v13 }
0x1362   :  { %v1789_v14 = vpop.xlane.xlu0 %1788 }
0x1363   :  { %v1791_v16 = vmul.f32 0.027777778, %v1789_v14  ;;  %v1804_v24 = vmul.f32 %v1790_v15, %v1790_v15  ;;  %v1802_v35 = vsub.f32 %v1782_v63, %v1790_v15 }
0x1364   :  { %v1799_v17 = vpop.xlane.xlu1 %1798 }
0x1365   :  { %v1805_v18 = vmul.f32 %v1791_v16, %v1791_v16  ;;  %v1801_v20 = vmul.f32 0.027777778, %v1799_v17  ;;  %v1803_v31 = vsub.f32 %v1783_v4, %v1791_v16 }
0x1366   :  { %v1796_v23 = vpop.xlane.xlu0 %1795 }
0x1367   :  { %v1807_v26 = vsub.f32 %v1801_v20, %v1805_v18  ;;  %v1800_v27 = vmul.f32 0.027777778, %v1796_v23 }
0x1369   :  { %v1809_v28 = vadd.f32 1e-05, %v1807_v26  ;;  %v1806_v29 = vsub.f32 %v1800_v27, %v1804_v24 }
0x136b   :  { %3462 = vrsqrt.f32 %v1809_v28  ;;  %v1808_v30 = vadd.f32 1e-05, %v1806_v29 }
0x136d   :  { %3464 = vrsqrt.f32 %v1808_v30 }
0x1375   :  { %v3463_v32 = vpop.eup %3462 }
0x1376   :  { %v1813_v36 = vmul.f32 %v3463_v32, %v1803_v31  ;;  %v2955_v31 = vld [vmem:[%s4662_s23 + $0x1] ss:$0 sm:$0xff] }
0x1377   :  { %v3465_v37 = vpop.eup %3464 }
0x1378   :  { %v1812_v38 = vmul.f32 %v3465_v37, %v1802_v35  ;;  %v1823_v39 = vmul.f32 %v2931_v34, %v1813_v36 }
0x137a   :  { %v1822_v41 = vmul.f32 %v2931_v34, %v1812_v38  ;;  %v1833_v43 = vadd.f32 %v2933_v40, %v1823_v39  ;;  %v2957_v38 = vld [vmem:[%s4663_s24 + $0x1] ss:$0 sm:$0xff] }
0x137c   :  { %v1832_v42 = vadd.f32 %v2933_v40, %v1822_v41 }
0x137e   :  { %v1834_v44 = vpack.c.bf16 %v1833_v43, %v1832_v42 }
0x1380   :  { %3263 = vmatmul.mubr.msk.bf16.vlgmr.msra.gmra.mrb[32].mxu1 %vm266_vm2, %v1834_v44 }
0x1381   :  { %3280 = vmatprep.mubr.msk.bf16.mxu1 %vm3813_vm0, %v3812_v0  ;;  %3275 = vmatpush3.bf16.msra.mxu1 %v3407_v9 }
0x1382   :  { %3276 = vmatprep.subr.bf16.mxu1 %v3812_v0 }
0x1385   :  { %3277 = vmatpush3.bf16.msra.mxu1 %v3408_v10 }
0x1386   :  { %3278 = vmatprep.subr.bf16.mxu1 %v3812_v0 }
0x1389   :  { %3279 = vmatpush3.bf16.msra.mxu1 %v2069_v22 }
0x138a   :  { %3296 = vmatprep.subr.bf16.mxu1 %v3812_v0 }
0x1453   :  { %v1904_v48 = vpop.f32.mrb[32].mxu1 }
0x1454   :  { %v1905_v49 = vadd.f32 %v2940_v47, %v1904_v48  ;;  %v3264_v50 = vpop.f32.mrb[33].mxu1 }
0x1455   :  { %v1907_v51 = vpop.f32.mrb[34].mxu1 }
0x1456   :  { %v1908_v52 = vadd.f32 %v2940_v47, %v1907_v51  ;;  %v3265_v53 = vpop.f32.mrb[35].mxu1  ;;  %v1911_v54 = vmax.f32 %v1905_v49, 0.0 }
0x1458   :  { %v1912_v55 = vmax.f32 %v1908_v52, 0.0 }
0x145a   :  { %v1913_v56 = vpack.c.bf16 %v1912_v55, %v1911_v54 }
0x145c   :  { %3271 = vmatmul.mubr.msk.bf16.vlgmr.msra.gmra.mrb[44].mxu0 %vm339_vm3, %v1913_v56 }
0x145d   :  { %3286 = vmatprep.mubr.msk.bf16.mxu0 %vm3813_vm0, %v3812_v0 }
0x152f   :  { %v1976_v3 = vpop.f32.mrb[44].mxu0 }
0x1530   :  { %v1977_v57 = vadd.f32 %v2950_v2, %v1976_v3  ;;  %v3272_v58 = vpop.f32.mrb[45].mxu0 }
0x1531   :  { %v1979_v59 = vpop.f32.mrb[46].mxu0 }
0x1532   :  { %v1983_v60 = vadd.f32 %v1977_v57, %v1832_v42  ;;  %v1980_v61 = vadd.f32 %v2950_v2, %v1979_v59  ;;  %v3273_v62 = vpop.f32.mrb[47].mxu0 }
0x1534   :  { %v1984_v63 = vadd.f32 %v1980_v61, %v1833_v43  ;;  %v1985_v1 = vsel %vm266_vm2, %v1983_v60, 0.0  ;;  %v1993_v4 = vmul.f32 %v1983_v60, %v1983_v60  ;;  %v2963_v43 = vld [vmem:[#allocation19 + $0x2] ss:$0 sm:$0xff] }
0x1535   :  { %1986 = vadd.xlane.f32.xlu0 %v1985_v1 }
0x1536   :  { %v1988_v5 = vsel %vm266_vm2, %v1984_v63, 0.0  ;;  %v1994_v6 = vmul.f32 %v1984_v63, %v1984_v63  ;;  %v1995_v7 = vsel %vm266_vm2, %v1993_v4, 0.0 }
0x1537   :  { %1989 = vadd.xlane.f32.xlu1 %v1988_v5 }
0x1538   :  { %v1998_v8 = vsel %vm266_vm2, %v1994_v6, 0.0 }
0x1539   :  { %1996 = vadd.xlane.f32.xlu0 %v1995_v7 }
0x153b   :  { %1999 = vadd.xlane.f32.xlu1 %v1998_v8 }
0x15c2   :  { %v1987_v11 = vpop.xlane.xlu0 %1986 }
0x15c3   :  { %v1991_v12 = vmul.f32 0.027777778, %v1987_v11 }
0x15c4   :  { %v1990_v13 = vpop.xlane.xlu1 %1989 }
0x15c5   :  { %v1992_v14 = vmul.f32 0.027777778, %v1990_v13  ;;  %v2005_v16 = vmul.f32 %v1991_v12, %v1991_v12  ;;  %v2003_v29 = vsub.f32 %v1983_v60, %v1991_v12 }
0x15c6   :  { %v1997_v15 = vpop.xlane.xlu0 %1996 }
0x15c7   :  { %v2001_v17 = vmul.f32 0.027777778, %v1997_v15  ;;  %v2006_v20 = vmul.f32 %v1992_v14, %v1992_v14  ;;  %v2004_v32 = vsub.f32 %v1984_v63, %v1992_v14 }
0x15c8   :  { %v2000_v18 = vpop.xlane.xlu1 %1999 }
0x15c9   :  { %v2007_v23 = vsub.f32 %v2001_v17, %v2005_v16  ;;  %v2002_v24 = vmul.f32 0.027777778, %v2000_v18 }
0x15cb   :  { %v2009_v26 = vadd.f32 1e-05, %v2007_v23  ;;  %v2008_v27 = vsub.f32 %v2002_v24, %v2006_v20 }
0x15cd   :  { %3466 = vrsqrt.f32 %v2009_v26  ;;  %v2010_v28 = vadd.f32 1e-05, %v2008_v27 }
0x15cf   :  { %3468 = vrsqrt.f32 %v2010_v28 }
0x15d7   :  { %v3467_v30 = vpop.eup %3466 }
0x15d8   :  { %v2013_v34 = vmul.f32 %v3467_v30, %v2003_v29 }
0x15d9   :  { %v3469_v35 = vpop.eup %3468 }
0x15da   :  { %v2014_v36 = vmul.f32 %v3469_v35, %v2004_v32  ;;  %v2023_v37 = vmul.f32 %v2955_v31, %v2013_v34 }
0x15dc   :  { %v2024_v39 = vmul.f32 %v2955_v31, %v2014_v36  ;;  %v4479_v40 = vadd.f32 %v2957_v38, %v2023_v37 }
0x15de   :  { %v4481_v41 = vadd.f32 %v2957_v38, %v2024_v39 }
0x15e0   :  { %v2035_v42 = vpack.c.bf16 %v4481_v41, %v4479_v40 }
0x15e2   :  { %3281 = vmatmul.mubr.msk.bf16.vlgmr.msra.gmra.mrb[36].mxu1 %vm266_vm2, %v2035_v42 }
0x15e3   :  { %3298 = vmatprep.mubr.msk.bf16.mxu1 %vm3813_vm0, %v3812_v0 }
0x16b5   :  { %v2105_v44 = vpop.f32.mrb[36].mxu1 }
0x16b6   :  { %v3282_v45 = vpop.f32.mrb[37].mxu1  ;;  %v2106_v47 = vadd.f32 %v2963_v43, %v2105_v44 }
0x16b7   :  { %v2108_v46 = vpop.f32.mrb[38].mxu1 }
0x16b8   :  { %v2109_v48 = vadd.f32 %v2963_v43, %v2108_v46  ;;  %v3283_v49 = vpop.f32.mrb[39].mxu1 }
0x16ba   :  { %v4488_v50 = vpack.c.bf16 %v2109_v48, %v2106_v47 }
0x16bc   :  { %2244 = vrot.lane.b32.xlu1 %v4488_v50, %s3814_s7  ;;  %2114 = vrot.lane.b32.xlu0 %v4488_v50, %s3815_s3 }
0x16c0   :  { %2242 = vrot.lane.b32.xlu1 %v4488_v50, %s3816_s12  ;;  %s4708_s12 = sld [smem:[#allocation43_spill]] }
0x172e   :  { %v2245_v51 = vpop.permute.xlu1 %2244  ;;  %v2115_v52 = vpop.permute.xlu0 %2114 }
0x172f   :  { %v2250_v53 = vsel %vm699_vm13, %v2245_v51, 0  ;;  %v2120_v54 = vsel %vm699_vm13, %v2115_v52, 0  ;;  %v3410_v51 = vld [vmem:[%s4654_s15 + $0x30] sm:$0xff]  }
0x1730   :  { %3285 = vmatpush3.bf16.xpose.msra.mxu0 %v2120_v54  ;;  %3297 = vmatpush3.bf16.xpose.msra.mxu1 %v2250_v53  ;;  %v3411_v53 = vld [vmem:[%s4654_s15 + $0x38] ss:$0 sps:$4 sm:$0x11]  }
0x1731   :  { %3290 = vmatprep.subr.bf16.mxu0 %v3812_v0  ;;  %3308 = vmatprep.subr.bf16.mxu1 %v3812_v0  ;;  %v2441_v54 = vsel %vm967_vm4, %v3411_v53, 0  ;;  %v2988_v53 = vld [vmem:[%s4661_s22 + $0x2] ss:$0 sm:$0xff] }
0x1732   :  { %v2243_v55 = vpop.permute.xlu1 %2242 }
0x1737   :  { %3287 = vmatmul.mubr.msk.bf16.vlgmr.msra.gmra.mrb[48].mxu0 %vm699_vm13, %v4488_v50  ;;  %3299 = vmatmul.mubr.msk.bf16.vlgmr.msra.gmra.mrb[40].mxu1 %vm699_vm13, %v2243_v55  ;;  %v3412_v55 = vld [vmem:[%s4654_s15 + $0x3c] sm:$0xff]  }
0x1738   :  { %3292 = vmatprep.mubr.msk.bf16.mxu0 %vm3813_vm0, %v3812_v0  ;;  %3312 = vmatprep.mubr.msk.bf16.mxu1 %vm3813_vm0, %v3812_v0 }
0x1739   :  { %3309 = vmatpush3.bf16.msra.mxu1 %v3412_v55 }
0x173a   :  { %3310 = vmatprep.subr.bf16.mxu1 %v3812_v0 }
0x180a   :  { %v2156_v56 = vpop.f32.mrb[48].mxu0  ;;  %v2286_v2 = vpop.f32.mrb[40].mxu1 }
0x180b   :  { %v2163_v3 = vmul.f32 0.23570226, %v2156_v56  ;;  %v3288_v57 = vpop.f32.mrb[49].mxu0  ;;  %v3300_v58 = vpop.f32.mrb[41].mxu1  ;;  %v2293_v61 = vmul.f32 0.23570226, %v2286_v2 }
0x180c   :  { %v2159_v59 = vpop.f32.mrb[50].mxu0  ;;  %v2289_v60 = vpop.f32.mrb[42].mxu1  ;;  %v3413_v56 = vld [vmem:[%s4654_s15 + $0x44] ss:$0 sps:$4 sm:$0x11]  }
0x180d   :  { %v2164_v62 = vmul.f32 0.23570226, %v2159_v59  ;;  %v3289_v63 = vpop.f32.mrb[51].mxu0  ;;  %v3301_v1 = vpop.f32.mrb[43].mxu1  ;;  %v2165_v4 = vadd.f32 %v2163_v3, %v4215_v25  ;;  %v2294_v7 = vmul.f32 0.23570226, %v2289_v60  ;;  %v2295_v9 = vadd.f32 %v2293_v61, %v4215_v25 }
0x180e   :  { %v2385_v2 = vsel %vm967_vm4, %v3413_v56, 0 }
0x180f   :  { %v2167_v5 = vsel %vm504_vm10, %v2165_v4, -inf  ;;  %v2166_v6 = vadd.f32 %v2164_v62, %v4218_v33  ;;  %v2297_v10 = vsel %vm504_vm10, %v2295_v9, -inf  ;;  %v2296_v21 = vadd.f32 %v2294_v7, %v4218_v33  ;;  %3311 = vmatpush3.bf16.msra.mxu1 %v2385_v2 }
0x1810   :  { %2168 = vmax.xlane.f32.xlu1 %v2167_v5  ;;  %3324 = vmatprep.subr.bf16.mxu1 %v3812_v0 }
0x1811   :  { %v2170_v8 = vsel %vm504_vm10, %v2166_v6, -inf  ;;  %v2300_v22 = vsel %vm504_vm10, %v2296_v21, -inf }
0x1812   :  { %2171 = vmax.xlane.f32.xlu0 %v2170_v8 }
0x1816   :  { %2298 = vmax.xlane.f32.xlu0 %v2297_v10  ;;  %v2984_v10 = vld [vmem:[#allocation20 + $0x2] ss:$0 sm:$0xff] }
0x181a   :  { %2301 = vmax.xlane.f32.xlu0 %v2300_v22 }
0x189d   :  { %v2169_v11 = vpop.xlane.xlu1 %2168 }
0x189e   :  { %v2173_v12 = vsub.f32 %v2165_v4, %v2169_v11 }
0x189f   :  { %v2172_v13 = vpop.xlane.xlu0 %2171 }
0x18a0   :  { %v2175_v14 = vmul.f32 1.442695, %v2173_v12  ;;  %v2174_v15 = vsub.f32 %v2166_v6, %v2172_v13 }
0x18a2   :  { %3470 = vpow2.f32 %v2175_v14  ;;  %v2177_v16 = vmul.f32 1.442695, %v2174_v15 }
0x18a3   :  { %v2299_v17 = vpop.xlane.xlu0 %2298 }
0x18a4   :  { %3472 = vpow2.f32 %v2177_v16  ;;  %v2303_v18 = vsub.f32 %v2295_v9, %v2299_v17 }
0x18a6   :  { %v2305_v25 = vmul.f32 1.442695, %v2303_v18 }
0x18a7   :  { %v2302_v20 = vpop.xlane.xlu0 %2301 }
0x18a8   :  { %3474 = vpow2.f32 %v2305_v25  ;;  %v2304_v23 = vsub.f32 %v2296_v21, %v2302_v20 }
0x18aa   :  { %v2307_v24 = vmul.f32 1.442695, %v2304_v23 }
0x18ac   :  { %v3471_v33 = vpop.eup %3470  ;;  %3476 = vpow2.f32 %v2307_v24 }
0x18ad   :  { %v2179_v26 = vsel %vm504_vm10, %v3471_v33, 0.0 }
0x18ae   :  { %v3473_v27 = vpop.eup %3472  ;;  %2180 = vadd.xlane.f32.xlu1 %v2179_v26  ;;  %v3416_v26 = vld [vmem:[%s4656_s17 + $0x38] ss:$0 sps:$4 sm:$0x33]  }
0x18af   :  { %v2182_v28 = vsel %vm504_vm10, %v3473_v27, 0.0 }
0x18b0   :  { %2183 = vadd.xlane.f32.xlu0 %v2182_v28 }
0x18b2   :  { %v3475_v29 = vpop.eup %3474 }
0x18b3   :  { %v2309_v30 = vsel %vm504_vm10, %v3475_v29, 0.0 }
0x18b4   :  { %2310 = vadd.xlane.f32.xlu1 %v2309_v30 }
0x18b6   :  { %v3477_v31 = vpop.eup %3476 }
0x18b7   :  { %v2312_v32 = vsel %vm504_vm10, %v3477_v31, 0.0 }
0x18b8   :  { %2313 = vadd.xlane.f32.xlu0 %v2312_v32 }
0x18c5   :  { %2190 = vrot.lane.b32.xlu1 %v4488_v50, %s3818_s26 }
0x18ce   :  { %2320 = vrot.lane.b32.xlu0 %v4488_v50, %s3819_s29 }
0x193b   :  { %v2181_v34 = vpop.xlane.xlu1 %2180 }
0x193c   :  { %3478 = vrcp.f32 %v2181_v34 }
0x193d   :  { %v2184_v35 = vpop.xlane.xlu0 %2183 }
0x193e   :  { %3480 = vrcp.f32 %v2184_v35 }
0x1941   :  { %v2311_v36 = vpop.xlane.xlu1 %2310 }
0x1942   :  { %3482 = vrcp.f32 %v2311_v36 }
0x1945   :  { %v2191_v37 = vpop.permute.xlu1 %2190  ;;  %v2314_v38 = vpop.xlane.xlu0 %2313 }
0x1946   :  { %v3479_v39 = vpop.eup %3478  ;;  %3484 = vrcp.f32 %v2314_v38  ;;  %3291 = vmatpush3.bf16.msra.mxu0 %v2191_v37 }
0x1947   :  { %3302 = vmatprep.subr.bf16.mxu0 %v3812_v0  ;;  %v2187_v43 = vmul.f32 %v3479_v39, %v3471_v33 }
0x1948   :  { %v3481_v42 = vpop.eup %3480 }
0x1949   :  { %v2188_v44 = vmul.f32 %v3481_v42, %v3473_v27  ;;  %v2321_v46 = vpop.permute.xlu0 %2320  ;;  %v2580_v27 = vsel %vm270_vm1, %v3416_v26, 0 }
0x194b   :  { %v2189_v45 = vpack.c.bf16 %v2188_v44, %v2187_v43 }
0x194c   :  { %v3483_v47 = vpop.eup %3482 }
0x194d   :  { %3293 = vmatmul.mubr.msk.bf16.vlgmr.msra.gmra.mrb[52].mxu0 %vm504_vm10, %v2189_v45  ;;  %v2317_v49 = vmul.f32 %v3483_v47, %v3475_v29  ;;  %v2986_v47 = vld [vmem:[%s4660_s21 + $0x2] ss:$0 sm:$0xff] }
0x194e   :  { %3303 = vmatpush3.bf16.msra.mxu0 %v2321_v46  ;;  %3304 = vmatprep.mubr.msk.bf16.mxu0 %vm3813_vm0, %v3812_v0 }
0x194f   :  { %3316 = vmatprep.subr.bf16.mxu0 %v3812_v0 }
0x1950   :  { %v3485_v48 = vpop.eup %3484 }
0x1951   :  { %v2318_v50 = vmul.f32 %v3485_v48, %v3477_v31 }
0x1953   :  { %v2319_v52 = vpack.c.bf16 %v2318_v50, %v2317_v49 }
0x1955   :  { %3305 = vmatmul.mubr.msk.bf16.vlgmr.msra.gmra.mrb[56].mxu0 %vm504_vm10, %v2319_v52 }
0x1956   :  { %3317 = vmatpush3.bf16.msra.mxu0 %v3410_v51  ;;  %3320 = vmatprep.mubr.msk.bf16.mxu0 %vm3813_vm0, %v3812_v0 }
0x1957   :  { %3318 = vmatprep.subr.bf16.mxu0 %v3812_v0 }
0x195a   :  { %3319 = vmatpush3.bf16.msra.mxu0 %v2441_v54 }
0x195b   :  { %3334 = vmatprep.subr.bf16.mxu0 %v3812_v0 }
0x1a20   :  { %v2230_v3 = vpop.f32.mrb[52].mxu0 }
0x1a21   :  { %v3294_v57 = vpop.f32.mrb[53].mxu0 }
0x1a22   :  { %v2233_v58 = vpop.f32.mrb[54].mxu0  ;;  %v3418_v57 = vld [vmem:[%s4658_s19 + $0x28] sm:$0xff]  }
0x1a23   :  { %v2237_v59 = vpack.c.bf16 %v2233_v58, %v2230_v3  ;;  %v3295_v60 = vpop.f32.mrb[55].mxu0  ;;  %v3417_v3 = vld [vmem:[%s4658_s19 + $0x20] sm:$0xff]  }
0x1a24   :  { %v2995_v58 = vld [vmem:[%s4657_s18 + $0x2] ss:$0 sm:$0xff]  ;;  %s3820_s18 = smov 4  }
0x1a25   :  { %3321 = vmatmul.mubr.msk.bf16.vlgmr.msra.gmra.mrb[60].mxu0 %vm699_vm13, %v2237_v59 }
0x1a26   :  { %3338 = vmatprep.mubr.msk.bf16.mxu0 %vm3813_vm0, %v3812_v0  ;;  %3335 = vmatpush3.bf16.msra.mxu0 %v3417_v3 }
0x1a27   :  { %3336 = vmatprep.subr.bf16.mxu0 %v3812_v0 }
0x1a28   :  { %v2360_v61 = vpop.f32.mrb[56].mxu0 }
0x1a29   :  { %v3306_v62 = vpop.f32.mrb[57].mxu0 }
0x1a2a   :  { %v2363_v63 = vpop.f32.mrb[58].mxu0  ;;  %3337 = vmatpush3.bf16.msra.mxu0 %v3418_v57 }
0x1a2b   :  { %v2367_v1 = vpack.c.bf16 %v2363_v63, %v2360_v61  ;;  %v3307_v4 = vpop.f32.mrb[59].mxu0 }
0x1a2d   :  { %3313 = vmatmul.mubr.msk.bf16.vlgmr.msra.gmra.mrb[44].mxu1 %vm699_vm13, %v2367_v1 }
0x1a2e   :  { %3330 = vmatprep.mubr.msk.bf16.mxu1 %vm3813_vm0, %v3812_v0 }
0x1af8   :  { %v2477_v5 = vpop.f32.mrb[60].mxu0 }
0x1af9   :  { %v3322_v6 = vpop.f32.mrb[61].mxu0 }
0x1afa   :  { %v2480_v7 = vpop.f32.mrb[62].mxu0 }
0x1afb   :  { %v3323_v8 = vpop.f32.mrb[63].mxu0 }
0x1b00   :  { %v2421_v9 = vpop.f32.mrb[44].mxu1 }
0x1b01   :  { %v2478_v21 = vadd.f32 %v2477_v5, %v2421_v9  ;;  %v3314_v22 = vpop.f32.mrb[45].mxu1 }
0x1b02   :  { %v2424_v11 = vpop.f32.mrb[46].mxu1 }
0x1b03   :  { %v2492_v12 = vadd.f32 %v2984_v10, %v2478_v21  ;;  %v2481_v13 = vadd.f32 %v2480_v7, %v2424_v11  ;;  %v3315_v14 = vpop.f32.mrb[47].mxu1  ;;  %v3005_v7 = vld [vmem:[%s4659_s20 + $0x2] ss:$0 sm:$0xff] }
0x1b05   :  { %v2494_v15 = vadd.f32 %v2492_v12, %v4479_v40  ;;  %v2493_v16 = vadd.f32 %v2984_v10, %v2481_v13  ;;  %v3414_v40 = vld [vmem:[%s4656_s17 + $0x28] sm:$0xff]  }
0x1b06   :  { %3325 = vmatpush3.bf16.msra.mxu1 %v3414_v40 }
0x1b07   :  { %v2495_v17 = vadd.f32 %v2493_v16, %v4481_v41  ;;  %v2496_v18 = vsel %vm266_vm2, %v2494_v15, 0.0  ;;  %v2504_v25 = vmul.f32 %v2494_v15, %v2494_v15  ;;  %3326 = vmatprep.subr.bf16.mxu1 %v3812_v0  ;;  %v3415_v41 = vld [vmem:[%s4656_s17 + $0x30] sm:$0xff]  }
0x1b08   :  { %2497 = vadd.xlane.f32.xlu1 %v2496_v18 }
0x1b09   :  { %v2499_v20 = vsel %vm266_vm2, %v2495_v17, 0.0  ;;  %v2505_v23 = vmul.f32 %v2495_v17, %v2495_v17  ;;  %v2506_v24 = vsel %vm266_vm2, %v2504_v25, 0.0 }
0x1b0a   :  { %2500 = vadd.xlane.f32.xlu0 %v2499_v20  ;;  %3327 = vmatpush3.bf16.msra.mxu1 %v3415_v41  ;;  %v3419_v20 = vld [vmem:[%s4708_s12] sm:$0xff]  }
0x1b0b   :  { %v2509_v33 = vsel %vm266_vm2, %v2505_v23, 0.0  ;;  %3328 = vmatprep.subr.bf16.mxu1 %v3812_v0  ;;  %v3420_v23 = vld [vmem:[%s4708_s12 + $0x8] sm:$0xff]  }
0x1b0c   :  { %2507 = vadd.xlane.f32.xlu1 %v2506_v24  ;;  %v3421_v24 = vld [vmem:[%s4708_s12 + $0x10] ss:$0 sps:$4 sm:$0x33]  }
0x1b0e   :  { %2510 = vadd.xlane.f32.xlu0 %v2509_v33  ;;  %3329 = vmatpush3.bf16.msra.mxu1 %v2580_v27 }
0x1b0f   :  { %3342 = vmatprep.subr.bf16.mxu1 %v3812_v0 }
0x1b95   :  { %v2498_v28 = vpop.xlane.xlu1 %2497 }
0x1b96   :  { %v2502_v29 = vmul.f32 0.027777778, %v2498_v28 }
0x1b97   :  { %v2501_v30 = vpop.xlane.xlu0 %2500 }
0x1b98   :  { %v2503_v31 = vmul.f32 0.027777778, %v2501_v30  ;;  %v2516_v34 = vmul.f32 %v2502_v29, %v2502_v29  ;;  %v2514_v45 = vsub.f32 %v2494_v15, %v2502_v29 }
0x1b99   :  { %v2508_v32 = vpop.xlane.xlu1 %2507 }
0x1b9a   :  { %v2512_v35 = vmul.f32 0.027777778, %v2508_v32  ;;  %v2517_v37 = vmul.f32 %v2503_v31, %v2503_v31  ;;  %v2515_v48 = vsub.f32 %v2495_v17, %v2503_v31 }
0x1b9b   :  { %v2511_v36 = vpop.xlane.xlu0 %2510 }
0x1b9c   :  { %v2518_v38 = vsub.f32 %v2512_v35, %v2516_v34  ;;  %v2513_v39 = vmul.f32 0.027777778, %v2511_v36 }
0x1b9e   :  { %v2520_v42 = vadd.f32 1e-05, %v2518_v38  ;;  %v2519_v43 = vsub.f32 %v2513_v39, %v2517_v37  ;;  %v3010_v39 = vld [vmem:[%s4662_s23 + $0x2] ss:$0 sm:$0xff]  ;;  %s3821_s23 = smov [#allocation22]  }
0x1b9f   :  { %s2835_s17 = sshll.u32 %s3821_s23, 4  ;;  %s2836_s17 = int_to_ptr.vmem [resolvable:$true] %s2835_s17 }
0x1ba0   :  { %3486 = vrsqrt.f32 %v2520_v42  ;;  %v2521_v44 = vadd.f32 1e-05, %v2519_v43  ;;  %p3763_p13 = scmp.lt.s32.totalorder %s2836_s17, %s2836_s17 }
0x1ba2   :  { %3488 = vrsqrt.f32 %v2521_v44 }
0x1baa   :  { %v3487_v46 = vpop.eup %3486 }
0x1bab   :  { %v2524_v49 = vmul.f32 %v3487_v46, %v2514_v45 }
0x1bac   :  { %v3489_v50 = vpop.eup %3488 }
0x1bad   :  { %v2525_v51 = vmul.f32 %v3489_v50, %v2515_v48  ;;  %v2534_v52 = vmul.f32 %v2986_v47, %v2524_v49 }
0x1baf   :  { %v2535_v54 = vmul.f32 %v2986_v47, %v2525_v51  ;;  %v2544_v55 = vadd.f32 %v2988_v53, %v2534_v52  ;;  %v3012_v47 = vld [vmem:[%s4663_s24 + $0x2] ss:$0 sm:$0xff]  ;;  %v3013_v52 = vld [vmem:[%s4709_s30] ss:$0 sm:$0xff]  ;;  %s3758_s24 = scalar_lea.vmem %s2836_s17, 256 }
0x1bb0   :  { %p3759_p12 = scmp.ne.s32.totalorder %s2836_s17, %s3758_s24  ;;  %p3764_p0 = scmp.lt.s32.totalorder %s3758_s24, %s3758_s24 }
0x1bb1   :  { %v2545_v56 = vadd.f32 %v2988_v53, %v2535_v54 }
0x1bb2   :  { %p3765_p1 = por %p3764_p0, %p3763_p13 }
0x1bb3   :  { %v2546_v2 = vpack.c.bf16 %v2545_v56, %v2544_v55 }
0x1bb4   :  { %p3766_p2 = pnand %p3765_p1, %p3759_p12 }
0x1bb5   :  { %3331 = vmatmul.mubr.msk.bf16.vlgmr.msra.gmra.mrb[48].mxu1 %vm266_vm2, %v2546_v2 }
0x1bb6   :  { %3348 = vmatprep.mubr.msk.bf16.mxu1 %vm3813_vm0, %v3812_v0  ;;  %3343 = vmatpush3.bf16.msra.mxu1 %v3419_v20  ;;  %vm2828_vm0 = vcmask 99360  }
0x1bb7   :  { %3344 = vmatprep.subr.bf16.mxu1 %v3812_v0 }
0x1bba   :  { %3345 = vmatpush3.bf16.msra.mxu1 %v3420_v23 }
0x1bbb   :  { %3346 = vmatprep.subr.bf16.mxu1 %v3812_v0 }
0x1c88   :  { %v2616_v59 = vpop.f32.mrb[48].mxu1 }
0x1c89   :  { %v2617_v60 = vadd.f32 %v2995_v58, %v2616_v59  ;;  %v3332_v61 = vpop.f32.mrb[49].mxu1 }
0x1c8a   :  { %v2619_v62 = vpop.f32.mrb[50].mxu1 }
0x1c8b   :  { %v2620_v63 = vadd.f32 %v2995_v58, %v2619_v62  ;;  %v3333_v1 = vpop.f32.mrb[51].mxu1  ;;  %v2623_v4 = vmax.f32 %v2617_v60, 0.0 }
0x1c8d   :  { %v2624_v5 = vmax.f32 %v2620_v63, 0.0 }
0x1c8f   :  { %v2625_v6 = vpack.c.bf16 %v2624_v5, %v2623_v4 }
0x1c91   :  { %3339 = vmatmul.mubr.msk.bf16.vlgmr.msra.gmra.mrb[64].mxu0 %vm339_vm3, %v2625_v6 }
0x1d64   :  { %v2688_v8 = vpop.f32.mrb[64].mxu0 }
0x1d65   :  { %v2689_v9 = vadd.f32 %v3005_v7, %v2688_v8  ;;  %v3340_v10 = vpop.f32.mrb[65].mxu0 }
0x1d66   :  { %v2691_v21 = vpop.f32.mrb[66].mxu0 }
0x1d67   :  { %v2695_v22 = vadd.f32 %v2689_v9, %v2544_v55  ;;  %v2692_v11 = vadd.f32 %v3005_v7, %v2691_v21  ;;  %v3341_v12 = vpop.f32.mrb[67].mxu0 }
0x1d69   :  { %v2696_v13 = vadd.f32 %v2692_v11, %v2545_v56  ;;  %v2697_v14 = vsel %vm266_vm2, %v2695_v22, 0.0  ;;  %v2705_v15 = vmul.f32 %v2695_v22, %v2695_v22 }
0x1d6a   :  { %2698 = vadd.xlane.f32.xlu1 %v2697_v14 }
0x1d6b   :  { %v2700_v16 = vsel %vm266_vm2, %v2696_v13, 0.0  ;;  %v2706_v17 = vmul.f32 %v2696_v13, %v2696_v13  ;;  %v2707_v18 = vsel %vm266_vm2, %v2705_v15, 0.0 }
0x1d6c   :  { %2701 = vadd.xlane.f32.xlu0 %v2700_v16 }
0x1d6d   :  { %v2710_v25 = vsel %vm266_vm2, %v2706_v17, 0.0 }
0x1d6e   :  { %2708 = vadd.xlane.f32.xlu1 %v2707_v18 }
0x1d70   :  { %2711 = vadd.xlane.f32.xlu0 %v2710_v25 }
0x1d7f   :  { %2825 = vrot.lane.b32.xlu1 %v4142_v19, %s3820_s18  ;;  %v2779_v19 = vsel %vm270_vm1, %v3421_v24, 0 }
0x1d80   :  { %3347 = vmatpush3.bf16.msra.mxu1 %v2779_v19 }
0x1df7   :  { %v2699_v33 = vpop.xlane.xlu1 %2698 }
0x1df8   :  { %v2703_v40 = vmul.f32 0.027777778, %v2699_v33 }
0x1df9   :  { %v2702_v41 = vpop.xlane.xlu0 %2701 }
0x1dfa   :  { %v2704_v26 = vmul.f32 0.027777778, %v2702_v41  ;;  %v2717_v28 = vmul.f32 %v2703_v40, %v2703_v40  ;;  %v2715_v0 = vsub.f32 %v2695_v22, %v2703_v40 }
0x1dfb   :  { %v2709_v27 = vpop.xlane.xlu1 %2708 }
0x1dfc   :  { %v2713_v29 = vmul.f32 0.027777778, %v2709_v27  ;;  %v2718_v31 = vmul.f32 %v2704_v26, %v2704_v26  ;;  %v2716_v42 = vsub.f32 %v2696_v13, %v2704_v26 }
0x1dfd   :  { %v2712_v30 = vpop.xlane.xlu0 %2711 }
0x1dfe   :  { %v2719_v32 = vsub.f32 %v2713_v29, %v2717_v28  ;;  %v2714_v34 = vmul.f32 0.027777778, %v2712_v30 }
0x1dff   :  { %v2826_v2 = vpop.permute.xlu1 %2825 }
0x1e00   :  { %v2721_v35 = vadd.f32 1e-05, %v2719_v32  ;;  %v2720_v36 = vsub.f32 %v2714_v34, %v2718_v31 }
0x1e02   :  { %3490 = vrsqrt.f32 %v2721_v35  ;;  %v2722_v37 = vadd.f32 1e-05, %v2720_v36 }
0x1e04   :  { %3492 = vrsqrt.f32 %v2722_v37 }
0x1e0c   :  { %v3491_v38 = vpop.eup %3490 }
0x1e0d   :  { %v2725_v43 = vmul.f32 %v3491_v38, %v2715_v0 }
0x1e0e   :  { %v3493_v44 = vpop.eup %3492 }
0x1e0f   :  { %v2726_v45 = vmul.f32 %v3493_v44, %v2716_v42  ;;  %v2735_v46 = vmul.f32 %v3010_v39, %v2725_v43 }
0x1e11   :  { %v2736_v48 = vmul.f32 %v3010_v39, %v2726_v45  ;;  %v2745_v49 = vadd.f32 %v3012_v47, %v2735_v46 }
0x1e13   :  { %v2746_v50 = vadd.f32 %v3012_v47, %v2736_v48 }
0x1e15   :  { %v2747_v51 = vpack.c.bf16 %v2746_v50, %v2745_v49 }
0x1e17   :  { %3349 = vmatmul.mubr.msk.bf16.vlgmr.msra.gmra.mrb[52].mxu1 %vm266_vm2, %v2747_v51 }
0x1eea   :  { %v2815_v53 = vpop.f32.mrb[52].mxu1 }
0x1eeb   :  { %v2816_v54 = vadd.f32 %v3013_v52, %v2815_v53  ;;  %v3350_v55 = vpop.f32.mrb[53].mxu1 }
0x1eec   :  { %v2818_v56 = vpop.f32.mrb[54].mxu1 }
0x1eed   :  { %2822 = vst [vmem:[#allocation22] sm:$0xff] %v2816_v54  ;;  %v2819_v3 = vadd.f32 %v3013_v52, %v2818_v56  ;;  %v3351_v57 = vpop.f32.mrb[55].mxu1 }
0x1eee   :  { %2829 = vst.msk [vmem:[#allocation22] sm:$0x3] %vm2828_vm0, %v2826_v2 }
0x1eef   :  { %2823 = vst [vmem:[#allocation22 + $0x8] sm:$0xff] %v2819_v3 }
0x1ef0   :  { %3769 = shalt.err (!%p3766_p2)
}
0x1ef1   :  { %s4710_s2 = sld [smem:[#allocation45_spill]] }
0x1ef7   :  { %s3770_s13 = scalar_lea.hbm %s4710_s2, 256 }
0x1ef8   :  { %p3771_p3 = scmp.ne.s32.totalorder %s4710_s2, %s3770_s13  ;;  %p3774_p4 = scmp.lt.u32.totalorder %s3770_s13, %s4710_s2 }
0x1efa   :  { %p3776_p5 = pnand %p3774_p4, %p3771_p3 }
0x1efc   :  { %3779 = shalt.err (!%p3776_p5)
}
0x1efd   :  { %2841 = dma.vmem_to_hbm [thread:$0]  %s2836_s17, 256, %s4710_s2, [#allocation4], %s3797_s6, %s3797_s6, %s3798_s11  }
0x1efe   :  { %3794 = dma.done.wait [#allocation4], 256  }
0x1eff   :  { %3795 = vsyncadd [#allocation4], 4294967040 }
0x1f00   :  { %2845 = vsyncpa [#allocation3], 1 }
0x1f01   :  { %2846 = vsyncpa [#allocation6], 1 }
0x1f02   :  { %2847 = vsyncpa [#allocation9], 1 }
0x1f03   :  { %2848 = vsyncpa [#allocation12], 1 }
0x1f04   :  { %2849 = vsyncpa [#allocation15], 1 }
0x1f05   :  { %2850 = vsyncpa [#allocation18], 1 }
0x1f06   :  { %2851 = vsyncpa [#allocation21], 1 }
0x1f07   :  { %2852 = vsyncpa [#allocation4], 1 }

</bundles_post_ra>
